<compile_context>
chip_gen: v6e
topology: v6e:2x2x1
jax: 0.10.0
libtpu: 0.0.40
codegen_flags: <defaults>
</compile_context>

<pallas_src>
import functools
import math

import jax
import jax.numpy as jnp
from jax.experimental import pallas as pl
from jax.experimental.pallas import tpu as pltpu

# ----------------------------- small BERT config ----------------------------
VOCAB = 100
MAX_POS = 16
TYPE_VOCAB = 2
HIDDEN = 32          # bert_config.hidden_size
NUM_HEADS = 4
HEAD_DIM = HIDDEN // NUM_HEADS
INTERMEDIATE = 64
NUM_BERT_LAYERS = 2
NUM_LABELS = 3
BATCH = 2
SEQ = 8
LN_EPS = 1e-12


# ------------------------------ in-kernel helpers ----------------------------
def _ln(x, g, b):
    mu = jnp.mean(x, axis=-1, keepdims=True)
    xc = x - mu
    var = jnp.mean(xc * xc, axis=-1, keepdims=True)
    return xc * jax.lax.rsqrt(var + LN_EPS) * g + b


def _gelu(y):
    # TODO(synk): exact erf-GELU (PyTorch BertIntermediate default); tanh
    # approximation used (~1e-3 deviation) to avoid relying on an erf lowering.
    return 0.5 * y * (1.0 + jnp.tanh(0.7978845608028654 * (y + 0.044715 * y * y * y)))


# ------------------------------- Pallas kernels ------------------------------
def _layernorm_kernel(x_ref, g_ref, b_ref, o_ref):
    o_ref[...] = _ln(x_ref[...], g_ref[...], b_ref[...])


def embed_layernorm(x2d, gamma, beta):
    return pl.pallas_call(
        _layernorm_kernel,
        out_shape=jax.ShapeDtypeStruct(x2d.shape, jnp.float32),
    )(x2d, gamma, beta)


def _bert_layer_kernel(x_ref, mask_ref, wqkv_ref, bqkv_ref, wo_ref, bo_ref,
                       ln1g_ref, ln1b_ref, wi_ref, bi_ref, wf_ref, bf_ref,
                       ln2g_ref, ln2b_ref, o_ref, ctx_sc, *, B, T, H, nh, dh):
    """One full BERT encoder layer, fully VMEM-resident (no grid)."""
    x = x_ref[...]                                                    # (B*T, H)
    qkv = jnp.dot(x, wqkv_ref[...],
                  preferred_element_type=jnp.float32) + bqkv_ref[...]  # (B*T, 3H)

    scale = 1.0 / math.sqrt(dh)
    for b in range(B):                      # static loops: heads are contiguous
        rows = slice(b * T, (b + 1) * T)    # 8-lane groups -> static slices only
        bias = mask_ref[b:b + 1, :]         # (1, T), broadcasts over query rows
        for h in range(nh):
            q = qkv[rows, h * dh:(h + 1) * dh]                         # (T, dh)
            k = qkv[rows, H + h * dh:H + (h + 1) * dh]                 # (T, dh)
            v = qkv[rows, 2 * H + h * dh:2 * H + (h + 1) * dh]         # (T, dh)
            s = jnp.dot(q, k.T, preferred_element_type=jnp.float32) * scale + bias
            m = jnp.max(s, axis=-1, keepdims=True)
            p = jnp.exp(s - m)
            p = p * pl.reciprocal(jnp.sum(p, axis=-1, keepdims=True), approx=False)
            ctx_sc[rows, h * dh:(h + 1) * dh] = jnp.dot(
                p, v, preferred_element_type=jnp.float32)

    attn = jnp.dot(ctx_sc[...], wo_ref[...],
                   preferred_element_type=jnp.float32) + bo_ref[...]
    h1 = _ln(attn + x, ln1g_ref[...], ln1b_ref[...])                  # residual+LN1
    inter = _gelu(jnp.dot(h1, wi_ref[...],
                          preferred_element_type=jnp.float32) + bi_ref[...])
    ffn = jnp.dot(inter, wf_ref[...],
                  preferred_element_type=jnp.float32) + bf_ref[...]
    o_ref[...] = _ln(ffn + h1, ln2g_ref[...], ln2b_ref[...])          # residual+LN2


def bert_layer(x2d, mask_bias, lp):
    M, H = x2d.shape
    B, T = mask_bias.shape
    return pl.pallas_call(
        functools.partial(_bert_layer_kernel, B=B, T=T, H=H,
                          nh=NUM_HEADS, dh=HEAD_DIM),
        out_shape=jax.ShapeDtypeStruct((M, H), jnp.float32),
        scratch_shapes=[pltpu.VMEM((M, H), jnp.float32)],
    )(x2d, mask_bias, lp["wqkv"], lp["bqkv"], lp["wo"], lp["bo"],
      lp["ln1_g"], lp["ln1_b"], lp["wi"], lp["bi"], lp["wf"], lp["bf"],
      lp["ln2_g"], lp["ln2_b"])


def _bilstm_layer_kernel(x_ref, wih_ref, whh_ref, b_ref, o_ref,
                         gx_ref, h_sc, c_sc, *, T, B, H):
    """Both LSTM directions in one call: grid axis d (0=fwd, 1=bwd/time-reversed)."""
    d = pl.program_id(0)
    wih = wih_ref[...]                      # (Din, 4H)   gate order i, f, g, o
    whh = whh_ref[...]                      # (H, 4H)
    bias = b_ref[...]                       # (1, 4H)

    # Hoisted input projection: one well-shaped (T*B, Din) @ (Din, 4H) matmul,
    # statically unpacked into a (T, B, 4H) scratch (off the serial path) so the
    # recurrent loop only indexes the leading (time) axis.
    gates_x = jnp.dot(x_ref[...], wih, preferred_element_type=jnp.float32) + bias
    for t in range(T):                      # static unpack
        gx_ref[t] = gates_x[t * B:(t + 1) * B, :]

    h_sc[...] = jnp.zeros_like(h_sc)
    c_sc[...] = jnp.zeros_like(c_sc)

    def step(t, carry):
        tt = t + d * (T - 1 - 2 * t)        # fwd: t ; bwd: T-1-t
        gates = gx_ref[tt] + jnp.dot(h_sc[...], whh,
                                     preferred_element_type=jnp.float32)   # (B, 4H)
        # One sigmoid + one tanh over the full (B, 4H) vreg (EUP slot), then
        # static lane slices for the gate recombination.
        sg = jax.nn.sigmoid(gates)
        th = jnp.tanh(gates)
        i = sg[:, 0:H]
        f = sg[:, H:2 * H]
        g = th[:, 2 * H:3 * H]
        o = sg[:, 3 * H:4 * H]
        c = f * c_sc[...] + i * g
        h = o * jnp.tanh(c)
        c_sc[...] = c
        h_sc[...] = h
        o_ref[tt] = h
        return carry

    jax.lax.fori_loop(0, T, step, 0, unroll=True)


def bilstm_layer(x_flat, w_ih, w_hh, b):
    """x_flat: (T*B, Din) time-major-flattened; weights stacked [fwd, bwd]."""
    TB, Din = x_flat.shape
    H = w_hh.shape[1]
    G = 4 * H
    B = BATCH
    T = TB // B
    return pl.pallas_call(
        functools.partial(_bilstm_layer_kernel, T=T, B=B, H=H),
        grid=(2,),
        in_specs=[
            pl.BlockSpec((TB, Din), lambda d: (0, 0)),            # shared input
            pl.BlockSpec((None, Din, G), lambda d: (d, 0, 0)),    # per-direction w_ih
            pl.BlockSpec((None, H, G), lambda d: (d, 0, 0)),      # per-direction w_hh
            pl.BlockSpec((None, 1, G), lambda d: (d, 0, 0)),      # per-direction bias
        ],
        out_specs=pl.BlockSpec((None, T, B, H), lambda d: (d, 0, 0, 0)),
        out_shape=jax.ShapeDtypeStruct((2, T, B, H), jnp.float32),
        scratch_shapes=[pltpu.VMEM((T, B, G), jnp.float32),       # hoisted gates_x
                        pltpu.VMEM((B, H), jnp.float32),          # h state
                        pltpu.VMEM((B, H), jnp.float32)],         # c state
        compiler_params=pltpu.CompilerParams(
            dimension_semantics=("parallel",)),                   # both v7x cores
    )(x_flat, w_ih, w_hh, b)


def _classifier_kernel(x_ref, wc_ref, bc_ref, o_ref, *, T, H):
    """Fused out[:, -1, :] slice + linear + softmax(dim=1)."""
    x = x_ref[...]                          # (2, T, B, H)
    f_last = x[0, T - 1]                    # (B, H) fwd hidden at last timestep
    b_last = x[1, T - 1]                    # (B, H) bwd hidden at last timestep
    logits = (jnp.dot(f_last, wc_ref[0:H, :], preferred_element_type=jnp.float32)
              + jnp.dot(b_last, wc_ref[H:2 * H, :], preferred_element_type=jnp.float32)
              + bc_ref[...])
    m = jnp.max(logits, axis=-1, keepdims=True)
    e = jnp.exp(logits - m)
    o_ref[...] = e * pl.reciprocal(jnp.sum(e, axis=-1, keepdims=True), approx=False)


def classifier_softmax(dirs, wc, bc):
    _, T, B, H = dirs.shape
    return pl.pallas_call(
        functools.partial(_classifier_kernel, T=T, H=H),
        out_shape=jax.ShapeDtypeStruct((B, wc.shape[1]), jnp.float32),
    )(dirs, wc, bc)


# ------------------------------- parameters ---------------------------------
def init_params(key):
    keys = iter(jax.random.split(key, 64))

    def nrm(shape, s=0.02):
        return (s * jax.random.normal(next(keys), shape)).astype(jnp.float32)

    params = {
        "word_emb": nrm((VOCAB, HIDDEN)),
        "pos_emb": nrm((MAX_POS, HIDDEN)),
        "type_emb": nrm((TYPE_VOCAB, HIDDEN)),
        "emb_ln_g": jnp.ones((1, HIDDEN), jnp.float32),
        "emb_ln_b": jnp.zeros((1, HIDDEN), jnp.float32),
        "layers": [],
        "lstm": [],
    }
    for _ in range(NUM_BERT_LAYERS):
        params["layers"].append({
            # fused QKV: columns [0:H]=Q, [H:2H]=K, [2H:3H]=V
            "wqkv": nrm((HIDDEN, 3 * HIDDEN)),
            "bqkv": jnp.zeros((1, 3 * HIDDEN), jnp.float32),
            "wo": nrm((HIDDEN, HIDDEN)), "bo": jnp.zeros((1, HIDDEN), jnp.float32),
            "ln1_g": jnp.ones((1, HIDDEN), jnp.float32),
            "ln1_b": jnp.zeros((1, HIDDEN), jnp.float32),
            "wi": nrm((HIDDEN, INTERMEDIATE)),
            "bi": jnp.zeros((1, INTERMEDIATE), jnp.float32),
            "wf": nrm((INTERMEDIATE, HIDDEN)),
            "bf": jnp.zeros((1, HIDDEN), jnp.float32),
            "ln2_g": jnp.ones((1, HIDDEN), jnp.float32),
            "ln2_b": jnp.zeros((1, HIDDEN), jnp.float32),
        })
    # 2-layer bidirectional LSTM; layer0 input = H, layer1 input = 2H.
    # Directions stacked on a leading axis: index 0 = fwd, 1 = bwd.
    for layer_idx in range(2):
        d_in = HIDDEN if layer_idx == 0 else 2 * HIDDEN
        params["lstm"].append({
            "w_ih": nrm((2, d_in, 4 * HIDDEN), 0.1),
            "w_hh": nrm((2, HIDDEN, 4 * HIDDEN), 0.1),
            "b": jnp.zeros((2, 1, 4 * HIDDEN), jnp.float32),   # b_ih + b_hh combined
        })
    params["wc"] = nrm((2 * HIDDEN, NUM_LABELS))
    params["bc"] = jnp.zeros((1, NUM_LABELS), jnp.float32)
    return params


# -------------------------------- forward -----------------------------------
def forward(params, input_ids, attention_mask, token_type_ids):
    B, T = input_ids.shape
    H = HIDDEN

    # ---- BERT embeddings (gather = plain-JAX glue) + layernorm kernel
    positions = jnp.arange(T, dtype=jnp.int32)
    emb = (jnp.take(params["word_emb"], input_ids, axis=0)
           + jnp.take(params["pos_emb"], positions, axis=0)[None, :, :]
           + jnp.take(params["type_emb"], token_type_ids, axis=0))
    h2d = embed_layernorm(emb.reshape(B * T, H),
                          params["emb_ln_g"], params["emb_ln_b"])

    # extended attention mask: (1 - mask) * -10000, kept 2-D (B, T)
    mask_bias = (1.0 - attention_mask.astype(jnp.float32)) * -10000.0

    # ---- BERT encoder: one fused pallas_call per layer
    for lp in params["layers"]:
        h2d = bert_layer(h2d, mask_bias, lp)

    # ---- 2-layer bidirectional LSTM (time-major, flattened to (T*B, Din))
    x_tm = h2d.reshape(B, T, H).transpose(1, 0, 2).reshape(T * B, H)
    dirs = None
    for lp in params["lstm"]:
        dirs = bilstm_layer(x_tm, lp["w_ih"], lp["w_hh"], lp["b"])   # (2, T, B, H)
        # input to the next layer: concat fwd/bwd on the feature axis
        x_tm = jnp.moveaxis(dirs, 0, 2).reshape(T * B, 2 * H)

    # ---- out[:, -1, :] slice + classifier + softmax(dim=1), fused
    return classifier_softmax(dirs, params["wc"], params["bc"])


# ---------------------------------- main -------------------------------------
if __name__ == "__main__":
    key = jax.random.PRNGKey(0)
    pkey, ikey = jax.random.split(key)
    params = init_params(pkey)

    input_ids = jax.random.randint(ikey, (BATCH, SEQ), 0, VOCAB, dtype=jnp.int32)
    attention_mask = jnp.ones((BATCH, SEQ), jnp.int32).at[1, 6:].set(0)
    token_type_ids = jnp.zeros((BATCH, SEQ), jnp.int32)

    probs = jax.jit(forward)(params, input_ids, attention_mask, token_type_ids)
    probs = jax.block_until_ready(probs)

    assert probs.shape == (BATCH, NUM_LABELS)
    assert bool(jnp.all(jnp.isfinite(probs)))
    assert bool(jnp.allclose(jnp.sum(probs, axis=1), 1.0, atol=1e-5))
    print("KERNEL_OK")
</pallas_src>

<mosaic_0001>
module attributes {stable_mosaic.version = 11 : i64} {
  func.func @_layernorm_kernel(%arg0: memref<16x32xf32, #tpu.memory_space<vmem>>, %arg1: memref<1x32xf32, #tpu.memory_space<vmem>>, %arg2: memref<1x32xf32, #tpu.memory_space<vmem>>, %arg3: memref<16x32xf32, #tpu.memory_space<vmem>>) attributes {dimension_semantics = [], scalar_prefetch = 0 : i64, scratch_operands = 0 : i64, tpu.core_type = #tpu.core_type<tc>} {
    %c0 = arith.constant 0 : index
    %c0_0 = arith.constant 0 : index
    %0 = vector.load %arg0[%c0, %c0_0] : memref<16x32xf32, #tpu.memory_space<vmem>>, vector<16x32xf32>
    %c0_1 = arith.constant 0 : index
    %c0_2 = arith.constant 0 : index
    %1 = vector.load %arg1[%c0_1, %c0_2] : memref<1x32xf32, #tpu.memory_space<vmem>>, vector<1x32xf32>
    %c0_3 = arith.constant 0 : index
    %c0_4 = arith.constant 0 : index
    %2 = vector.load %arg2[%c0_3, %c0_4] : memref<1x32xf32, #tpu.memory_space<vmem>>, vector<1x32xf32>
    %cst = arith.constant dense<0.000000e+00> : vector<16xf32>
    %3 = vector.multi_reduction <add>, %0, %cst [1] : vector<16x32xf32> to vector<16xf32>
    %4 = vector.shape_cast %3 : vector<16xf32> to vector<16x1xf32>
    %cst_5 = arith.constant 3.200000e+01 : f32
    %5 = vector.broadcast %cst_5 : f32 to vector<16x1xf32>
    %6 = arith.divf %4, %5 : vector<16x1xf32>
    %7 = vector.broadcast %6 : vector<16x1xf32> to vector<16x32xf32>
    %8 = arith.subf %0, %7 : vector<16x32xf32>
    %9 = arith.mulf %8, %8 : vector<16x32xf32>
    %cst_6 = arith.constant dense<0.000000e+00> : vector<16xf32>
    %10 = vector.multi_reduction <add>, %9, %cst_6 [1] : vector<16x32xf32> to vector<16xf32>
    %11 = vector.shape_cast %10 : vector<16xf32> to vector<16x1xf32>
    %cst_7 = arith.constant 3.200000e+01 : f32
    %12 = vector.broadcast %cst_7 : f32 to vector<16x1xf32>
    %13 = arith.divf %11, %12 : vector<16x1xf32>
    %cst_8 = arith.constant 9.99999996E-13 : f32
    %14 = vector.broadcast %cst_8 : f32 to vector<16x1xf32>
    %15 = arith.addf %13, %14 : vector<16x1xf32>
    %16 = math.rsqrt %15 : vector<16x1xf32>
    %17 = vector.broadcast %16 : vector<16x1xf32> to vector<16x32xf32>
    %18 = arith.mulf %8, %17 : vector<16x32xf32>
    %19 = vector.broadcast %1 : vector<1x32xf32> to vector<16x32xf32>
    %20 = arith.mulf %18, %19 : vector<16x32xf32>
    %21 = vector.broadcast %2 : vector<1x32xf32> to vector<16x32xf32>
    %22 = arith.addf %20, %21 : vector<16x32xf32>
    %c0_9 = arith.constant 0 : index
    %c0_10 = arith.constant 0 : index
    %23 = vector.load %arg3[%c0_9, %c0_10] : memref<16x32xf32, #tpu.memory_space<vmem>>, vector<16x32xf32>
    tpu.vector_store %arg3[%c0_9, %c0_10], %22 {strides = array<i32>} : memref<16x32xf32, #tpu.memory_space<vmem>>, vector<16x32xf32>,
    return
  }
}

module attributes {stable_mosaic.version = 11 : i64} {
  func.func @_bert_layer_kernel(%arg0: memref<16x32xf32, #tpu.memory_space<vmem>>, %arg1: memref<2x8xf32, #tpu.memory_space<vmem>>, %arg2: memref<32x96xf32, #tpu.memory_space<vmem>>, %arg3: memref<1x96xf32, #tpu.memory_space<vmem>>, %arg4: memref<32x32xf32, #tpu.memory_space<vmem>>, %arg5: memref<1x32xf32, #tpu.memory_space<vmem>>, %arg6: memref<1x32xf32, #tpu.memory_space<vmem>>, %arg7: memref<1x32xf32, #tpu.memory_space<vmem>>, %arg8: memref<32x64xf32, #tpu.memory_space<vmem>>, %arg9: memref<1x64xf32, #tpu.memory_space<vmem>>, %arg10: memref<64x32xf32, #tpu.memory_space<vmem>>, %arg11: memref<1x32xf32, #tpu.memory_space<vmem>>, %arg12: memref<1x32xf32, #tpu.memory_space<vmem>>, %arg13: memref<1x32xf32, #tpu.memory_space<vmem>>, %arg14: memref<16x32xf32, #tpu.memory_space<vmem>>, %arg15: memref<16x32xf32, #tpu.memory_space<vmem>>) attributes {dimension_semantics = [], scalar_prefetch = 0 : i64, scratch_operands = 1 : i64, tpu.core_type = #tpu.core_type<tc>} {
    %c0 = arith.constant 0 : index
    %c0_0 = arith.constant 0 : index
    %0 = vector.load %arg0[%c0, %c0_0] : memref<16x32xf32, #tpu.memory_space<vmem>>, vector<16x32xf32>
    %c0_1 = arith.constant 0 : index
    %c0_2 = arith.constant 0 : index
    %1 = vector.load %arg2[%c0_1, %c0_2] : memref<32x96xf32, #tpu.memory_space<vmem>>, vector<32x96xf32>
    %cst = arith.constant dense<0.000000e+00> : vector<16x96xf32>
    %2 = tpu.matmul %0, %1, %cst {dimension_numbers = #tpu.dot_dimension_numbers<[1], [0], [0], [1], [0, 0, 1, 1], [], []>} : vector<16x32xf32>, vector<32x96xf32>, vector<16x96xf32> -> vector<16x96xf32>
    %c0_3 = arith.constant 0 : index
    %c0_4 = arith.constant 0 : index
    %3 = vector.load %arg3[%c0_3, %c0_4] : memref<1x96xf32, #tpu.memory_space<vmem>>, vector<1x96xf32>
    %4 = vector.broadcast %3 : vector<1x96xf32> to vector<16x96xf32>
    %5 = arith.addf %2, %4 : vector<16x96xf32>
    %c0_5 = arith.constant 0 : index
    %c0_6 = arith.constant 0 : index
    %6 = vector.load %arg1[%c0_5, %c0_6] : memref<2x8xf32, #tpu.memory_space<vmem>>, vector<1x8xf32>
    %7 = vector.extract_strided_slice %5 {offsets = [0, 0], sizes = [8, 8], strides = [1, 1]} : vector<16x96xf32> to vector<8x8xf32>
    %8 = vector.extract_strided_slice %5 {offsets = [0, 32], sizes = [8, 8], strides = [1, 1]} : vector<16x96xf32> to vector<8x8xf32>
    %9 = vector.extract_strided_slice %5 {offsets = [0, 64], sizes = [8, 8], strides = [1, 1]} : vector<16x96xf32> to vector<8x8xf32>
    %10 = tpu.transpose %8, [1, 0] : vector<8x8xf32> -> vector<8x8xf32>
    %cst_7 = arith.constant dense<0.000000e+00> : vector<8x8xf32>
    %11 = tpu.matmul %7, %10, %cst_7 {dimension_numbers = #tpu.dot_dimension_numbers<[1], [0], [0], [1], [0, 0, 1, 1], [], []>} : vector<8x8xf32>, vector<8x8xf32>, vector<8x8xf32> -> vector<8x8xf32>
    %cst_8 = arith.constant 0.353553385 : f32
    %12 = vector.broadcast %cst_8 : f32 to vector<8x8xf32>
    %13 = arith.mulf %11, %12 : vector<8x8xf32>
    %14 = vector.broadcast %6 : vector<1x8xf32> to vector<8x8xf32>
    %15 = arith.addf %13, %14 : vector<8x8xf32>
    %cst_9 = arith.constant dense<0xFF800000> : vector<8xf32>
    %16 = vector.multi_reduction <maximumf>, %15, %cst_9 [1] : vector<8x8xf32> to vector<8xf32>
    %17 = vector.shape_cast %16 : vector<8xf32> to vector<8x1xf32>
    %18 = vector.broadcast %17 : vector<8x1xf32> to vector<8x8xf32>
    %19 = arith.subf %15, %18 : vector<8x8xf32>
    %20 = math.exp %19 : vector<8x8xf32>
    %cst_10 = arith.constant dense<0.000000e+00> : vector<8xf32>
    %21 = vector.multi_reduction <add>, %20, %cst_10 [1] : vector<8x8xf32> to vector<8xf32>
    %22 = vector.shape_cast %21 : vector<8xf32> to vector<8x1xf32>
    %23 = tpu.reciprocal %22 : vector<8x1xf32> -> vector<8x1xf32>
    %24 = vector.broadcast %23 : vector<8x1xf32> to vector<8x8xf32>
    %25 = arith.mulf %20, %24 : vector<8x8xf32>
    %cst_11 = arith.constant dense<0.000000e+00> : vector<8x8xf32>
    %26 = tpu.matmul %25, %9, %cst_11 {dimension_numbers = #tpu.dot_dimension_numbers<[1], [0], [0], [1], [0, 0, 1, 1], [], []>} : vector<8x8xf32>, vector<8x8xf32>, vector<8x8xf32> -> vector<8x8xf32>
    %c0_12 = arith.constant 0 : index
    %c0_13 = arith.constant 0 : index
    %27 = vector.load %arg15[%c0_12, %c0_13] : memref<16x32xf32, #tpu.memory_space<vmem>>, vector<8x8xf32>
    tpu.vector_store %arg15[%c0_12, %c0_13], %26 {strides = array<i32>} : memref<16x32xf32, #tpu.memory_space<vmem>>, vector<8x8xf32>,
    %28 = vector.extract_strided_slice %5 {offsets = [0, 8], sizes = [8, 8], strides = [1, 1]} : vector<16x96xf32> to vector<8x8xf32>
    %29 = vector.extract_strided_slice %5 {offsets = [0, 40], sizes = [8, 8], strides = [1, 1]} : vector<16x96xf32> to vector<8x8xf32>
    %30 = vector.extract_strided_slice %5 {offsets = [0, 72], sizes = [8, 8], strides = [1, 1]} : vector<16x96xf32> to vector<8x8xf32>
    %31 = tpu.transpose %29, [1, 0] : vector<8x8xf32> -> vector<8x8xf32>
    %cst_14 = arith.constant dense<0.000000e+00> : vector<8x8xf32>
    %32 = tpu.matmul %28, %31, %cst_14 {dimension_numbers = #tpu.dot_dimension_numbers<[1], [0], [0], [1], [0, 0, 1, 1], [], []>} : vector<8x8xf32>, vector<8x8xf32>, vector<8x8xf32> -> vector<8x8xf32>
    %cst_15 = arith.constant 0.353553385 : f32
    %33 = vector.broadcast %cst_15 : f32 to vector<8x8xf32>
    %34 = arith.mulf %32, %33 : vector<8x8xf32>
    %35 = vector.broadcast %6 : vector<1x8xf32> to vector<8x8xf32>
    %36 = arith.addf %34, %35 : vector<8x8xf32>
    %cst_16 = arith.constant dense<0xFF800000> : vector<8xf32>
    %37 = vector.multi_reduction <maximumf>, %36, %cst_16 [1] : vector<8x8xf32> to vector<8xf32>
    %38 = vector.shape_cast %37 : vector<8xf32> to vector<8x1xf32>
    %39 = vector.broadcast %38 : vector<8x1xf32> to vector<8x8xf32>
    %40 = arith.subf %36, %39 : vector<8x8xf32>
    %41 = math.exp %40 : vector<8x8xf32>
    %cst_17 = arith.constant dense<0.000000e+00> : vector<8xf32>
    %42 = vector.multi_reduction <add>, %41, %cst_17 [1] : vector<8x8xf32> to vector<8xf32>
    %43 = vector.shape_cast %42 : vector<8xf32> to vector<8x1xf32>
    %44 = tpu.reciprocal %43 : vector<8x1xf32> -> vector<8x1xf32>
    %45 = vector.broadcast %44 : vector<8x1xf32> to vector<8x8xf32>
    %46 = arith.mulf %41, %45 : vector<8x8xf32>
    %cst_18 = arith.constant dense<0.000000e+00> : vector<8x8xf32>
    %47 = tpu.matmul %46, %30, %cst_18 {dimension_numbers = #tpu.dot_dimension_numbers<[1], [0], [0], [1], [0, 0, 1, 1], [], []>} : vector<8x8xf32>, vector<8x8xf32>, vector<8x8xf32> -> vector<8x8xf32>
    %c0_19 = arith.constant 0 : index
    %c8 = arith.constant 8 : index
    %48 = vector.load %arg15[%c0_19, %c8] : memref<16x32xf32, #tpu.memory_space<vmem>>, vector<8x8xf32>
    tpu.vector_store %arg15[%c0_19, %c8], %47 {strides = array<i32>} : memref<16x32xf32, #tpu.memory_space<vmem>>, vector<8x8xf32>,
    %49 = vector.extract_strided_slice %5 {offsets = [0, 16], sizes = [8, 8], strides = [1, 1]} : vector<16x96xf32> to vector<8x8xf32>
    %50 = vector.extract_strided_slice %5 {offsets = [0, 48], sizes = [8, 8], strides = [1, 1]} : vector<16x96xf32> to vector<8x8xf32>
    %51 = vector.extract_strided_slice %5 {offsets = [0, 80], sizes = [8, 8], strides = [1, 1]} : vector<16x96xf32> to vector<8x8xf32>
    %52 = tpu.transpose %50, [1, 0] : vector<8x8xf32> -> vector<8x8xf32>
    %cst_20 = arith.constant dense<0.000000e+00> : vector<8x8xf32>
    %53 = tpu.matmul %49, %52, %cst_20 {dimension_numbers = #tpu.dot_dimension_numbers<[1], [0], [0], [1], [0, 0, 1, 1], [], []>} : vector<8x8xf32>, vector<8x8xf32>, vector<8x8xf32> -> vector<8x8xf32>
    %cst_21 = arith.constant 0.353553385 : f32
    %54 = vector.broadcast %cst_21 : f32 to vector<8x8xf32>
    %55 = arith.mulf %53, %54 : vector<8x8xf32>
    %56 = vector.broadcast %6 : vector<1x8xf32> to vector<8x8xf32>
    %57 = arith.addf %55, %56 : vector<8x8xf32>
    %cst_22 = arith.constant dense<0xFF800000> : vector<8xf32>
    %58 = vector.multi_reduction <maximumf>, %57, %cst_22 [1] : vector<8x8xf32> to vector<8xf32>
    %59 = vector.shape_cast %58 : vector<8xf32> to vector<8x1xf32>
    %60 = vector.broadcast %59 : vector<8x1xf32> to vector<8x8xf32>
    %61 = arith.subf %57, %60 : vector<8x8xf32>
    %62 = math.exp %61 : vector<8x8xf32>
    %cst_23 = arith.constant dense<0.000000e+00> : vector<8xf32>
    %63 = vector.multi_reduction <add>, %62, %cst_23 [1] : vector<8x8xf32> to vector<8xf32>
    %64 = vector.shape_cast %63 : vector<8xf32> to vector<8x1xf32>
    %65 = tpu.reciprocal %64 : vector<8x1xf32> -> vector<8x1xf32>
    %66 = vector.broadcast %65 : vector<8x1xf32> to vector<8x8xf32>
    %67 = arith.mulf %62, %66 : vector<8x8xf32>
    %cst_24 = arith.constant dense<0.000000e+00> : vector<8x8xf32>
    %68 = tpu.matmul %67, %51, %cst_24 {dimension_numbers = #tpu.dot_dimension_numbers<[1], [0], [0], [1], [0, 0, 1, 1], [], []>} : vector<8x8xf32>, vector<8x8xf32>, vector<8x8xf32> -> vector<8x8xf32>
    %c0_25 = arith.constant 0 : index
    %c16 = arith.constant 16 : index
    %69 = vector.load %arg15[%c0_25, %c16] : memref<16x32xf32, #tpu.memory_space<vmem>>, vector<8x8xf32>
    tpu.vector_store %arg15[%c0_25, %c16], %68 {strides = array<i32>} : memref<16x32xf32, #tpu.memory_space<vmem>>, vector<8x8xf32>,
    %70 = vector.extract_strided_slice %5 {offsets = [0, 24], sizes = [8, 8], strides = [1, 1]} : vector<16x96xf32> to vector<8x8xf32>
    %71 = vector.extract_strided_slice %5 {offsets = [0, 56], sizes = [8, 8], strides = [1, 1]} : vector<16x96xf32> to vector<8x8xf32>
    %72 = vector.extract_strided_slice %5 {offsets = [0, 88], sizes = [8, 8], strides = [1, 1]} : vector<16x96xf32> to vector<8x8xf32>
    %73 = tpu.transpose %71, [1, 0] : vector<8x8xf32> -> vector<8x8xf32>
    %cst_26 = arith.constant dense<0.000000e+00> : vector<8x8xf32>
    %74 = tpu.matmul %70, %73, %cst_26 {dimension_numbers = #tpu.dot_dimension_numbers<[1], [0], [0], [1], [0, 0, 1, 1], [], []>} : vector<8x8xf32>, vector<8x8xf32>, vector<8x8xf32> -> vector<8x8xf32>
    %cst_27 = arith.constant 0.353553385 : f32
    %75 = vector.broadcast %cst_27 : f32 to vector<8x8xf32>
    %76 = arith.mulf %74, %75 : vector<8x8xf32>
    %77 = vector.broadcast %6 : vector<1x8xf32> to vector<8x8xf32>
    %78 = arith.addf %76, %77 : vector<8x8xf32>
    %cst_28 = arith.constant dense<0xFF800000> : vector<8xf32>
    %79 = vector.multi_reduction <maximumf>, %78, %cst_28 [1] : vector<8x8xf32> to vector<8xf32>
    %80 = vector.shape_cast %79 : vector<8xf32> to vector<8x1xf32>
    %81 = vector.broadcast %80 : vector<8x1xf32> to vector<8x8xf32>
    %82 = arith.subf %78, %81 : vector<8x8xf32>
    %83 = math.exp %82 : vector<8x8xf32>
    %cst_29 = arith.constant dense<0.000000e+00> : vector<8xf32>
    %84 = vector.multi_reduction <add>, %83, %cst_29 [1] : vector<8x8xf32> to vector<8xf32>
    %85 = vector.shape_cast %84 : vector<8xf32> to vector<8x1xf32>
    %86 = tpu.reciprocal %85 : vector<8x1xf32> -> vector<8x1xf32>
    %87 = vector.broadcast %86 : vector<8x1xf32> to vector<8x8xf32>
    %88 = arith.mulf %83, %87 : vector<8x8xf32>
    %cst_30 = arith.constant dense<0.000000e+00> : vector<8x8xf32>
    %89 = tpu.matmul %88, %72, %cst_30 {dimension_numbers = #tpu.dot_dimension_numbers<[1], [0], [0], [1], [0, 0, 1, 1], [], []>} : vector<8x8xf32>, vector<8x8xf32>, vector<8x8xf32> -> vector<8x8xf32>
    %c0_31 = arith.constant 0 : index
    %c24 = arith.constant 24 : index
    %90 = vector.load %arg15[%c0_31, %c24] : memref<16x32xf32, #tpu.memory_space<vmem>>, vector<8x8xf32>
    tpu.vector_store %arg15[%c0_31, %c24], %89 {strides = array<i32>} : memref<16x32xf32, #tpu.memory_space<vmem>>, vector<8x8xf32>,
    %c1 = arith.constant 1 : index
    %c0_32 = arith.constant 0 : index
    %91 = vector.load %arg1[%c1, %c0_32] : memref<2x8xf32, #tpu.memory_space<vmem>>, vector<1x8xf32>
    %92 = vector.extract_strided_slice %5 {offsets = [8, 0], sizes = [8, 8], strides = [1, 1]} : vector<16x96xf32> to vector<8x8xf32>
    %93 = vector.extract_strided_slice %5 {offsets = [8, 32], sizes = [8, 8], strides = [1, 1]} : vector<16x96xf32> to vector<8x8xf32>
    %94 = vector.extract_strided_slice %5 {offsets = [8, 64], sizes = [8, 8], strides = [1, 1]} : vector<16x96xf32> to vector<8x8xf32>
    %95 = tpu.transpose %93, [1, 0] : vector<8x8xf32> -> vector<8x8xf32>
    %cst_33 = arith.constant dense<0.000000e+00> : vector<8x8xf32>
    %96 = tpu.matmul %92, %95, %cst_33 {dimension_numbers = #tpu.dot_dimension_numbers<[1], [0], [0], [1], [0, 0, 1, 1], [], []>} : vector<8x8xf32>, vector<8x8xf32>, vector<8x8xf32> -> vector<8x8xf32>
    %cst_34 = arith.constant 0.353553385 : f32
    %97 = vector.broadcast %cst_34 : f32 to vector<8x8xf32>
    %98 = arith.mulf %96, %97 : vector<8x8xf32>
    %99 = vector.broadcast %91 : vector<1x8xf32> to vector<8x8xf32>
    %100 = arith.addf %98, %99 : vector<8x8xf32>
    %cst_35 = arith.constant dense<0xFF800000> : vector<8xf32>
    %101 = vector.multi_reduction <maximumf>, %100, %cst_35 [1] : vector<8x8xf32> to vector<8xf32>
    %102 = vector.shape_cast %101 : vector<8xf32> to vector<8x1xf32>
    %103 = vector.broadcast %102 : vector<8x1xf32> to vector<8x8xf32>
    %104 = arith.subf %100, %103 : vector<8x8xf32>
    %105 = math.exp %104 : vector<8x8xf32>
    %cst_36 = arith.constant dense<0.000000e+00> : vector<8xf32>
    %106 = vector.multi_reduction <add>, %105, %cst_36 [1] : vector<8x8xf32> to vector<8xf32>
    %107 = vector.shape_cast %106 : vector<8xf32> to vector<8x1xf32>
    %108 = tpu.reciprocal %107 : vector<8x1xf32> -> vector<8x1xf32>
    %109 = vector.broadcast %108 : vector<8x1xf32> to vector<8x8xf32>
    %110 = arith.mulf %105, %109 : vector<8x8xf32>
    %cst_37 = arith.constant dense<0.000000e+00> : vector<8x8xf32>
    %111 = tpu.matmul %110, %94, %cst_37 {dimension_numbers = #tpu.dot_dimension_numbers<[1], [0], [0], [1], [0, 0, 1, 1], [], []>} : vector<8x8xf32>, vector<8x8xf32>, vector<8x8xf32> -> vector<8x8xf32>
    %c8_38 = arith.constant 8 : index
    %c0_39 = arith.constant 0 : index
    %112 = vector.load %arg15[%c8_38, %c0_39] : memref<16x32xf32, #tpu.memory_space<vmem>>, vector<8x8xf32>
    tpu.vector_store %arg15[%c8_38, %c0_39], %111 {strides = array<i32>} : memref<16x32xf32, #tpu.memory_space<vmem>>, vector<8x8xf32>,
    %113 = vector.extract_strided_slice %5 {offsets = [8, 8], sizes = [8, 8], strides = [1, 1]} : vector<16x96xf32> to vector<8x8xf32>
    %114 = vector.extract_strided_slice %5 {offsets = [8, 40], sizes = [8, 8], strides = [1, 1]} : vector<16x96xf32> to vector<8x8xf32>
    %115 = vector.extract_strided_slice %5 {offsets = [8, 72], sizes = [8, 8], strides = [1, 1]} : vector<16x96xf32> to vector<8x8xf32>
    %116 = tpu.transpose %114, [1, 0] : vector<8x8xf32> -> vector<8x8xf32>
    %cst_40 = arith.constant dense<0.000000e+00> : vector<8x8xf32>
    %117 = tpu.matmul %113, %116, %cst_40 {dimension_numbers = #tpu.dot_dimension_numbers<[1], [0], [0], [1], [0, 0, 1, 1], [], []>} : vector<8x8xf32>, vector<8x8xf32>, vector<8x8xf32> -> vector<8x8xf32>
    %cst_41 = arith.constant 0.353553385 : f32
    %118 = vector.broadcast %cst_41 : f32 to vector<8x8xf32>
    %119 = arith.mulf %117, %118 : vector<8x8xf32>
    %120 = vector.broadcast %91 : vector<1x8xf32> to vector<8x8xf32>
    %121 = arith.addf %119, %120 : vector<8x8xf32>
    %cst_42 = arith.constant dense<0xFF800000> : vector<8xf32>
    %122 = vector.multi_reduction <maximumf>, %121, %cst_42 [1] : vector<8x8xf32> to vector<8xf32>
    %123 = vector.shape_cast %122 : vector<8xf32> to vector<8x1xf32>
    %124 = vector.broadcast %123 : vector<8x1xf32> to vector<8x8xf32>
    %125 = arith.subf %121, %124 : vector<8x8xf32>
    %126 = math.exp %125 : vector<8x8xf32>
    %cst_43 = arith.constant dense<0.000000e+00> : vector<8xf32>
    %127 = vector.multi_reduction <add>, %126, %cst_43 [1] : vector<8x8xf32> to vector<8xf32>
    %128 = vector.shape_cast %127 : vector<8xf32> to vector<8x1xf32>
    %129 = tpu.reciprocal %128 : vector<8x1xf32> -> vector<8x1xf32>
    %130 = vector.broadcast %129 : vector<8x1xf32> to vector<8x8xf32>
    %131 = arith.mulf %126, %130 : vector<8x8xf32>
    %cst_44 = arith.constant dense<0.000000e+00> : vector<8x8xf32>
    %132 = tpu.matmul %131, %115, %cst_44 {dimension_numbers = #tpu.dot_dimension_numbers<[1], [0], [0], [1], [0, 0, 1, 1], [], []>} : vector<8x8xf32>, vector<8x8xf32>, vector<8x8xf32> -> vector<8x8xf32>
    %c8_45 = arith.constant 8 : index
    %c8_46 = arith.constant 8 : index
    %133 = vector.load %arg15[%c8_45, %c8_46] : memref<16x32xf32, #tpu.memory_space<vmem>>, vector<8x8xf32>
    tpu.vector_store %arg15[%c8_45, %c8_46], %132 {strides = array<i32>} : memref<16x32xf32, #tpu.memory_space<vmem>>, vector<8x8xf32>,
    %134 = vector.extract_strided_slice %5 {offsets = [8, 16], sizes = [8, 8], strides = [1, 1]} : vector<16x96xf32> to vector<8x8xf32>
    %135 = vector.extract_strided_slice %5 {offsets = [8, 48], sizes = [8, 8], strides = [1, 1]} : vector<16x96xf32> to vector<8x8xf32>
    %136 = vector.extract_strided_slice %5 {offsets = [8, 80], sizes = [8, 8], strides = [1, 1]} : vector<16x96xf32> to vector<8x8xf32>
    %137 = tpu.transpose %135, [1, 0] : vector<8x8xf32> -> vector<8x8xf32>
    %cst_47 = arith.constant dense<0.000000e+00> : vector<8x8xf32>
    %138 = tpu.matmul %134, %137, %cst_47 {dimension_numbers = #tpu.dot_dimension_numbers<[1], [0], [0], [1], [0, 0, 1, 1], [], []>} : vector<8x8xf32>, vector<8x8xf32>, vector<8x8xf32> -> vector<8x8xf32>
    %cst_48 = arith.constant 0.353553385 : f32
    %139 = vector.broadcast %cst_48 : f32 to vector<8x8xf32>
    %140 = arith.mulf %138, %139 : vector<8x8xf32>
    %141 = vector.broadcast %91 : vector<1x8xf32> to vector<8x8xf32>
    %142 = arith.addf %140, %141 : vector<8x8xf32>
    %cst_49 = arith.constant dense<0xFF800000> : vector<8xf32>
    %143 = vector.multi_reduction <maximumf>, %142, %cst_49 [1] : vector<8x8xf32> to vector<8xf32>
    %144 = vector.shape_cast %143 : vector<8xf32> to vector<8x1xf32>
    %145 = vector.broadcast %144 : vector<8x1xf32> to vector<8x8xf32>
    %146 = arith.subf %142, %145 : vector<8x8xf32>
    %147 = math.exp %146 : vector<8x8xf32>
    %cst_50 = arith.constant dense<0.000000e+00> : vector<8xf32>
    %148 = vector.multi_reduction <add>, %147, %cst_50 [1] : vector<8x8xf32> to vector<8xf32>
    %149 = vector.shape_cast %148 : vector<8xf32> to vector<8x1xf32>
    %150 = tpu.reciprocal %149 : vector<8x1xf32> -> vector<8x1xf32>
    %151 = vector.broadcast %150 : vector<8x1xf32> to vector<8x8xf32>
    %152 = arith.mulf %147, %151 : vector<8x8xf32>
    %cst_51 = arith.constant dense<0.000000e+00> : vector<8x8xf32>
    %153 = tpu.matmul %152, %136, %cst_51 {dimension_numbers = #tpu.dot_dimension_numbers<[1], [0], [0], [1], [0, 0, 1, 1], [], []>} : vector<8x8xf32>, vector<8x8xf32>, vector<8x8xf32> -> vector<8x8xf32>
    %c8_52 = arith.constant 8 : index
    %c16_53 = arith.constant 16 : index
    %154 = vector.load %arg15[%c8_52, %c16_53] : memref<16x32xf32, #tpu.memory_space<vmem>>, vector<8x8xf32>
    tpu.vector_store %arg15[%c8_52, %c16_53], %153 {strides = array<i32>} : memref<16x32xf32, #tpu.memory_space<vmem>>, vector<8x8xf32>,
    %155 = vector.extract_strided_slice %5 {offsets = [8, 24], sizes = [8, 8], strides = [1, 1]} : vector<16x96xf32> to vector<8x8xf32>
    %156 = vector.extract_strided_slice %5 {offsets = [8, 56], sizes = [8, 8], strides = [1, 1]} : vector<16x96xf32> to vector<8x8xf32>
    %157 = vector.extract_strided_slice %5 {offsets = [8, 88], sizes = [8, 8], strides = [1, 1]} : vector<16x96xf32> to vector<8x8xf32>
    %158 = tpu.transpose %156, [1, 0] : vector<8x8xf32> -> vector<8x8xf32>
    %cst_54 = arith.constant dense<0.000000e+00> : vector<8x8xf32>
    %159 = tpu.matmul %155, %158, %cst_54 {dimension_numbers = #tpu.dot_dimension_numbers<[1], [0], [0], [1], [0, 0, 1, 1], [], []>} : vector<8x8xf32>, vector<8x8xf32>, vector<8x8xf32> -> vector<8x8xf32>
    %cst_55 = arith.constant 0.353553385 : f32
    %160 = vector.broadcast %cst_55 : f32 to vector<8x8xf32>
    %161 = arith.mulf %159, %160 : vector<8x8xf32>
    %162 = vector.broadcast %91 : vector<1x8xf32> to vector<8x8xf32>
    %163 = arith.addf %161, %162 : vector<8x8xf32>
    %cst_56 = arith.constant dense<0xFF800000> : vector<8xf32>
    %164 = vector.multi_reduction <maximumf>, %163, %cst_56 [1] : vector<8x8xf32> to vector<8xf32>
    %165 = vector.shape_cast %164 : vector<8xf32> to vector<8x1xf32>
    %166 = vector.broadcast %165 : vector<8x1xf32> to vector<8x8xf32>
    %167 = arith.subf %163, %166 : vector<8x8xf32>
    %168 = math.exp %167 : vector<8x8xf32>
    %cst_57 = arith.constant dense<0.000000e+00> : vector<8xf32>
    %169 = vector.multi_reduction <add>, %168, %cst_57 [1] : vector<8x8xf32> to vector<8xf32>
    %170 = vector.shape_cast %169 : vector<8xf32> to vector<8x1xf32>
    %171 = tpu.reciprocal %170 : vector<8x1xf32> -> vector<8x1xf32>
    %172 = vector.broadcast %171 : vector<8x1xf32> to vector<8x8xf32>
    %173 = arith.mulf %168, %172 : vector<8x8xf32>
    %cst_58 = arith.constant dense<0.000000e+00> : vector<8x8xf32>
    %174 = tpu.matmul %173, %157, %cst_58 {dimension_numbers = #tpu.dot_dimension_numbers<[1], [0], [0], [1], [0, 0, 1, 1], [], []>} : vector<8x8xf32>, vector<8x8xf32>, vector<8x8xf32> -> vector<8x8xf32>
    %c8_59 = arith.constant 8 : index
    %c24_60 = arith.constant 24 : index
    %175 = vector.load %arg15[%c8_59, %c24_60] : memref<16x32xf32, #tpu.memory_space<vmem>>, vector<8x8xf32>
    tpu.vector_store %arg15[%c8_59, %c24_60], %174 {strides = array<i32>} : memref<16x32xf32, #tpu.memory_space<vmem>>, vector<8x8xf32>,
    %c0_61 = arith.constant 0 : index
    %c0_62 = arith.constant 0 : index
    %176 = vector.load %arg15[%c0_61, %c0_62] : memref<16x32xf32, #tpu.memory_space<vmem>>, vector<16x32xf32>
    %c0_63 = arith.constant 0 : index
    %c0_64 = arith.constant 0 : index
    %177 = vector.load %arg4[%c0_63, %c0_64] : memref<32x32xf32, #tpu.memory_space<vmem>>, vector<32x32xf32>
    %cst_65 = arith.constant dense<0.000000e+00> : vector<16x32xf32>
    %178 = tpu.matmul %176, %177, %cst_65 {dimension_numbers = #tpu.dot_dimension_numbers<[1], [0], [0], [1], [0, 0, 1, 1], [], []>} : vector<16x32xf32>, vector<32x32xf32>, vector<16x32xf32> -> vector<16x32xf32>
    %c0_66 = arith.constant 0 : index
    %c0_67 = arith.constant 0 : index
    %179 = vector.load %arg5[%c0_66, %c0_67] : memref<1x32xf32, #tpu.memory_space<vmem>>, vector<1x32xf32>
    %180 = vector.broadcast %179 : vector<1x32xf32> to vector<16x32xf32>
    %181 = arith.addf %178, %180 : vector<16x32xf32>
    %182 = arith.addf %181, %0 : vector<16x32xf32>
    %c0_68 = arith.constant 0 : index
    %c0_69 = arith.constant 0 : index
    %183 = vector.load %arg6[%c0_68, %c0_69] : memref<1x32xf32, #tpu.memory_space<vmem>>, vector<1x32xf32>
    %c0_70 = arith.constant 0 : index
    %c0_71 = arith.constant 0 : index
    %184 = vector.load %arg7[%c0_70, %c0_71] : memref<1x32xf32, #tpu.memory_space<vmem>>, vector<1x32xf32>
    %cst_72 = arith.constant dense<0.000000e+00> : vector<16xf32>
    %185 = vector.multi_reduction <add>, %182, %cst_72 [1] : vector<16x32xf32> to vector<16xf32>
    %186 = vector.shape_cast %185 : vector<16xf32> to vector<16x1xf32>
    %cst_73 = arith.constant 3.200000e+01 : f32
    %187 = vector.broadcast %cst_73 : f32 to vector<16x1xf32>
    %188 = arith.divf %186, %187 : vector<16x1xf32>
    %189 = vector.broadcast %188 : vector<16x1xf32> to vector<16x32xf32>
    %190 = arith.subf %182, %189 : vector<16x32xf32>
    %191 = arith.mulf %190, %190 : vector<16x32xf32>
    %cst_74 = arith.constant dense<0.000000e+00> : vector<16xf32>
    %192 = vector.multi_reduction <add>, %191, %cst_74 [1] : vector<16x32xf32> to vector<16xf32>
    %193 = vector.shape_cast %192 : vector<16xf32> to vector<16x1xf32>
    %cst_75 = arith.constant 3.200000e+01 : f32
    %194 = vector.broadcast %cst_75 : f32 to vector<16x1xf32>
    %195 = arith.divf %193, %194 : vector<16x1xf32>
    %cst_76 = arith.constant 9.99999996E-13 : f32
    %196 = vector.broadcast %cst_76 : f32 to vector<16x1xf32>
    %197 = arith.addf %195, %196 : vector<16x1xf32>
    %198 = math.rsqrt %197 : vector<16x1xf32>
    %199 = vector.broadcast %198 : vector<16x1xf32> to vector<16x32xf32>
    %200 = arith.mulf %190, %199 : vector<16x32xf32>
    %201 = vector.broadcast %183 : vector<1x32xf32> to vector<16x32xf32>
    %202 = arith.mulf %200, %201 : vector<16x32xf32>
    %203 = vector.broadcast %184 : vector<1x32xf32> to vector<16x32xf32>
    %204 = arith.addf %202, %203 : vector<16x32xf32>
    %c0_77 = arith.constant 0 : index
    %c0_78 = arith.constant 0 : index
    %205 = vector.load %arg8[%c0_77, %c0_78] : memref<32x64xf32, #tpu.memory_space<vmem>>, vector<32x64xf32>
    %cst_79 = arith.constant dense<0.000000e+00> : vector<16x64xf32>
    %206 = tpu.matmul %204, %205, %cst_79 {dimension_numbers = #tpu.dot_dimension_numbers<[1], [0], [0], [1], [0, 0, 1, 1], [], []>} : vector<16x32xf32>, vector<32x64xf32>, vector<16x64xf32> -> vector<16x64xf32>
    %c0_80 = arith.constant 0 : index
    %c0_81 = arith.constant 0 : index
    %207 = vector.load %arg9[%c0_80, %c0_81] : memref<1x64xf32, #tpu.memory_space<vmem>>, vector<1x64xf32>
    %208 = vector.broadcast %207 : vector<1x64xf32> to vector<16x64xf32>
    %209 = arith.addf %206, %208 : vector<16x64xf32>
    %cst_82 = arith.constant 5.000000e-01 : f32
    %210 = vector.broadcast %cst_82 : f32 to vector<16x64xf32>
    %211 = arith.mulf %210, %209 : vector<16x64xf32>
    %cst_83 = arith.constant 4.471500e-02 : f32
    %212 = vector.broadcast %cst_83 : f32 to vector<16x64xf32>
    %213 = arith.mulf %212, %209 : vector<16x64xf32>
    %214 = arith.mulf %213, %209 : vector<16x64xf32>
    %215 = arith.mulf %214, %209 : vector<16x64xf32>
    %216 = arith.addf %209, %215 : vector<16x64xf32>
    %cst_84 = arith.constant 0.797884583 : f32
    %217 = vector.broadcast %cst_84 : f32 to vector<16x64xf32>
    %218 = arith.mulf %217, %216 : vector<16x64xf32>
    %219 = math.tanh %218 : vector<16x64xf32>
    %cst_85 = arith.constant 1.000000e+00 : f32
    %220 = vector.broadcast %cst_85 : f32 to vector<16x64xf32>
    %221 = arith.addf %220, %219 : vector<16x64xf32>
    %222 = arith.mulf %211, %221 : vector<16x64xf32>
    %c0_86 = arith.constant 0 : index
    %c0_87 = arith.constant 0 : index
    %223 = vector.load %arg10[%c0_86, %c0_87] : memref<64x32xf32, #tpu.memory_space<vmem>>, vector<64x32xf32>
    %cst_88 = arith.constant dense<0.000000e+00> : vector<16x32xf32>
    %224 = tpu.matmul %222, %223, %cst_88 {dimension_numbers = #tpu.dot_dimension_numbers<[1], [0], [0], [1], [0, 0, 1, 1], [], []>} : vector<16x64xf32>, vector<64x32xf32>, vector<16x32xf32> -> vector<16x32xf32>
    %c0_89 = arith.constant 0 : index
    %c0_90 = arith.constant 0 : index
    %225 = vector.load %arg11[%c0_89, %c0_90] : memref<1x32xf32, #tpu.memory_space<vmem>>, vector<1x32xf32>
    %226 = vector.broadcast %225 : vector<1x32xf32> to vector<16x32xf32>
    %227 = arith.addf %224, %226 : vector<16x32xf32>
    %228 = arith.addf %227, %204 : vector<16x32xf32>
    %c0_91 = arith.constant 0 : index
    %c0_92 = arith.constant 0 : index
    %229 = vector.load %arg12[%c0_91, %c0_92] : memref<1x32xf32, #tpu.memory_space<vmem>>, vector<1x32xf32>
    %c0_93 = arith.constant 0 : index
    %c0_94 = arith.constant 0 : index
    %230 = vector.load %arg13[%c0_93, %c0_94] : memref<1x32xf32, #tpu.memory_space<vmem>>, vector<1x32xf32>
    %cst_95 = arith.constant dense<0.000000e+00> : vector<16xf32>
    %231 = vector.multi_reduction <add>, %228, %cst_95 [1] : vector<16x32xf32> to vector<16xf32>
    %232 = vector.shape_cast %231 : vector<16xf32> to vector<16x1xf32>
    %cst_96 = arith.constant 3.200000e+01 : f32
    %233 = vector.broadcast %cst_96 : f32 to vector<16x1xf32>
    %234 = arith.divf %232, %233 : vector<16x1xf32>
    %235 = vector.broadcast %234 : vector<16x1xf32> to vector<16x32xf32>
    %236 = arith.subf %228, %235 : vector<16x32xf32>
    %237 = arith.mulf %236, %236 : vector<16x32xf32>
    %cst_97 = arith.constant dense<0.000000e+00> : vector<16xf32>
    %238 = vector.multi_reduction <add>, %237, %cst_97 [1] : vector<16x32xf32> to vector<16xf32>
    %239 = vector.shape_cast %238 : vector<16xf32> to vector<16x1xf32>
    %cst_98 = arith.constant 3.200000e+01 : f32
    %240 = vector.broadcast %cst_98 : f32 to vector<16x1xf32>
    %241 = arith.divf %239, %240 : vector<16x1xf32>
    %cst_99 = arith.constant 9.99999996E-13 : f32
    %242 = vector.broadcast %cst_99 : f32 to vector<16x1xf32>
    %243 = arith.addf %241, %242 : vector<16x1xf32>
    %244 = math.rsqrt %243 : vector<16x1xf32>
    %245 = vector.broadcast %244 : vector<16x1xf32> to vector<16x32xf32>
    %246 = arith.mulf %236, %245 : vector<16x32xf32>
    %247 = vector.broadcast %229 : vector<1x32xf32> to vector<16x32xf32>
    %248 = arith.mulf %246, %247 : vector<16x32xf32>
    %249 = vector.broadcast %230 : vector<1x32xf32> to vector<16x32xf32>
    %250 = arith.addf %248, %249 : vector<16x32xf32>
    %c0_100 = arith.constant 0 : index
    %c0_101 = arith.constant 0 : index
    %251 = vector.load %arg14[%c0_100, %c0_101] : memref<16x32xf32, #tpu.memory_space<vmem>>, vector<16x32xf32>
    tpu.vector_store %arg14[%c0_100, %c0_101], %250 {strides = array<i32>} : memref<16x32xf32, #tpu.memory_space<vmem>>, vector<16x32xf32>,
    return
  }
}

module attributes {stable_mosaic.version = 11 : i64} {
  func.func @_bilstm_layer_kernel(%arg0: i32, %arg1: memref<16x64xf32, #tpu.memory_space<vmem>>, %arg2: memref<1x64x128xf32, #tpu.memory_space<vmem>>, %arg3: memref<1x32x128xf32, #tpu.memory_space<vmem>>, %arg4: memref<1x1x128xf32, #tpu.memory_space<vmem>>, %arg5: memref<1x8x2x32xf32, #tpu.memory_space<vmem>>, %arg6: memref<8x2x128xf32, #tpu.memory_space<vmem>>, %arg7: memref<2x32xf32, #tpu.memory_space<vmem>>, %arg8: memref<2x32xf32, #tpu.memory_space<vmem>>) attributes {dimension_semantics = [#tpu.dimension_semantics<parallel>], iteration_bounds = array<i64: 2>, scalar_prefetch = 0 : i64, scratch_operands = 3 : i64, tpu.core_type = #tpu.core_type<tc>, window_params = [{pipeline_mode = #tpu.pipeline_mode<synchronous>, transform_indices = @transform_0, window_bounds = array<i64: 16, 64>}, {transform_indices = @transform_1, window_bounds = array<i64: 1, 64, 128>}, {transform_indices = @transform_2, window_bounds = array<i64: 1, 32, 128>}, {transform_indices = @transform_3, window_bounds = array<i64: 1, 1, 128>}, {transform_indices = @transform_4, window_bounds = array<i64: 1, 8, 2, 32>}]} {
    %c0 = arith.constant 0 : index
    %c0_0 = arith.constant 0 : index
    %c0_1 = arith.constant 0 : index
    %0 = vector.load %arg2[%c0, %c0_0, %c0_1] : memref<1x64x128xf32, #tpu.memory_space<vmem>>, vector<1x64x128xf32>
    %1 = vector.shape_cast %0 : vector<1x64x128xf32> to vector<64x128xf32>
    %c0_2 = arith.constant 0 : index
    %c0_3 = arith.constant 0 : index
    %c0_4 = arith.constant 0 : index
    %2 = vector.load %arg3[%c0_2, %c0_3, %c0_4] : memref<1x32x128xf32, #tpu.memory_space<vmem>>, vector<1x32x128xf32>
    %3 = vector.shape_cast %2 : vector<1x32x128xf32> to vector<32x128xf32>
    %c0_5 = arith.constant 0 : index
    %c0_6 = arith.constant 0 : index
    %c0_7 = arith.constant 0 : index
    %4 = vector.load %arg4[%c0_5, %c0_6, %c0_7] : memref<1x1x128xf32, #tpu.memory_space<vmem>>, vector<1x1x128xf32>
    %5 = vector.shape_cast %4 : vector<1x1x128xf32> to vector<1x128xf32>
    %c0_8 = arith.constant 0 : index
    %c0_9 = arith.constant 0 : index
    %6 = vector.load %arg1[%c0_8, %c0_9] : memref<16x64xf32, #tpu.memory_space<vmem>>, vector<16x64xf32>
    %cst = arith.constant dense<0.000000e+00> : vector<16x128xf32>
    %7 = tpu.matmul %6, %1, %cst {dimension_numbers = #tpu.dot_dimension_numbers<[1], [0], [0], [1], [0, 0, 1, 1], [], []>} : vector<16x64xf32>, vector<64x128xf32>, vector<16x128xf32> -> vector<16x128xf32>
    %8 = vector.broadcast %5 : vector<1x128xf32> to vector<16x128xf32>
    %9 = arith.addf %7, %8 : vector<16x128xf32>
    %10 = vector.extract_strided_slice %9 {offsets = [0, 0], sizes = [2, 128], strides = [1, 1]} : vector<16x128xf32> to vector<2x128xf32>
    %c0_10 = arith.constant 0 : index
    %c0_11 = arith.constant 0 : index
    %c0_12 = arith.constant 0 : index
    %11 = vector.load %arg6[%c0_10, %c0_11, %c0_12] : memref<8x2x128xf32, #tpu.memory_space<vmem>>, vector<1x2x128xf32>
    %12 = vector.shape_cast %11 : vector<1x2x128xf32> to vector<2x128xf32>
    %13 = vector.shape_cast %10 : vector<2x128xf32> to vector<1x2x128xf32>
    tpu.vector_store %arg6[%c0_10, %c0_11, %c0_12], %13 {strides = array<i32>} : memref<8x2x128xf32, #tpu.memory_space<vmem>>, vector<1x2x128xf32>,
    %14 = vector.extract_strided_slice %9 {offsets = [2, 0], sizes = [2, 128], strides = [1, 1]} : vector<16x128xf32> to vector<2x128xf32>
    %c1 = arith.constant 1 : index
    %c0_13 = arith.constant 0 : index
    %c0_14 = arith.constant 0 : index
    %15 = vector.load %arg6[%c1, %c0_13, %c0_14] : memref<8x2x128xf32, #tpu.memory_space<vmem>>, vector<1x2x128xf32>
    %16 = vector.shape_cast %15 : vector<1x2x128xf32> to vector<2x128xf32>
    %17 = vector.shape_cast %14 : vector<2x128xf32> to vector<1x2x128xf32>
    tpu.vector_store %arg6[%c1, %c0_13, %c0_14], %17 {strides = array<i32>} : memref<8x2x128xf32, #tpu.memory_space<vmem>>, vector<1x2x128xf32>,
    %18 = vector.extract_strided_slice %9 {offsets = [4, 0], sizes = [2, 128], strides = [1, 1]} : vector<16x128xf32> to vector<2x128xf32>
    %c2 = arith.constant 2 : index
    %c0_15 = arith.constant 0 : index
    %c0_16 = arith.constant 0 : index
    %19 = vector.load %arg6[%c2, %c0_15, %c0_16] : memref<8x2x128xf32, #tpu.memory_space<vmem>>, vector<1x2x128xf32>
    %20 = vector.shape_cast %19 : vector<1x2x128xf32> to vector<2x128xf32>
    %21 = vector.shape_cast %18 : vector<2x128xf32> to vector<1x2x128xf32>
    tpu.vector_store %arg6[%c2, %c0_15, %c0_16], %21 {strides = array<i32>} : memref<8x2x128xf32, #tpu.memory_space<vmem>>, vector<1x2x128xf32>,
    %22 = vector.extract_strided_slice %9 {offsets = [6, 0], sizes = [2, 128], strides = [1, 1]} : vector<16x128xf32> to vector<2x128xf32>
    %c3 = arith.constant 3 : index
    %c0_17 = arith.constant 0 : index
    %c0_18 = arith.constant 0 : index
    %23 = vector.load %arg6[%c3, %c0_17, %c0_18] : memref<8x2x128xf32, #tpu.memory_space<vmem>>, vector<1x2x128xf32>
    %24 = vector.shape_cast %23 : vector<1x2x128xf32> to vector<2x128xf32>
    %25 = vector.shape_cast %22 : vector<2x128xf32> to vector<1x2x128xf32>
    tpu.vector_store %arg6[%c3, %c0_17, %c0_18], %25 {strides = array<i32>} : memref<8x2x128xf32, #tpu.memory_space<vmem>>, vector<1x2x128xf32>,
    %26 = vector.extract_strided_slice %9 {offsets = [8, 0], sizes = [2, 128], strides = [1, 1]} : vector<16x128xf32> to vector<2x128xf32>
    %c4 = arith.constant 4 : index
    %c0_19 = arith.constant 0 : index
    %c0_20 = arith.constant 0 : index
    %27 = vector.load %arg6[%c4, %c0_19, %c0_20] : memref<8x2x128xf32, #tpu.memory_space<vmem>>, vector<1x2x128xf32>
    %28 = vector.shape_cast %27 : vector<1x2x128xf32> to vector<2x128xf32>
    %29 = vector.shape_cast %26 : vector<2x128xf32> to vector<1x2x128xf32>
    tpu.vector_store %arg6[%c4, %c0_19, %c0_20], %29 {strides = array<i32>} : memref<8x2x128xf32, #tpu.memory_space<vmem>>, vector<1x2x128xf32>,
    %30 = vector.extract_strided_slice %9 {offsets = [10, 0], sizes = [2, 128], strides = [1, 1]} : vector<16x128xf32> to vector<2x128xf32>
    %c5 = arith.constant 5 : index
    %c0_21 = arith.constant 0 : index
    %c0_22 = arith.constant 0 : index
    %31 = vector.load %arg6[%c5, %c0_21, %c0_22] : memref<8x2x128xf32, #tpu.memory_space<vmem>>, vector<1x2x128xf32>
    %32 = vector.shape_cast %31 : vector<1x2x128xf32> to vector<2x128xf32>
    %33 = vector.shape_cast %30 : vector<2x128xf32> to vector<1x2x128xf32>
    tpu.vector_store %arg6[%c5, %c0_21, %c0_22], %33 {strides = array<i32>} : memref<8x2x128xf32, #tpu.memory_space<vmem>>, vector<1x2x128xf32>,
    %34 = vector.extract_strided_slice %9 {offsets = [12, 0], sizes = [2, 128], strides = [1, 1]} : vector<16x128xf32> to vector<2x128xf32>
    %c6 = arith.constant 6 : index
    %c0_23 = arith.constant 0 : index
    %c0_24 = arith.constant 0 : index
    %35 = vector.load %arg6[%c6, %c0_23, %c0_24] : memref<8x2x128xf32, #tpu.memory_space<vmem>>, vector<1x2x128xf32>
    %36 = vector.shape_cast %35 : vector<1x2x128xf32> to vector<2x128xf32>
    %37 = vector.shape_cast %34 : vector<2x128xf32> to vector<1x2x128xf32>
    tpu.vector_store %arg6[%c6, %c0_23, %c0_24], %37 {strides = array<i32>} : memref<8x2x128xf32, #tpu.memory_space<vmem>>, vector<1x2x128xf32>,
    %38 = vector.extract_strided_slice %9 {offsets = [14, 0], sizes = [2, 128], strides = [1, 1]} : vector<16x128xf32> to vector<2x128xf32>
    %c7 = arith.constant 7 : index
    %c0_25 = arith.constant 0 : index
    %c0_26 = arith.constant 0 : index
    %39 = vector.load %arg6[%c7, %c0_25, %c0_26] : memref<8x2x128xf32, #tpu.memory_space<vmem>>, vector<1x2x128xf32>
    %40 = vector.shape_cast %39 : vector<1x2x128xf32> to vector<2x128xf32>
    %41 = vector.shape_cast %38 : vector<2x128xf32> to vector<1x2x128xf32>
    tpu.vector_store %arg6[%c7, %c0_25, %c0_26], %41 {strides = array<i32>} : memref<8x2x128xf32, #tpu.memory_space<vmem>>, vector<1x2x128xf32>,
    %cst_27 = arith.constant 0.000000e+00 : f32
    %42 = vector.broadcast %cst_27 : f32 to vector<2x32xf32>
    %c0_28 = arith.constant 0 : index
    %c0_29 = arith.constant 0 : index
    %43 = vector.load %arg7[%c0_28, %c0_29] : memref<2x32xf32, #tpu.memory_space<vmem>>, vector<2x32xf32>
    tpu.vector_store %arg7[%c0_28, %c0_29], %42 {strides = array<i32>} : memref<2x32xf32, #tpu.memory_space<vmem>>, vector<2x32xf32>,
    %cst_30 = arith.constant 0.000000e+00 : f32
    %44 = vector.broadcast %cst_30 : f32 to vector<2x32xf32>
    %c0_31 = arith.constant 0 : index
    %c0_32 = arith.constant 0 : index
    %45 = vector.load %arg8[%c0_31, %c0_32] : memref<2x32xf32, #tpu.memory_space<vmem>>, vector<2x32xf32>
    tpu.vector_store %arg8[%c0_31, %c0_32], %44 {strides = array<i32>} : memref<2x32xf32, #tpu.memory_space<vmem>>, vector<2x32xf32>,
    %c0_i32 = arith.constant 0 : i32
    %c2_i32 = arith.constant 2 : i32
    %46 = arith.muli %c2_i32, %c0_i32 : i32
    %c7_i32 = arith.constant 7 : i32
    %47 = arith.subi %c7_i32, %46 : i32
    %48 = arith.muli %arg0, %47 : i32
    %49 = arith.addi %c0_i32, %48 : i32
    %50 = arith.index_cast %49 : i32 to index
    %c0_33 = arith.constant 0 : index
    %c0_34 = arith.constant 0 : index
    %51 = vector.load %arg6[%50, %c0_33, %c0_34] : memref<8x2x128xf32, #tpu.memory_space<vmem>>, vector<1x2x128xf32>
    %52 = vector.shape_cast %51 : vector<1x2x128xf32> to vector<2x128xf32>
    %c0_35 = arith.constant 0 : index
    %c0_36 = arith.constant 0 : index
    %53 = vector.load %arg7[%c0_35, %c0_36] : memref<2x32xf32, #tpu.memory_space<vmem>>, vector<2x32xf32>
    %cst_37 = arith.constant dense<0.000000e+00> : vector<2x128xf32>
    %54 = tpu.matmul %53, %3, %cst_37 {dimension_numbers = #tpu.dot_dimension_numbers<[1], [0], [0], [1], [0, 0, 1, 1], [], []>} : vector<2x32xf32>, vector<32x128xf32>, vector<2x128xf32> -> vector<2x128xf32>
    %55 = arith.addf %52, %54 : vector<2x128xf32>
    %56 = arith.negf %55 : vector<2x128xf32>
    %57 = math.exp %56 : vector<2x128xf32>
    %cst_38 = arith.constant 1.000000e+00 : f32
    %58 = vector.broadcast %cst_38 : f32 to vector<2x128xf32>
    %59 = arith.addf %58, %57 : vector<2x128xf32>
    %60 = arith.divf %58, %59 : vector<2x128xf32>
    %61 = math.tanh %55 : vector<2x128xf32>
    %62 = vector.extract_strided_slice %60 {offsets = [0, 0], sizes = [2, 32], strides = [1, 1]} : vector<2x128xf32> to vector<2x32xf32>
    %63 = vector.extract_strided_slice %60 {offsets = [0, 32], sizes = [2, 32], strides = [1, 1]} : vector<2x128xf32> to vector<2x32xf32>
    %64 = vector.extract_strided_slice %61 {offsets = [0, 64], sizes = [2, 32], strides = [1, 1]} : vector<2x128xf32> to vector<2x32xf32>
    %65 = vector.extract_strided_slice %60 {offsets = [0, 96], sizes = [2, 32], strides = [1, 1]} : vector<2x128xf32> to vector<2x32xf32>
    %c0_39 = arith.constant 0 : index
    %c0_40 = arith.constant 0 : index
    %66 = vector.load %arg8[%c0_39, %c0_40] : memref<2x32xf32, #tpu.memory_space<vmem>>, vector<2x32xf32>
    %67 = arith.mulf %63, %66 : vector<2x32xf32>
    %68 = arith.mulf %62, %64 : vector<2x32xf32>
    %69 = arith.addf %67, %68 : vector<2x32xf32>
    %70 = math.tanh %69 : vector<2x32xf32>
    %71 = arith.mulf %65, %70 : vector<2x32xf32>
    %c0_41 = arith.constant 0 : index
    %c0_42 = arith.constant 0 : index
    %72 = vector.load %arg8[%c0_41, %c0_42] : memref<2x32xf32, #tpu.memory_space<vmem>>, vector<2x32xf32>
    tpu.vector_store %arg8[%c0_41, %c0_42], %69 {strides = array<i32>} : memref<2x32xf32, #tpu.memory_space<vmem>>, vector<2x32xf32>,
    %c0_43 = arith.constant 0 : index
    %c0_44 = arith.constant 0 : index
    %73 = vector.load %arg7[%c0_43, %c0_44] : memref<2x32xf32, #tpu.memory_space<vmem>>, vector<2x32xf32>
    tpu.vector_store %arg7[%c0_43, %c0_44], %71 {strides = array<i32>} : memref<2x32xf32, #tpu.memory_space<vmem>>, vector<2x32xf32>,
    %c0_45 = arith.constant 0 : index
    %74 = arith.index_cast %49 : i32 to index
    %c0_46 = arith.constant 0 : index
    %c0_47 = arith.constant 0 : index
    %75 = vector.load %arg5[%c0_45, %74, %c0_46, %c0_47] : memref<1x8x2x32xf32, #tpu.memory_space<vmem>>, vector<1x1x2x32xf32>
    %76 = vector.shape_cast %75 : vector<1x1x2x32xf32> to vector<2x32xf32>
    %77 = vector.shape_cast %71 : vector<2x32xf32> to vector<1x1x2x32xf32>
    tpu.vector_store %arg5[%c0_45, %74, %c0_46, %c0_47], %77 {strides = array<i32>} : memref<1x8x2x32xf32, #tpu.memory_space<vmem>>, vector<1x1x2x32xf32>,
    %c1_i32 = arith.constant 1 : i32
    %c2_i32_48 = arith.constant 2 : i32
    %78 = arith.muli %c2_i32_48, %c1_i32 : i32
    %c7_i32_49 = arith.constant 7 : i32
    %79 = arith.subi %c7_i32_49, %78 : i32
    %80 = arith.muli %arg0, %79 : i32
    %81 = arith.addi %c1_i32, %80 : i32
    %82 = arith.index_cast %81 : i32 to index
    %c0_50 = arith.constant 0 : index
    %c0_51 = arith.constant 0 : index
    %83 = vector.load %arg6[%82, %c0_50, %c0_51] : memref<8x2x128xf32, #tpu.memory_space<vmem>>, vector<1x2x128xf32>
    %84 = vector.shape_cast %83 : vector<1x2x128xf32> to vector<2x128xf32>
    %c0_52 = arith.constant 0 : index
    %c0_53 = arith.constant 0 : index
    %85 = vector.load %arg7[%c0_52, %c0_53] : memref<2x32xf32, #tpu.memory_space<vmem>>, vector<2x32xf32>
    %cst_54 = arith.constant dense<0.000000e+00> : vector<2x128xf32>
    %86 = tpu.matmul %85, %3, %cst_54 {dimension_numbers = #tpu.dot_dimension_numbers<[1], [0], [0], [1], [0, 0, 1, 1], [], []>} : vector<2x32xf32>, vector<32x128xf32>, vector<2x128xf32> -> vector<2x128xf32>
    %87 = arith.addf %84, %86 : vector<2x128xf32>
    %88 = arith.negf %87 : vector<2x128xf32>
    %89 = math.exp %88 : vector<2x128xf32>
    %cst_55 = arith.constant 1.000000e+00 : f32
    %90 = vector.broadcast %cst_55 : f32 to vector<2x128xf32>
    %91 = arith.addf %90, %89 : vector<2x128xf32>
    %92 = arith.divf %90, %91 : vector<2x128xf32>
    %93 = math.tanh %87 : vector<2x128xf32>
    %94 = vector.extract_strided_slice %92 {offsets = [0, 0], sizes = [2, 32], strides = [1, 1]} : vector<2x128xf32> to vector<2x32xf32>
    %95 = vector.extract_strided_slice %92 {offsets = [0, 32], sizes = [2, 32], strides = [1, 1]} : vector<2x128xf32> to vector<2x32xf32>
    %96 = vector.extract_strided_slice %93 {offsets = [0, 64], sizes = [2, 32], strides = [1, 1]} : vector<2x128xf32> to vector<2x32xf32>
    %97 = vector.extract_strided_slice %92 {offsets = [0, 96], sizes = [2, 32], strides = [1, 1]} : vector<2x128xf32> to vector<2x32xf32>
    %c0_56 = arith.constant 0 : index
    %c0_57 = arith.constant 0 : index
    %98 = vector.load %arg8[%c0_56, %c0_57] : memref<2x32xf32, #tpu.memory_space<vmem>>, vector<2x32xf32>
    %99 = arith.mulf %95, %98 : vector<2x32xf32>
    %100 = arith.mulf %94, %96 : vector<2x32xf32>
    %101 = arith.addf %99, %100 : vector<2x32xf32>
    %102 = math.tanh %101 : vector<2x32xf32>
    %103 = arith.mulf %97, %102 : vector<2x32xf32>
    %c0_58 = arith.constant 0 : index
    %c0_59 = arith.constant 0 : index
    %104 = vector.load %arg8[%c0_58, %c0_59] : memref<2x32xf32, #tpu.memory_space<vmem>>, vector<2x32xf32>
    tpu.vector_store %arg8[%c0_58, %c0_59], %101 {strides = array<i32>} : memref<2x32xf32, #tpu.memory_space<vmem>>, vector<2x32xf32>,
    %c0_60 = arith.constant 0 : index
    %c0_61 = arith.constant 0 : index
    %105 = vector.load %arg7[%c0_60, %c0_61] : memref<2x32xf32, #tpu.memory_space<vmem>>, vector<2x32xf32>
    tpu.vector_store %arg7[%c0_60, %c0_61], %103 {strides = array<i32>} : memref<2x32xf32, #tpu.memory_space<vmem>>, vector<2x32xf32>,
    %c0_62 = arith.constant 0 : index
    %106 = arith.index_cast %81 : i32 to index
    %c0_63 = arith.constant 0 : index
    %c0_64 = arith.constant 0 : index
    %107 = vector.load %arg5[%c0_62, %106, %c0_63, %c0_64] : memref<1x8x2x32xf32, #tpu.memory_space<vmem>>, vector<1x1x2x32xf32>
    %108 = vector.shape_cast %107 : vector<1x1x2x32xf32> to vector<2x32xf32>
    %109 = vector.shape_cast %103 : vector<2x32xf32> to vector<1x1x2x32xf32>
    tpu.vector_store %arg5[%c0_62, %106, %c0_63, %c0_64], %109 {strides = array<i32>} : memref<1x8x2x32xf32, #tpu.memory_space<vmem>>, vector<1x1x2x32xf32>,
    %c2_i32_65 = arith.constant 2 : i32
    %c2_i32_66 = arith.constant 2 : i32
    %110 = arith.muli %c2_i32_66, %c2_i32_65 : i32
    %c7_i32_67 = arith.constant 7 : i32
    %111 = arith.subi %c7_i32_67, %110 : i32
    %112 = arith.muli %arg0, %111 : i32
    %113 = arith.addi %c2_i32_65, %112 : i32
    %114 = arith.index_cast %113 : i32 to index
    %c0_68 = arith.constant 0 : index
    %c0_69 = arith.constant 0 : index
    %115 = vector.load %arg6[%114, %c0_68, %c0_69] : memref<8x2x128xf32, #tpu.memory_space<vmem>>, vector<1x2x128xf32>
    %116 = vector.shape_cast %115 : vector<1x2x128xf32> to vector<2x128xf32>
    %c0_70 = arith.constant 0 : index
    %c0_71 = arith.constant 0 : index
    %117 = vector.load %arg7[%c0_70, %c0_71] : memref<2x32xf32, #tpu.memory_space<vmem>>, vector<2x32xf32>
    %cst_72 = arith.constant dense<0.000000e+00> : vector<2x128xf32>
    %118 = tpu.matmul %117, %3, %cst_72 {dimension_numbers = #tpu.dot_dimension_numbers<[1], [0], [0], [1], [0, 0, 1, 1], [], []>} : vector<2x32xf32>, vector<32x128xf32>, vector<2x128xf32> -> vector<2x128xf32>
    %119 = arith.addf %116, %118 : vector<2x128xf32>
    %120 = arith.negf %119 : vector<2x128xf32>
    %121 = math.exp %120 : vector<2x128xf32>
    %cst_73 = arith.constant 1.000000e+00 : f32
    %122 = vector.broadcast %cst_73 : f32 to vector<2x128xf32>
    %123 = arith.addf %122, %121 : vector<2x128xf32>
    %124 = arith.divf %122, %123 : vector<2x128xf32>
    %125 = math.tanh %119 : vector<2x128xf32>
    %126 = vector.extract_strided_slice %124 {offsets = [0, 0], sizes = [2, 32], strides = [1, 1]} : vector<2x128xf32> to vector<2x32xf32>
    %127 = vector.extract_strided_slice %124 {offsets = [0, 32], sizes = [2, 32], strides = [1, 1]} : vector<2x128xf32> to vector<2x32xf32>
    %128 = vector.extract_strided_slice %125 {offsets = [0, 64], sizes = [2, 32], strides = [1, 1]} : vector<2x128xf32> to vector<2x32xf32>
    %129 = vector.extract_strided_slice %124 {offsets = [0, 96], sizes = [2, 32], strides = [1, 1]} : vector<2x128xf32> to vector<2x32xf32>
    %c0_74 = arith.constant 0 : index
    %c0_75 = arith.constant 0 : index
    %130 = vector.load %arg8[%c0_74, %c0_75] : memref<2x32xf32, #tpu.memory_space<vmem>>, vector<2x32xf32>
    %131 = arith.mulf %127, %130 : vector<2x32xf32>
    %132 = arith.mulf %126, %128 : vector<2x32xf32>
    %133 = arith.addf %131, %132 : vector<2x32xf32>
    %134 = math.tanh %133 : vector<2x32xf32>
    %135 = arith.mulf %129, %134 : vector<2x32xf32>
    %c0_76 = arith.constant 0 : index
    %c0_77 = arith.constant 0 : index
    %136 = vector.load %arg8[%c0_76, %c0_77] : memref<2x32xf32, #tpu.memory_space<vmem>>, vector<2x32xf32>
    tpu.vector_store %arg8[%c0_76, %c0_77], %133 {strides = array<i32>} : memref<2x32xf32, #tpu.memory_space<vmem>>, vector<2x32xf32>,
    %c0_78 = arith.constant 0 : index
    %c0_79 = arith.constant 0 : index
    %137 = vector.load %arg7[%c0_78, %c0_79] : memref<2x32xf32, #tpu.memory_space<vmem>>, vector<2x32xf32>
    tpu.vector_store %arg7[%c0_78, %c0_79], %135 {strides = array<i32>} : memref<2x32xf32, #tpu.memory_space<vmem>>, vector<2x32xf32>,
    %c0_80 = arith.constant 0 : index
    %138 = arith.index_cast %113 : i32 to index
    %c0_81 = arith.constant 0 : index
    %c0_82 = arith.constant 0 : index
    %139 = vector.load %arg5[%c0_80, %138, %c0_81, %c0_82] : memref<1x8x2x32xf32, #tpu.memory_space<vmem>>, vector<1x1x2x32xf32>
    %140 = vector.shape_cast %139 : vector<1x1x2x32xf32> to vector<2x32xf32>
    %141 = vector.shape_cast %135 : vector<2x32xf32> to vector<1x1x2x32xf32>
    tpu.vector_store %arg5[%c0_80, %138, %c0_81, %c0_82], %141 {strides = array<i32>} : memref<1x8x2x32xf32, #tpu.memory_space<vmem>>, vector<1x1x2x32xf32>,
    %c3_i32 = arith.constant 3 : i32
    %c2_i32_83 = arith.constant 2 : i32
    %142 = arith.muli %c2_i32_83, %c3_i32 : i32
    %c7_i32_84 = arith.constant 7 : i32
    %143 = arith.subi %c7_i32_84, %142 : i32
    %144 = arith.muli %arg0, %143 : i32
    %145 = arith.addi %c3_i32, %144 : i32
    %146 = arith.index_cast %145 : i32 to index
    %c0_85 = arith.constant 0 : index
    %c0_86 = arith.constant 0 : index
    %147 = vector.load %arg6[%146, %c0_85, %c0_86] : memref<8x2x128xf32, #tpu.memory_space<vmem>>, vector<1x2x128xf32>
    %148 = vector.shape_cast %147 : vector<1x2x128xf32> to vector<2x128xf32>
    %c0_87 = arith.constant 0 : index
    %c0_88 = arith.constant 0 : index
    %149 = vector.load %arg7[%c0_87, %c0_88] : memref<2x32xf32, #tpu.memory_space<vmem>>, vector<2x32xf32>
    %cst_89 = arith.constant dense<0.000000e+00> : vector<2x128xf32>
    %150 = tpu.matmul %149, %3, %cst_89 {dimension_numbers = #tpu.dot_dimension_numbers<[1], [0], [0], [1], [0, 0, 1, 1], [], []>} : vector<2x32xf32>, vector<32x128xf32>, vector<2x128xf32> -> vector<2x128xf32>
    %151 = arith.addf %148, %150 : vector<2x128xf32>
    %152 = arith.negf %151 : vector<2x128xf32>
    %153 = math.exp %152 : vector<2x128xf32>
    %cst_90 = arith.constant 1.000000e+00 : f32
    %154 = vector.broadcast %cst_90 : f32 to vector<2x128xf32>
    %155 = arith.addf %154, %153 : vector<2x128xf32>
    %156 = arith.divf %154, %155 : vector<2x128xf32>
    %157 = math.tanh %151 : vector<2x128xf32>
    %158 = vector.extract_strided_slice %156 {offsets = [0, 0], sizes = [2, 32], strides = [1, 1]} : vector<2x128xf32> to vector<2x32xf32>
    %159 = vector.extract_strided_slice %156 {offsets = [0, 32], sizes = [2, 32], strides = [1, 1]} : vector<2x128xf32> to vector<2x32xf32>
    %160 = vector.extract_strided_slice %157 {offsets = [0, 64], sizes = [2, 32], strides = [1, 1]} : vector<2x128xf32> to vector<2x32xf32>
    %161 = vector.extract_strided_slice %156 {offsets = [0, 96], sizes = [2, 32], strides = [1, 1]} : vector<2x128xf32> to vector<2x32xf32>
    %c0_91 = arith.constant 0 : index
    %c0_92 = arith.constant 0 : index
    %162 = vector.load %arg8[%c0_91, %c0_92] : memref<2x32xf32, #tpu.memory_space<vmem>>, vector<2x32xf32>
    %163 = arith.mulf %159, %162 : vector<2x32xf32>
    %164 = arith.mulf %158, %160 : vector<2x32xf32>
    %165 = arith.addf %163, %164 : vector<2x32xf32>
    %166 = math.tanh %165 : vector<2x32xf32>
    %167 = arith.mulf %161, %166 : vector<2x32xf32>
    %c0_93 = arith.constant 0 : index
    %c0_94 = arith.constant 0 : index
    %168 = vector.load %arg8[%c0_93, %c0_94] : memref<2x32xf32, #tpu.memory_space<vmem>>, vector<2x32xf32>
    tpu.vector_store %arg8[%c0_93, %c0_94], %165 {strides = array<i32>} : memref<2x32xf32, #tpu.memory_space<vmem>>, vector<2x32xf32>,
    %c0_95 = arith.constant 0 : index
    %c0_96 = arith.constant 0 : index
    %169 = vector.load %arg7[%c0_95, %c0_96] : memref<2x32xf32, #tpu.memory_space<vmem>>, vector<2x32xf32>
    tpu.vector_store %arg7[%c0_95, %c0_96], %167 {strides = array<i32>} : memref<2x32xf32, #tpu.memory_space<vmem>>, vector<2x32xf32>,
    %c0_97 = arith.constant 0 : index
    %170 = arith.index_cast %145 : i32 to index
    %c0_98 = arith.constant 0 : index
    %c0_99 = arith.constant 0 : index
    %171 = vector.load %arg5[%c0_97, %170, %c0_98, %c0_99] : memref<1x8x2x32xf32, #tpu.memory_space<vmem>>, vector<1x1x2x32xf32>
    %172 = vector.shape_cast %171 : vector<1x1x2x32xf32> to vector<2x32xf32>
    %173 = vector.shape_cast %167 : vector<2x32xf32> to vector<1x1x2x32xf32>
    tpu.vector_store %arg5[%c0_97, %170, %c0_98, %c0_99], %173 {strides = array<i32>} : memref<1x8x2x32xf32, #tpu.memory_space<vmem>>, vector<1x1x2x32xf32>,
    %c4_i32 = arith.constant 4 : i32
    %c2_i32_100 = arith.constant 2 : i32
    %174 = arith.muli %c2_i32_100, %c4_i32 : i32
    %c7_i32_101 = arith.constant 7 : i32
    %175 = arith.subi %c7_i32_101, %174 : i32
    %176 = arith.muli %arg0, %175 : i32
    %177 = arith.addi %c4_i32, %176 : i32
    %178 = arith.index_cast %177 : i32 to index
    %c0_102 = arith.constant 0 : index
    %c0_103 = arith.constant 0 : index
    %179 = vector.load %arg6[%178, %c0_102, %c0_103] : memref<8x2x128xf32, #tpu.memory_space<vmem>>, vector<1x2x128xf32>
    %180 = vector.shape_cast %179 : vector<1x2x128xf32> to vector<2x128xf32>
    %c0_104 = arith.constant 0 : index
    %c0_105 = arith.constant 0 : index
    %181 = vector.load %arg7[%c0_104, %c0_105] : memref<2x32xf32, #tpu.memory_space<vmem>>, vector<2x32xf32>
    %cst_106 = arith.constant dense<0.000000e+00> : vector<2x128xf32>
    %182 = tpu.matmul %181, %3, %cst_106 {dimension_numbers = #tpu.dot_dimension_numbers<[1], [0], [0], [1], [0, 0, 1, 1], [], []>} : vector<2x32xf32>, vector<32x128xf32>, vector<2x128xf32> -> vector<2x128xf32>
    %183 = arith.addf %180, %182 : vector<2x128xf32>
    %184 = arith.negf %183 : vector<2x128xf32>
    %185 = math.exp %184 : vector<2x128xf32>
    %cst_107 = arith.constant 1.000000e+00 : f32
    %186 = vector.broadcast %cst_107 : f32 to vector<2x128xf32>
    %187 = arith.addf %186, %185 : vector<2x128xf32>
    %188 = arith.divf %186, %187 : vector<2x128xf32>
    %189 = math.tanh %183 : vector<2x128xf32>
    %190 = vector.extract_strided_slice %188 {offsets = [0, 0], sizes = [2, 32], strides = [1, 1]} : vector<2x128xf32> to vector<2x32xf32>
    %191 = vector.extract_strided_slice %188 {offsets = [0, 32], sizes = [2, 32], strides = [1, 1]} : vector<2x128xf32> to vector<2x32xf32>
    %192 = vector.extract_strided_slice %189 {offsets = [0, 64], sizes = [2, 32], strides = [1, 1]} : vector<2x128xf32> to vector<2x32xf32>
    %193 = vector.extract_strided_slice %188 {offsets = [0, 96], sizes = [2, 32], strides = [1, 1]} : vector<2x128xf32> to vector<2x32xf32>
    %c0_108 = arith.constant 0 : index
    %c0_109 = arith.constant 0 : index
    %194 = vector.load %arg8[%c0_108, %c0_109] : memref<2x32xf32, #tpu.memory_space<vmem>>, vector<2x32xf32>
    %195 = arith.mulf %191, %194 : vector<2x32xf32>
    %196 = arith.mulf %190, %192 : vector<2x32xf32>
    %197 = arith.addf %195, %196 : vector<2x32xf32>
    %198 = math.tanh %197 : vector<2x32xf32>
    %199 = arith.mulf %193, %198 : vector<2x32xf32>
    %c0_110 = arith.constant 0 : index
    %c0_111 = arith.constant 0 : index
    %200 = vector.load %arg8[%c0_110, %c0_111] : memref<2x32xf32, #tpu.memory_space<vmem>>, vector<2x32xf32>
    tpu.vector_store %arg8[%c0_110, %c0_111], %197 {strides = array<i32>} : memref<2x32xf32, #tpu.memory_space<vmem>>, vector<2x32xf32>,
    %c0_112 = arith.constant 0 : index
    %c0_113 = arith.constant 0 : index
    %201 = vector.load %arg7[%c0_112, %c0_113] : memref<2x32xf32, #tpu.memory_space<vmem>>, vector<2x32xf32>
    tpu.vector_store %arg7[%c0_112, %c0_113], %199 {strides = array<i32>} : memref<2x32xf32, #tpu.memory_space<vmem>>, vector<2x32xf32>,
    %c0_114 = arith.constant 0 : index
    %202 = arith.index_cast %177 : i32 to index
    %c0_115 = arith.constant 0 : index
    %c0_116 = arith.constant 0 : index
    %203 = vector.load %arg5[%c0_114, %202, %c0_115, %c0_116] : memref<1x8x2x32xf32, #tpu.memory_space<vmem>>, vector<1x1x2x32xf32>
    %204 = vector.shape_cast %203 : vector<1x1x2x32xf32> to vector<2x32xf32>
    %205 = vector.shape_cast %199 : vector<2x32xf32> to vector<1x1x2x32xf32>
    tpu.vector_store %arg5[%c0_114, %202, %c0_115, %c0_116], %205 {strides = array<i32>} : memref<1x8x2x32xf32, #tpu.memory_space<vmem>>, vector<1x1x2x32xf32>,
    %c5_i32 = arith.constant 5 : i32
    %c2_i32_117 = arith.constant 2 : i32
    %206 = arith.muli %c2_i32_117, %c5_i32 : i32
    %c7_i32_118 = arith.constant 7 : i32
    %207 = arith.subi %c7_i32_118, %206 : i32
    %208 = arith.muli %arg0, %207 : i32
    %209 = arith.addi %c5_i32, %208 : i32
    %210 = arith.index_cast %209 : i32 to index
    %c0_119 = arith.constant 0 : index
    %c0_120 = arith.constant 0 : index
    %211 = vector.load %arg6[%210, %c0_119, %c0_120] : memref<8x2x128xf32, #tpu.memory_space<vmem>>, vector<1x2x128xf32>
    %212 = vector.shape_cast %211 : vector<1x2x128xf32> to vector<2x128xf32>
    %c0_121 = arith.constant 0 : index
    %c0_122 = arith.constant 0 : index
    %213 = vector.load %arg7[%c0_121, %c0_122] : memref<2x32xf32, #tpu.memory_space<vmem>>, vector<2x32xf32>
    %cst_123 = arith.constant dense<0.000000e+00> : vector<2x128xf32>
    %214 = tpu.matmul %213, %3, %cst_123 {dimension_numbers = #tpu.dot_dimension_numbers<[1], [0], [0], [1], [0, 0, 1, 1], [], []>} : vector<2x32xf32>, vector<32x128xf32>, vector<2x128xf32> -> vector<2x128xf32>
    %215 = arith.addf %212, %214 : vector<2x128xf32>
    %216 = arith.negf %215 : vector<2x128xf32>
    %217 = math.exp %216 : vector<2x128xf32>
    %cst_124 = arith.constant 1.000000e+00 : f32
    %218 = vector.broadcast %cst_124 : f32 to vector<2x128xf32>
    %219 = arith.addf %218, %217 : vector<2x128xf32>
    %220 = arith.divf %218, %219 : vector<2x128xf32>
    %221 = math.tanh %215 : vector<2x128xf32>
    %222 = vector.extract_strided_slice %220 {offsets = [0, 0], sizes = [2, 32], strides = [1, 1]} : vector<2x128xf32> to vector<2x32xf32>
    %223 = vector.extract_strided_slice %220 {offsets = [0, 32], sizes = [2, 32], strides = [1, 1]} : vector<2x128xf32> to vector<2x32xf32>
    %224 = vector.extract_strided_slice %221 {offsets = [0, 64], sizes = [2, 32], strides = [1, 1]} : vector<2x128xf32> to vector<2x32xf32>
    %225 = vector.extract_strided_slice %220 {offsets = [0, 96], sizes = [2, 32], strides = [1, 1]} : vector<2x128xf32> to vector<2x32xf32>
    %c0_125 = arith.constant 0 : index
    %c0_126 = arith.constant 0 : index
    %226 = vector.load %arg8[%c0_125, %c0_126] : memref<2x32xf32, #tpu.memory_space<vmem>>, vector<2x32xf32>
    %227 = arith.mulf %223, %226 : vector<2x32xf32>
    %228 = arith.mulf %222, %224 : vector<2x32xf32>
    %229 = arith.addf %227, %228 : vector<2x32xf32>
    %230 = math.tanh %229 : vector<2x32xf32>
    %231 = arith.mulf %225, %230 : vector<2x32xf32>
    %c0_127 = arith.constant 0 : index
    %c0_128 = arith.constant 0 : index
    %232 = vector.load %arg8[%c0_127, %c0_128] : memref<2x32xf32, #tpu.memory_space<vmem>>, vector<2x32xf32>
    tpu.vector_store %arg8[%c0_127, %c0_128], %229 {strides = array<i32>} : memref<2x32xf32, #tpu.memory_space<vmem>>, vector<2x32xf32>,
    %c0_129 = arith.constant 0 : index
    %c0_130 = arith.constant 0 : index
    %233 = vector.load %arg7[%c0_129, %c0_130] : memref<2x32xf32, #tpu.memory_space<vmem>>, vector<2x32xf32>
    tpu.vector_store %arg7[%c0_129, %c0_130], %231 {strides = array<i32>} : memref<2x32xf32, #tpu.memory_space<vmem>>, vector<2x32xf32>,
    %c0_131 = arith.constant 0 : index
    %234 = arith.index_cast %209 : i32 to index
    %c0_132 = arith.constant 0 : index
    %c0_133 = arith.constant 0 : index
    %235 = vector.load %arg5[%c0_131, %234, %c0_132, %c0_133] : memref<1x8x2x32xf32, #tpu.memory_space<vmem>>, vector<1x1x2x32xf32>
    %236 = vector.shape_cast %235 : vector<1x1x2x32xf32> to vector<2x32xf32>
    %237 = vector.shape_cast %231 : vector<2x32xf32> to vector<1x1x2x32xf32>
    tpu.vector_store %arg5[%c0_131, %234, %c0_132, %c0_133], %237 {strides = array<i32>} : memref<1x8x2x32xf32, #tpu.memory_space<vmem>>, vector<1x1x2x32xf32>,
    %c6_i32 = arith.constant 6 : i32
    %c2_i32_134 = arith.constant 2 : i32
    %238 = arith.muli %c2_i32_134, %c6_i32 : i32
    %c7_i32_135 = arith.constant 7 : i32
    %239 = arith.subi %c7_i32_135, %238 : i32
    %240 = arith.muli %arg0, %239 : i32
    %241 = arith.addi %c6_i32, %240 : i32
    %242 = arith.index_cast %241 : i32 to index
    %c0_136 = arith.constant 0 : index
    %c0_137 = arith.constant 0 : index
    %243 = vector.load %arg6[%242, %c0_136, %c0_137] : memref<8x2x128xf32, #tpu.memory_space<vmem>>, vector<1x2x128xf32>
    %244 = vector.shape_cast %243 : vector<1x2x128xf32> to vector<2x128xf32>
    %c0_138 = arith.constant 0 : index
    %c0_139 = arith.constant 0 : index
    %245 = vector.load %arg7[%c0_138, %c0_139] : memref<2x32xf32, #tpu.memory_space<vmem>>, vector<2x32xf32>
    %cst_140 = arith.constant dense<0.000000e+00> : vector<2x128xf32>
    %246 = tpu.matmul %245, %3, %cst_140 {dimension_numbers = #tpu.dot_dimension_numbers<[1], [0], [0], [1], [0, 0, 1, 1], [], []>} : vector<2x32xf32>, vector<32x128xf32>, vector<2x128xf32> -> vector<2x128xf32>
    %247 = arith.addf %244, %246 : vector<2x128xf32>
    %248 = arith.negf %247 : vector<2x128xf32>
    %249 = math.exp %248 : vector<2x128xf32>
    %cst_141 = arith.constant 1.000000e+00 : f32
    %250 = vector.broadcast %cst_141 : f32 to vector<2x128xf32>
    %251 = arith.addf %250, %249 : vector<2x128xf32>
    %252 = arith.divf %250, %251 : vector<2x128xf32>
    %253 = math.tanh %247 : vector<2x128xf32>
    %254 = vector.extract_strided_slice %252 {offsets = [0, 0], sizes = [2, 32], strides = [1, 1]} : vector<2x128xf32> to vector<2x32xf32>
    %255 = vector.extract_strided_slice %252 {offsets = [0, 32], sizes = [2, 32], strides = [1, 1]} : vector<2x128xf32> to vector<2x32xf32>
    %256 = vector.extract_strided_slice %253 {offsets = [0, 64], sizes = [2, 32], strides = [1, 1]} : vector<2x128xf32> to vector<2x32xf32>
    %257 = vector.extract_strided_slice %252 {offsets = [0, 96], sizes = [2, 32], strides = [1, 1]} : vector<2x128xf32> to vector<2x32xf32>
    %c0_142 = arith.constant 0 : index
    %c0_143 = arith.constant 0 : index
    %258 = vector.load %arg8[%c0_142, %c0_143] : memref<2x32xf32, #tpu.memory_space<vmem>>, vector<2x32xf32>
    %259 = arith.mulf %255, %258 : vector<2x32xf32>
    %260 = arith.mulf %254, %256 : vector<2x32xf32>
    %261 = arith.addf %259, %260 : vector<2x32xf32>
    %262 = math.tanh %261 : vector<2x32xf32>
    %263 = arith.mulf %257, %262 : vector<2x32xf32>
    %c0_144 = arith.constant 0 : index
    %c0_145 = arith.constant 0 : index
    %264 = vector.load %arg8[%c0_144, %c0_145] : memref<2x32xf32, #tpu.memory_space<vmem>>, vector<2x32xf32>
    tpu.vector_store %arg8[%c0_144, %c0_145], %261 {strides = array<i32>} : memref<2x32xf32, #tpu.memory_space<vmem>>, vector<2x32xf32>,
    %c0_146 = arith.constant 0 : index
    %c0_147 = arith.constant 0 : index
    %265 = vector.load %arg7[%c0_146, %c0_147] : memref<2x32xf32, #tpu.memory_space<vmem>>, vector<2x32xf32>
    tpu.vector_store %arg7[%c0_146, %c0_147], %263 {strides = array<i32>} : memref<2x32xf32, #tpu.memory_space<vmem>>, vector<2x32xf32>,
    %c0_148 = arith.constant 0 : index
    %266 = arith.index_cast %241 : i32 to index
    %c0_149 = arith.constant 0 : index
    %c0_150 = arith.constant 0 : index
    %267 = vector.load %arg5[%c0_148, %266, %c0_149, %c0_150] : memref<1x8x2x32xf32, #tpu.memory_space<vmem>>, vector<1x1x2x32xf32>
    %268 = vector.shape_cast %267 : vector<1x1x2x32xf32> to vector<2x32xf32>
    %269 = vector.shape_cast %263 : vector<2x32xf32> to vector<1x1x2x32xf32>
    tpu.vector_store %arg5[%c0_148, %266, %c0_149, %c0_150], %269 {strides = array<i32>} : memref<1x8x2x32xf32, #tpu.memory_space<vmem>>, vector<1x1x2x32xf32>,
    %c7_i32_151 = arith.constant 7 : i32
    %c2_i32_152 = arith.constant 2 : i32
    %270 = arith.muli %c2_i32_152, %c7_i32_151 : i32
    %c7_i32_153 = arith.constant 7 : i32
    %271 = arith.subi %c7_i32_153, %270 : i32
    %272 = arith.muli %arg0, %271 : i32
    %273 = arith.addi %c7_i32_151, %272 : i32
    %274 = arith.index_cast %273 : i32 to index
    %c0_154 = arith.constant 0 : index
    %c0_155 = arith.constant 0 : index
    %275 = vector.load %arg6[%274, %c0_154, %c0_155] : memref<8x2x128xf32, #tpu.memory_space<vmem>>, vector<1x2x128xf32>
    %276 = vector.shape_cast %275 : vector<1x2x128xf32> to vector<2x128xf32>
    %c0_156 = arith.constant 0 : index
    %c0_157 = arith.constant 0 : index
    %277 = vector.load %arg7[%c0_156, %c0_157] : memref<2x32xf32, #tpu.memory_space<vmem>>, vector<2x32xf32>
    %cst_158 = arith.constant dense<0.000000e+00> : vector<2x128xf32>
    %278 = tpu.matmul %277, %3, %cst_158 {dimension_numbers = #tpu.dot_dimension_numbers<[1], [0], [0], [1], [0, 0, 1, 1], [], []>} : vector<2x32xf32>, vector<32x128xf32>, vector<2x128xf32> -> vector<2x128xf32>
    %279 = arith.addf %276, %278 : vector<2x128xf32>
    %280 = arith.negf %279 : vector<2x128xf32>
    %281 = math.exp %280 : vector<2x128xf32>
    %cst_159 = arith.constant 1.000000e+00 : f32
    %282 = vector.broadcast %cst_159 : f32 to vector<2x128xf32>
    %283 = arith.addf %282, %281 : vector<2x128xf32>
    %284 = arith.divf %282, %283 : vector<2x128xf32>
    %285 = math.tanh %279 : vector<2x128xf32>
    %286 = vector.extract_strided_slice %284 {offsets = [0, 0], sizes = [2, 32], strides = [1, 1]} : vector<2x128xf32> to vector<2x32xf32>
    %287 = vector.extract_strided_slice %284 {offsets = [0, 32], sizes = [2, 32], strides = [1, 1]} : vector<2x128xf32> to vector<2x32xf32>
    %288 = vector.extract_strided_slice %285 {offsets = [0, 64], sizes = [2, 32], strides = [1, 1]} : vector<2x128xf32> to vector<2x32xf32>
    %289 = vector.extract_strided_slice %284 {offsets = [0, 96], sizes = [2, 32], strides = [1, 1]} : vector<2x128xf32> to vector<2x32xf32>
    %c0_160 = arith.constant 0 : index
    %c0_161 = arith.constant 0 : index
    %290 = vector.load %arg8[%c0_160, %c0_161] : memref<2x32xf32, #tpu.memory_space<vmem>>, vector<2x32xf32>
    %291 = arith.mulf %287, %290 : vector<2x32xf32>
    %292 = arith.mulf %286, %288 : vector<2x32xf32>
    %293 = arith.addf %291, %292 : vector<2x32xf32>
    %294 = math.tanh %293 : vector<2x32xf32>
    %295 = arith.mulf %289, %294 : vector<2x32xf32>
    %c0_162 = arith.constant 0 : index
    %c0_163 = arith.constant 0 : index
    %296 = vector.load %arg8[%c0_162, %c0_163] : memref<2x32xf32, #tpu.memory_space<vmem>>, vector<2x32xf32>
    tpu.vector_store %arg8[%c0_162, %c0_163], %293 {strides = array<i32>} : memref<2x32xf32, #tpu.memory_space<vmem>>, vector<2x32xf32>,
    %c0_164 = arith.constant 0 : index
    %c0_165 = arith.constant 0 : index
    %297 = vector.load %arg7[%c0_164, %c0_165] : memref<2x32xf32, #tpu.memory_space<vmem>>, vector<2x32xf32>
    tpu.vector_store %arg7[%c0_164, %c0_165], %295 {strides = array<i32>} : memref<2x32xf32, #tpu.memory_space<vmem>>, vector<2x32xf32>,
    %c0_166 = arith.constant 0 : index
    %298 = arith.index_cast %273 : i32 to index
    %c0_167 = arith.constant 0 : index
    %c0_168 = arith.constant 0 : index
    %299 = vector.load %arg5[%c0_166, %298, %c0_167, %c0_168] : memref<1x8x2x32xf32, #tpu.memory_space<vmem>>, vector<1x1x2x32xf32>
    %300 = vector.shape_cast %299 : vector<1x1x2x32xf32> to vector<2x32xf32>
    %301 = vector.shape_cast %295 : vector<2x32xf32> to vector<1x1x2x32xf32>
    tpu.vector_store %arg5[%c0_166, %298, %c0_167, %c0_168], %301 {strides = array<i32>} : memref<1x8x2x32xf32, #tpu.memory_space<vmem>>, vector<1x1x2x32xf32>,
    %c8_i32 = arith.constant 8 : i32
    return
  }
  func.func @transform_0(%arg0: i32) -> (i32, i32) {
    %c0_i32 = arith.constant 0 : i32
    %c0_i32_0 = arith.constant 0 : i32
    %c0_i32_1 = arith.constant 0 : i32
    return %c0_i32, %c0_i32_0 : i32, i32
  }
  func.func @transform_1(%arg0: i32) -> (i32, i32, i32) {
    %c0_i32 = arith.constant 0 : i32
    %c0_i32_0 = arith.constant 0 : i32
    %c0_i32_1 = arith.constant 0 : i32
    return %arg0, %c0_i32, %c0_i32_0 : i32, i32, i32
  }
  func.func @transform_2(%arg0: i32) -> (i32, i32, i32) {
    %c0_i32 = arith.constant 0 : i32
    %c0_i32_0 = arith.constant 0 : i32
    %c0_i32_1 = arith.constant 0 : i32
    return %arg0, %c0_i32, %c0_i32_0 : i32, i32, i32
  }
  func.func @transform_3(%arg0: i32) -> (i32, i32, i32) {
    %c0_i32 = arith.constant 0 : i32
    %c0_i32_0 = arith.constant 0 : i32
    %c0_i32_1 = arith.constant 0 : i32
    return %arg0, %c0_i32, %c0_i32_0 : i32, i32, i32
  }
  func.func @transform_4(%arg0: i32) -> (i32, i32, i32, i32) {
    %c0_i32 = arith.constant 0 : i32
    %c0_i32_0 = arith.constant 0 : i32
    %c0_i32_1 = arith.constant 0 : i32
    %c0_i32_2 = arith.constant 0 : i32
    return %arg0, %c0_i32, %c0_i32_0, %c0_i32_1 : i32, i32, i32, i32
  }
}

module attributes {stable_mosaic.version = 11 : i64} {
  func.func @_bilstm_layer_kernel(%arg0: i32, %arg1: memref<16x32xf32, #tpu.memory_space<vmem>>, %arg2: memref<1x32x128xf32, #tpu.memory_space<vmem>>, %arg3: memref<1x32x128xf32, #tpu.memory_space<vmem>>, %arg4: memref<1x1x128xf32, #tpu.memory_space<vmem>>, %arg5: memref<1x8x2x32xf32, #tpu.memory_space<vmem>>, %arg6: memref<8x2x128xf32, #tpu.memory_space<vmem>>, %arg7: memref<2x32xf32, #tpu.memory_space<vmem>>, %arg8: memref<2x32xf32, #tpu.memory_space<vmem>>) attributes {dimension_semantics = [#tpu.dimension_semantics<parallel>], iteration_bounds = array<i64: 2>, scalar_prefetch = 0 : i64, scratch_operands = 3 : i64, tpu.core_type = #tpu.core_type<tc>, window_params = [{pipeline_mode = #tpu.pipeline_mode<synchronous>, transform_indices = @transform_0, window_bounds = array<i64: 16, 32>}, {transform_indices = @transform_1, window_bounds = array<i64: 1, 32, 128>}, {transform_indices = @transform_2, window_bounds = array<i64: 1, 32, 128>}, {transform_indices = @transform_3, window_bounds = array<i64: 1, 1, 128>}, {transform_indices = @transform_4, window_bounds = array<i64: 1, 8, 2, 32>}]} {
    %c0 = arith.constant 0 : index
    %c0_0 = arith.constant 0 : index
    %c0_1 = arith.constant 0 : index
    %0 = vector.load %arg2[%c0, %c0_0, %c0_1] : memref<1x32x128xf32, #tpu.memory_space<vmem>>, vector<1x32x128xf32>
    %1 = vector.shape_cast %0 : vector<1x32x128xf32> to vector<32x128xf32>
    %c0_2 = arith.constant 0 : index
    %c0_3 = arith.constant 0 : index
    %c0_4 = arith.constant 0 : index
    %2 = vector.load %arg3[%c0_2, %c0_3, %c0_4] : memref<1x32x128xf32, #tpu.memory_space<vmem>>, vector<1x32x128xf32>
    %3 = vector.shape_cast %2 : vector<1x32x128xf32> to vector<32x128xf32>
    %c0_5 = arith.constant 0 : index
    %c0_6 = arith.constant 0 : index
    %c0_7 = arith.constant 0 : index
    %4 = vector.load %arg4[%c0_5, %c0_6, %c0_7] : memref<1x1x128xf32, #tpu.memory_space<vmem>>, vector<1x1x128xf32>
    %5 = vector.shape_cast %4 : vector<1x1x128xf32> to vector<1x128xf32>
    %c0_8 = arith.constant 0 : index
    %c0_9 = arith.constant 0 : index
    %6 = vector.load %arg1[%c0_8, %c0_9] : memref<16x32xf32, #tpu.memory_space<vmem>>, vector<16x32xf32>
    %cst = arith.constant dense<0.000000e+00> : vector<16x128xf32>
    %7 = tpu.matmul %6, %1, %cst {dimension_numbers = #tpu.dot_dimension_numbers<[1], [0], [0], [1], [0, 0, 1, 1], [], []>} : vector<16x32xf32>, vector<32x128xf32>, vector<16x128xf32> -> vector<16x128xf32>
    %8 = vector.broadcast %5 : vector<1x128xf32> to vector<16x128xf32>
    %9 = arith.addf %7, %8 : vector<16x128xf32>
    %10 = vector.extract_strided_slice %9 {offsets = [0, 0], sizes = [2, 128], strides = [1, 1]} : vector<16x128xf32> to vector<2x128xf32>
    %c0_10 = arith.constant 0 : index
    %c0_11 = arith.constant 0 : index
    %c0_12 = arith.constant 0 : index
    %11 = vector.load %arg6[%c0_10, %c0_11, %c0_12] : memref<8x2x128xf32, #tpu.memory_space<vmem>>, vector<1x2x128xf32>
    %12 = vector.shape_cast %11 : vector<1x2x128xf32> to vector<2x128xf32>
    %13 = vector.shape_cast %10 : vector<2x128xf32> to vector<1x2x128xf32>
    tpu.vector_store %arg6[%c0_10, %c0_11, %c0_12], %13 {strides = array<i32>} : memref<8x2x128xf32, #tpu.memory_space<vmem>>, vector<1x2x128xf32>,
    %14 = vector.extract_strided_slice %9 {offsets = [2, 0], sizes = [2, 128], strides = [1, 1]} : vector<16x128xf32> to vector<2x128xf32>
    %c1 = arith.constant 1 : index
    %c0_13 = arith.constant 0 : index
    %c0_14 = arith.constant 0 : index
    %15 = vector.load %arg6[%c1, %c0_13, %c0_14] : memref<8x2x128xf32, #tpu.memory_space<vmem>>, vector<1x2x128xf32>
    %16 = vector.shape_cast %15 : vector<1x2x128xf32> to vector<2x128xf32>
    %17 = vector.shape_cast %14 : vector<2x128xf32> to vector<1x2x128xf32>
    tpu.vector_store %arg6[%c1, %c0_13, %c0_14], %17 {strides = array<i32>} : memref<8x2x128xf32, #tpu.memory_space<vmem>>, vector<1x2x128xf32>,
    %18 = vector.extract_strided_slice %9 {offsets = [4, 0], sizes = [2, 128], strides = [1, 1]} : vector<16x128xf32> to vector<2x128xf32>
    %c2 = arith.constant 2 : index
    %c0_15 = arith.constant 0 : index
    %c0_16 = arith.constant 0 : index
    %19 = vector.load %arg6[%c2, %c0_15, %c0_16] : memref<8x2x128xf32, #tpu.memory_space<vmem>>, vector<1x2x128xf32>
    %20 = vector.shape_cast %19 : vector<1x2x128xf32> to vector<2x128xf32>
    %21 = vector.shape_cast %18 : vector<2x128xf32> to vector<1x2x128xf32>
    tpu.vector_store %arg6[%c2, %c0_15, %c0_16], %21 {strides = array<i32>} : memref<8x2x128xf32, #tpu.memory_space<vmem>>, vector<1x2x128xf32>,
    %22 = vector.extract_strided_slice %9 {offsets = [6, 0], sizes = [2, 128], strides = [1, 1]} : vector<16x128xf32> to vector<2x128xf32>
    %c3 = arith.constant 3 : index
    %c0_17 = arith.constant 0 : index
    %c0_18 = arith.constant 0 : index
    %23 = vector.load %arg6[%c3, %c0_17, %c0_18] : memref<8x2x128xf32, #tpu.memory_space<vmem>>, vector<1x2x128xf32>
    %24 = vector.shape_cast %23 : vector<1x2x128xf32> to vector<2x128xf32>
    %25 = vector.shape_cast %22 : vector<2x128xf32> to vector<1x2x128xf32>
    tpu.vector_store %arg6[%c3, %c0_17, %c0_18], %25 {strides = array<i32>} : memref<8x2x128xf32, #tpu.memory_space<vmem>>, vector<1x2x128xf32>,
    %26 = vector.extract_strided_slice %9 {offsets = [8, 0], sizes = [2, 128], strides = [1, 1]} : vector<16x128xf32> to vector<2x128xf32>
    %c4 = arith.constant 4 : index
    %c0_19 = arith.constant 0 : index
    %c0_20 = arith.constant 0 : index
    %27 = vector.load %arg6[%c4, %c0_19, %c0_20] : memref<8x2x128xf32, #tpu.memory_space<vmem>>, vector<1x2x128xf32>
    %28 = vector.shape_cast %27 : vector<1x2x128xf32> to vector<2x128xf32>
    %29 = vector.shape_cast %26 : vector<2x128xf32> to vector<1x2x128xf32>
    tpu.vector_store %arg6[%c4, %c0_19, %c0_20], %29 {strides = array<i32>} : memref<8x2x128xf32, #tpu.memory_space<vmem>>, vector<1x2x128xf32>,
    %30 = vector.extract_strided_slice %9 {offsets = [10, 0], sizes = [2, 128], strides = [1, 1]} : vector<16x128xf32> to vector<2x128xf32>
    %c5 = arith.constant 5 : index
    %c0_21 = arith.constant 0 : index
    %c0_22 = arith.constant 0 : index
    %31 = vector.load %arg6[%c5, %c0_21, %c0_22] : memref<8x2x128xf32, #tpu.memory_space<vmem>>, vector<1x2x128xf32>
    %32 = vector.shape_cast %31 : vector<1x2x128xf32> to vector<2x128xf32>
    %33 = vector.shape_cast %30 : vector<2x128xf32> to vector<1x2x128xf32>
    tpu.vector_store %arg6[%c5, %c0_21, %c0_22], %33 {strides = array<i32>} : memref<8x2x128xf32, #tpu.memory_space<vmem>>, vector<1x2x128xf32>,
    %34 = vector.extract_strided_slice %9 {offsets = [12, 0], sizes = [2, 128], strides = [1, 1]} : vector<16x128xf32> to vector<2x128xf32>
    %c6 = arith.constant 6 : index
    %c0_23 = arith.constant 0 : index
    %c0_24 = arith.constant 0 : index
    %35 = vector.load %arg6[%c6, %c0_23, %c0_24] : memref<8x2x128xf32, #tpu.memory_space<vmem>>, vector<1x2x128xf32>
    %36 = vector.shape_cast %35 : vector<1x2x128xf32> to vector<2x128xf32>
    %37 = vector.shape_cast %34 : vector<2x128xf32> to vector<1x2x128xf32>
    tpu.vector_store %arg6[%c6, %c0_23, %c0_24], %37 {strides = array<i32>} : memref<8x2x128xf32, #tpu.memory_space<vmem>>, vector<1x2x128xf32>,
    %38 = vector.extract_strided_slice %9 {offsets = [14, 0], sizes = [2, 128], strides = [1, 1]} : vector<16x128xf32> to vector<2x128xf32>
    %c7 = arith.constant 7 : index
    %c0_25 = arith.constant 0 : index
    %c0_26 = arith.constant 0 : index
    %39 = vector.load %arg6[%c7, %c0_25, %c0_26] : memref<8x2x128xf32, #tpu.memory_space<vmem>>, vector<1x2x128xf32>
    %40 = vector.shape_cast %39 : vector<1x2x128xf32> to vector<2x128xf32>
    %41 = vector.shape_cast %38 : vector<2x128xf32> to vector<1x2x128xf32>
    tpu.vector_store %arg6[%c7, %c0_25, %c0_26], %41 {strides = array<i32>} : memref<8x2x128xf32, #tpu.memory_space<vmem>>, vector<1x2x128xf32>,
    %cst_27 = arith.constant 0.000000e+00 : f32
    %42 = vector.broadcast %cst_27 : f32 to vector<2x32xf32>
    %c0_28 = arith.constant 0 : index
    %c0_29 = arith.constant 0 : index
    %43 = vector.load %arg7[%c0_28, %c0_29] : memref<2x32xf32, #tpu.memory_space<vmem>>, vector<2x32xf32>
    tpu.vector_store %arg7[%c0_28, %c0_29], %42 {strides = array<i32>} : memref<2x32xf32, #tpu.memory_space<vmem>>, vector<2x32xf32>,
    %cst_30 = arith.constant 0.000000e+00 : f32
    %44 = vector.broadcast %cst_30 : f32 to vector<2x32xf32>
    %c0_31 = arith.constant 0 : index
    %c0_32 = arith.constant 0 : index
    %45 = vector.load %arg8[%c0_31, %c0_32] : memref<2x32xf32, #tpu.memory_space<vmem>>, vector<2x32xf32>
    tpu.vector_store %arg8[%c0_31, %c0_32], %44 {strides = array<i32>} : memref<2x32xf32, #tpu.memory_space<vmem>>, vector<2x32xf32>,
    %c0_i32 = arith.constant 0 : i32
    %c2_i32 = arith.constant 2 : i32
    %46 = arith.muli %c2_i32, %c0_i32 : i32
    %c7_i32 = arith.constant 7 : i32
    %47 = arith.subi %c7_i32, %46 : i32
    %48 = arith.muli %arg0, %47 : i32
    %49 = arith.addi %c0_i32, %48 : i32
    %50 = arith.index_cast %49 : i32 to index
    %c0_33 = arith.constant 0 : index
    %c0_34 = arith.constant 0 : index
    %51 = vector.load %arg6[%50, %c0_33, %c0_34] : memref<8x2x128xf32, #tpu.memory_space<vmem>>, vector<1x2x128xf32>
    %52 = vector.shape_cast %51 : vector<1x2x128xf32> to vector<2x128xf32>
    %c0_35 = arith.constant 0 : index
    %c0_36 = arith.constant 0 : index
    %53 = vector.load %arg7[%c0_35, %c0_36] : memref<2x32xf32, #tpu.memory_space<vmem>>, vector<2x32xf32>
    %cst_37 = arith.constant dense<0.000000e+00> : vector<2x128xf32>
    %54 = tpu.matmul %53, %3, %cst_37 {dimension_numbers = #tpu.dot_dimension_numbers<[1], [0], [0], [1], [0, 0, 1, 1], [], []>} : vector<2x32xf32>, vector<32x128xf32>, vector<2x128xf32> -> vector<2x128xf32>
    %55 = arith.addf %52, %54 : vector<2x128xf32>
    %56 = arith.negf %55 : vector<2x128xf32>
    %57 = math.exp %56 : vector<2x128xf32>
    %cst_38 = arith.constant 1.000000e+00 : f32
    %58 = vector.broadcast %cst_38 : f32 to vector<2x128xf32>
    %59 = arith.addf %58, %57 : vector<2x128xf32>
    %60 = arith.divf %58, %59 : vector<2x128xf32>
    %61 = math.tanh %55 : vector<2x128xf32>
    %62 = vector.extract_strided_slice %60 {offsets = [0, 0], sizes = [2, 32], strides = [1, 1]} : vector<2x128xf32> to vector<2x32xf32>
    %63 = vector.extract_strided_slice %60 {offsets = [0, 32], sizes = [2, 32], strides = [1, 1]} : vector<2x128xf32> to vector<2x32xf32>
    %64 = vector.extract_strided_slice %61 {offsets = [0, 64], sizes = [2, 32], strides = [1, 1]} : vector<2x128xf32> to vector<2x32xf32>
    %65 = vector.extract_strided_slice %60 {offsets = [0, 96], sizes = [2, 32], strides = [1, 1]} : vector<2x128xf32> to vector<2x32xf32>
    %c0_39 = arith.constant 0 : index
    %c0_40 = arith.constant 0 : index
    %66 = vector.load %arg8[%c0_39, %c0_40] : memref<2x32xf32, #tpu.memory_space<vmem>>, vector<2x32xf32>
    %67 = arith.mulf %63, %66 : vector<2x32xf32>
    %68 = arith.mulf %62, %64 : vector<2x32xf32>
    %69 = arith.addf %67, %68 : vector<2x32xf32>
    %70 = math.tanh %69 : vector<2x32xf32>
    %71 = arith.mulf %65, %70 : vector<2x32xf32>
    %c0_41 = arith.constant 0 : index
    %c0_42 = arith.constant 0 : index
    %72 = vector.load %arg8[%c0_41, %c0_42] : memref<2x32xf32, #tpu.memory_space<vmem>>, vector<2x32xf32>
    tpu.vector_store %arg8[%c0_41, %c0_42], %69 {strides = array<i32>} : memref<2x32xf32, #tpu.memory_space<vmem>>, vector<2x32xf32>,
    %c0_43 = arith.constant 0 : index
    %c0_44 = arith.constant 0 : index
    %73 = vector.load %arg7[%c0_43, %c0_44] : memref<2x32xf32, #tpu.memory_space<vmem>>, vector<2x32xf32>
    tpu.vector_store %arg7[%c0_43, %c0_44], %71 {strides = array<i32>} : memref<2x32xf32, #tpu.memory_space<vmem>>, vector<2x32xf32>,
    %c0_45 = arith.constant 0 : index
    %74 = arith.index_cast %49 : i32 to index
    %c0_46 = arith.constant 0 : index
    %c0_47 = arith.constant 0 : index
    %75 = vector.load %arg5[%c0_45, %74, %c0_46, %c0_47] : memref<1x8x2x32xf32, #tpu.memory_space<vmem>>, vector<1x1x2x32xf32>
    %76 = vector.shape_cast %75 : vector<1x1x2x32xf32> to vector<2x32xf32>
    %77 = vector.shape_cast %71 : vector<2x32xf32> to vector<1x1x2x32xf32>
    tpu.vector_store %arg5[%c0_45, %74, %c0_46, %c0_47], %77 {strides = array<i32>} : memref<1x8x2x32xf32, #tpu.memory_space<vmem>>, vector<1x1x2x32xf32>,
    %c1_i32 = arith.constant 1 : i32
    %c2_i32_48 = arith.constant 2 : i32
    %78 = arith.muli %c2_i32_48, %c1_i32 : i32
    %c7_i32_49 = arith.constant 7 : i32
    %79 = arith.subi %c7_i32_49, %78 : i32
    %80 = arith.muli %arg0, %79 : i32
    %81 = arith.addi %c1_i32, %80 : i32
    %82 = arith.index_cast %81 : i32 to index
    %c0_50 = arith.constant 0 : index
    %c0_51 = arith.constant 0 : index
    %83 = vector.load %arg6[%82, %c0_50, %c0_51] : memref<8x2x128xf32, #tpu.memory_space<vmem>>, vector<1x2x128xf32>
    %84 = vector.shape_cast %83 : vector<1x2x128xf32> to vector<2x128xf32>
    %c0_52 = arith.constant 0 : index
    %c0_53 = arith.constant 0 : index
    %85 = vector.load %arg7[%c0_52, %c0_53] : memref<2x32xf32, #tpu.memory_space<vmem>>, vector<2x32xf32>
    %cst_54 = arith.constant dense<0.000000e+00> : vector<2x128xf32>
    %86 = tpu.matmul %85, %3, %cst_54 {dimension_numbers = #tpu.dot_dimension_numbers<[1], [0], [0], [1], [0, 0, 1, 1], [], []>} : vector<2x32xf32>, vector<32x128xf32>, vector<2x128xf32> -> vector<2x128xf32>
    %87 = arith.addf %84, %86 : vector<2x128xf32>
    %88 = arith.negf %87 : vector<2x128xf32>
    %89 = math.exp %88 : vector<2x128xf32>
    %cst_55 = arith.constant 1.000000e+00 : f32
    %90 = vector.broadcast %cst_55 : f32 to vector<2x128xf32>
    %91 = arith.addf %90, %89 : vector<2x128xf32>
    %92 = arith.divf %90, %91 : vector<2x128xf32>
    %93 = math.tanh %87 : vector<2x128xf32>
    %94 = vector.extract_strided_slice %92 {offsets = [0, 0], sizes = [2, 32], strides = [1, 1]} : vector<2x128xf32> to vector<2x32xf32>
    %95 = vector.extract_strided_slice %92 {offsets = [0, 32], sizes = [2, 32], strides = [1, 1]} : vector<2x128xf32> to vector<2x32xf32>
    %96 = vector.extract_strided_slice %93 {offsets = [0, 64], sizes = [2, 32], strides = [1, 1]} : vector<2x128xf32> to vector<2x32xf32>
    %97 = vector.extract_strided_slice %92 {offsets = [0, 96], sizes = [2, 32], strides = [1, 1]} : vector<2x128xf32> to vector<2x32xf32>
    %c0_56 = arith.constant 0 : index
    %c0_57 = arith.constant 0 : index
    %98 = vector.load %arg8[%c0_56, %c0_57] : memref<2x32xf32, #tpu.memory_space<vmem>>, vector<2x32xf32>
    %99 = arith.mulf %95, %98 : vector<2x32xf32>
    %100 = arith.mulf %94, %96 : vector<2x32xf32>
    %101 = arith.addf %99, %100 : vector<2x32xf32>
    %102 = math.tanh %101 : vector<2x32xf32>
    %103 = arith.mulf %97, %102 : vector<2x32xf32>
    %c0_58 = arith.constant 0 : index
    %c0_59 = arith.constant 0 : index
    %104 = vector.load %arg8[%c0_58, %c0_59] : memref<2x32xf32, #tpu.memory_space<vmem>>, vector<2x32xf32>
    tpu.vector_store %arg8[%c0_58, %c0_59], %101 {strides = array<i32>} : memref<2x32xf32, #tpu.memory_space<vmem>>, vector<2x32xf32>,
    %c0_60 = arith.constant 0 : index
    %c0_61 = arith.constant 0 : index
    %105 = vector.load %arg7[%c0_60, %c0_61] : memref<2x32xf32, #tpu.memory_space<vmem>>, vector<2x32xf32>
    tpu.vector_store %arg7[%c0_60, %c0_61], %103 {strides = array<i32>} : memref<2x32xf32, #tpu.memory_space<vmem>>, vector<2x32xf32>,
    %c0_62 = arith.constant 0 : index
    %106 = arith.index_cast %81 : i32 to index
    %c0_63 = arith.constant 0 : index
    %c0_64 = arith.constant 0 : index
    %107 = vector.load %arg5[%c0_62, %106, %c0_63, %c0_64] : memref<1x8x2x32xf32, #tpu.memory_space<vmem>>, vector<1x1x2x32xf32>
    %108 = vector.shape_cast %107 : vector<1x1x2x32xf32> to vector<2x32xf32>
    %109 = vector.shape_cast %103 : vector<2x32xf32> to vector<1x1x2x32xf32>
    tpu.vector_store %arg5[%c0_62, %106, %c0_63, %c0_64], %109 {strides = array<i32>} : memref<1x8x2x32xf32, #tpu.memory_space<vmem>>, vector<1x1x2x32xf32>,
    %c2_i32_65 = arith.constant 2 : i32
    %c2_i32_66 = arith.constant 2 : i32
    %110 = arith.muli %c2_i32_66, %c2_i32_65 : i32
    %c7_i32_67 = arith.constant 7 : i32
    %111 = arith.subi %c7_i32_67, %110 : i32
    %112 = arith.muli %arg0, %111 : i32
    %113 = arith.addi %c2_i32_65, %112 : i32
    %114 = arith.index_cast %113 : i32 to index
    %c0_68 = arith.constant 0 : index
    %c0_69 = arith.constant 0 : index
    %115 = vector.load %arg6[%114, %c0_68, %c0_69] : memref<8x2x128xf32, #tpu.memory_space<vmem>>, vector<1x2x128xf32>
    %116 = vector.shape_cast %115 : vector<1x2x128xf32> to vector<2x128xf32>
    %c0_70 = arith.constant 0 : index
    %c0_71 = arith.constant 0 : index
    %117 = vector.load %arg7[%c0_70, %c0_71] : memref<2x32xf32, #tpu.memory_space<vmem>>, vector<2x32xf32>
    %cst_72 = arith.constant dense<0.000000e+00> : vector<2x128xf32>
    %118 = tpu.matmul %117, %3, %cst_72 {dimension_numbers = #tpu.dot_dimension_numbers<[1], [0], [0], [1], [0, 0, 1, 1], [], []>} : vector<2x32xf32>, vector<32x128xf32>, vector<2x128xf32> -> vector<2x128xf32>
    %119 = arith.addf %116, %118 : vector<2x128xf32>
    %120 = arith.negf %119 : vector<2x128xf32>
    %121 = math.exp %120 : vector<2x128xf32>
    %cst_73 = arith.constant 1.000000e+00 : f32
    %122 = vector.broadcast %cst_73 : f32 to vector<2x128xf32>
    %123 = arith.addf %122, %121 : vector<2x128xf32>
    %124 = arith.divf %122, %123 : vector<2x128xf32>
    %125 = math.tanh %119 : vector<2x128xf32>
    %126 = vector.extract_strided_slice %124 {offsets = [0, 0], sizes = [2, 32], strides = [1, 1]} : vector<2x128xf32> to vector<2x32xf32>
    %127 = vector.extract_strided_slice %124 {offsets = [0, 32], sizes = [2, 32], strides = [1, 1]} : vector<2x128xf32> to vector<2x32xf32>
    %128 = vector.extract_strided_slice %125 {offsets = [0, 64], sizes = [2, 32], strides = [1, 1]} : vector<2x128xf32> to vector<2x32xf32>
    %129 = vector.extract_strided_slice %124 {offsets = [0, 96], sizes = [2, 32], strides = [1, 1]} : vector<2x128xf32> to vector<2x32xf32>
    %c0_74 = arith.constant 0 : index
    %c0_75 = arith.constant 0 : index
    %130 = vector.load %arg8[%c0_74, %c0_75] : memref<2x32xf32, #tpu.memory_space<vmem>>, vector<2x32xf32>
    %131 = arith.mulf %127, %130 : vector<2x32xf32>
    %132 = arith.mulf %126, %128 : vector<2x32xf32>
    %133 = arith.addf %131, %132 : vector<2x32xf32>
    %134 = math.tanh %133 : vector<2x32xf32>
    %135 = arith.mulf %129, %134 : vector<2x32xf32>
    %c0_76 = arith.constant 0 : index
    %c0_77 = arith.constant 0 : index
    %136 = vector.load %arg8[%c0_76, %c0_77] : memref<2x32xf32, #tpu.memory_space<vmem>>, vector<2x32xf32>
    tpu.vector_store %arg8[%c0_76, %c0_77], %133 {strides = array<i32>} : memref<2x32xf32, #tpu.memory_space<vmem>>, vector<2x32xf32>,
    %c0_78 = arith.constant 0 : index
    %c0_79 = arith.constant 0 : index
    %137 = vector.load %arg7[%c0_78, %c0_79] : memref<2x32xf32, #tpu.memory_space<vmem>>, vector<2x32xf32>
    tpu.vector_store %arg7[%c0_78, %c0_79], %135 {strides = array<i32>} : memref<2x32xf32, #tpu.memory_space<vmem>>, vector<2x32xf32>,
    %c0_80 = arith.constant 0 : index
    %138 = arith.index_cast %113 : i32 to index
    %c0_81 = arith.constant 0 : index
    %c0_82 = arith.constant 0 : index
    %139 = vector.load %arg5[%c0_80, %138, %c0_81, %c0_82] : memref<1x8x2x32xf32, #tpu.memory_space<vmem>>, vector<1x1x2x32xf32>
    %140 = vector.shape_cast %139 : vector<1x1x2x32xf32> to vector<2x32xf32>
    %141 = vector.shape_cast %135 : vector<2x32xf32> to vector<1x1x2x32xf32>
    tpu.vector_store %arg5[%c0_80, %138, %c0_81, %c0_82], %141 {strides = array<i32>} : memref<1x8x2x32xf32, #tpu.memory_space<vmem>>, vector<1x1x2x32xf32>,
    %c3_i32 = arith.constant 3 : i32
    %c2_i32_83 = arith.constant 2 : i32
    %142 = arith.muli %c2_i32_83, %c3_i32 : i32
    %c7_i32_84 = arith.constant 7 : i32
    %143 = arith.subi %c7_i32_84, %142 : i32
    %144 = arith.muli %arg0, %143 : i32
    %145 = arith.addi %c3_i32, %144 : i32
    %146 = arith.index_cast %145 : i32 to index
    %c0_85 = arith.constant 0 : index
    %c0_86 = arith.constant 0 : index
    %147 = vector.load %arg6[%146, %c0_85, %c0_86] : memref<8x2x128xf32, #tpu.memory_space<vmem>>, vector<1x2x128xf32>
    %148 = vector.shape_cast %147 : vector<1x2x128xf32> to vector<2x128xf32>
    %c0_87 = arith.constant 0 : index
    %c0_88 = arith.constant 0 : index
    %149 = vector.load %arg7[%c0_87, %c0_88] : memref<2x32xf32, #tpu.memory_space<vmem>>, vector<2x32xf32>
    %cst_89 = arith.constant dense<0.000000e+00> : vector<2x128xf32>
    %150 = tpu.matmul %149, %3, %cst_89 {dimension_numbers = #tpu.dot_dimension_numbers<[1], [0], [0], [1], [0, 0, 1, 1], [], []>} : vector<2x32xf32>, vector<32x128xf32>, vector<2x128xf32> -> vector<2x128xf32>
    %151 = arith.addf %148, %150 : vector<2x128xf32>
    %152 = arith.negf %151 : vector<2x128xf32>
    %153 = math.exp %152 : vector<2x128xf32>
    %cst_90 = arith.constant 1.000000e+00 : f32
    %154 = vector.broadcast %cst_90 : f32 to vector<2x128xf32>
    %155 = arith.addf %154, %153 : vector<2x128xf32>
    %156 = arith.divf %154, %155 : vector<2x128xf32>
    %157 = math.tanh %151 : vector<2x128xf32>
    %158 = vector.extract_strided_slice %156 {offsets = [0, 0], sizes = [2, 32], strides = [1, 1]} : vector<2x128xf32> to vector<2x32xf32>
    %159 = vector.extract_strided_slice %156 {offsets = [0, 32], sizes = [2, 32], strides = [1, 1]} : vector<2x128xf32> to vector<2x32xf32>
    %160 = vector.extract_strided_slice %157 {offsets = [0, 64], sizes = [2, 32], strides = [1, 1]} : vector<2x128xf32> to vector<2x32xf32>
    %161 = vector.extract_strided_slice %156 {offsets = [0, 96], sizes = [2, 32], strides = [1, 1]} : vector<2x128xf32> to vector<2x32xf32>
    %c0_91 = arith.constant 0 : index
    %c0_92 = arith.constant 0 : index
    %162 = vector.load %arg8[%c0_91, %c0_92] : memref<2x32xf32, #tpu.memory_space<vmem>>, vector<2x32xf32>
    %163 = arith.mulf %159, %162 : vector<2x32xf32>
    %164 = arith.mulf %158, %160 : vector<2x32xf32>
    %165 = arith.addf %163, %164 : vector<2x32xf32>
    %166 = math.tanh %165 : vector<2x32xf32>
    %167 = arith.mulf %161, %166 : vector<2x32xf32>
    %c0_93 = arith.constant 0 : index
    %c0_94 = arith.constant 0 : index
    %168 = vector.load %arg8[%c0_93, %c0_94] : memref<2x32xf32, #tpu.memory_space<vmem>>, vector<2x32xf32>
    tpu.vector_store %arg8[%c0_93, %c0_94], %165 {strides = array<i32>} : memref<2x32xf32, #tpu.memory_space<vmem>>, vector<2x32xf32>,
    %c0_95 = arith.constant 0 : index
    %c0_96 = arith.constant 0 : index
    %169 = vector.load %arg7[%c0_95, %c0_96] : memref<2x32xf32, #tpu.memory_space<vmem>>, vector<2x32xf32>
    tpu.vector_store %arg7[%c0_95, %c0_96], %167 {strides = array<i32>} : memref<2x32xf32, #tpu.memory_space<vmem>>, vector<2x32xf32>,
    %c0_97 = arith.constant 0 : index
    %170 = arith.index_cast %145 : i32 to index
    %c0_98 = arith.constant 0 : index
    %c0_99 = arith.constant 0 : index
    %171 = vector.load %arg5[%c0_97, %170, %c0_98, %c0_99] : memref<1x8x2x32xf32, #tpu.memory_space<vmem>>, vector<1x1x2x32xf32>
    %172 = vector.shape_cast %171 : vector<1x1x2x32xf32> to vector<2x32xf32>
    %173 = vector.shape_cast %167 : vector<2x32xf32> to vector<1x1x2x32xf32>
    tpu.vector_store %arg5[%c0_97, %170, %c0_98, %c0_99], %173 {strides = array<i32>} : memref<1x8x2x32xf32, #tpu.memory_space<vmem>>, vector<1x1x2x32xf32>,
    %c4_i32 = arith.constant 4 : i32
    %c2_i32_100 = arith.constant 2 : i32
    %174 = arith.muli %c2_i32_100, %c4_i32 : i32
    %c7_i32_101 = arith.constant 7 : i32
    %175 = arith.subi %c7_i32_101, %174 : i32
    %176 = arith.muli %arg0, %175 : i32
    %177 = arith.addi %c4_i32, %176 : i32
    %178 = arith.index_cast %177 : i32 to index
    %c0_102 = arith.constant 0 : index
    %c0_103 = arith.constant 0 : index
    %179 = vector.load %arg6[%178, %c0_102, %c0_103] : memref<8x2x128xf32, #tpu.memory_space<vmem>>, vector<1x2x128xf32>
    %180 = vector.shape_cast %179 : vector<1x2x128xf32> to vector<2x128xf32>
    %c0_104 = arith.constant 0 : index
    %c0_105 = arith.constant 0 : index
    %181 = vector.load %arg7[%c0_104, %c0_105] : memref<2x32xf32, #tpu.memory_space<vmem>>, vector<2x32xf32>
    %cst_106 = arith.constant dense<0.000000e+00> : vector<2x128xf32>
    %182 = tpu.matmul %181, %3, %cst_106 {dimension_numbers = #tpu.dot_dimension_numbers<[1], [0], [0], [1], [0, 0, 1, 1], [], []>} : vector<2x32xf32>, vector<32x128xf32>, vector<2x128xf32> -> vector<2x128xf32>
    %183 = arith.addf %180, %182 : vector<2x128xf32>
    %184 = arith.negf %183 : vector<2x128xf32>
    %185 = math.exp %184 : vector<2x128xf32>
    %cst_107 = arith.constant 1.000000e+00 : f32
    %186 = vector.broadcast %cst_107 : f32 to vector<2x128xf32>
    %187 = arith.addf %186, %185 : vector<2x128xf32>
    %188 = arith.divf %186, %187 : vector<2x128xf32>
    %189 = math.tanh %183 : vector<2x128xf32>
    %190 = vector.extract_strided_slice %188 {offsets = [0, 0], sizes = [2, 32], strides = [1, 1]} : vector<2x128xf32> to vector<2x32xf32>
    %191 = vector.extract_strided_slice %188 {offsets = [0, 32], sizes = [2, 32], strides = [1, 1]} : vector<2x128xf32> to vector<2x32xf32>
    %192 = vector.extract_strided_slice %189 {offsets = [0, 64], sizes = [2, 32], strides = [1, 1]} : vector<2x128xf32> to vector<2x32xf32>
    %193 = vector.extract_strided_slice %188 {offsets = [0, 96], sizes = [2, 32], strides = [1, 1]} : vector<2x128xf32> to vector<2x32xf32>
    %c0_108 = arith.constant 0 : index
    %c0_109 = arith.constant 0 : index
    %194 = vector.load %arg8[%c0_108, %c0_109] : memref<2x32xf32, #tpu.memory_space<vmem>>, vector<2x32xf32>
    %195 = arith.mulf %191, %194 : vector<2x32xf32>
    %196 = arith.mulf %190, %192 : vector<2x32xf32>
    %197 = arith.addf %195, %196 : vector<2x32xf32>
    %198 = math.tanh %197 : vector<2x32xf32>
    %199 = arith.mulf %193, %198 : vector<2x32xf32>
    %c0_110 = arith.constant 0 : index
    %c0_111 = arith.constant 0 : index
    %200 = vector.load %arg8[%c0_110, %c0_111] : memref<2x32xf32, #tpu.memory_space<vmem>>, vector<2x32xf32>
    tpu.vector_store %arg8[%c0_110, %c0_111], %197 {strides = array<i32>} : memref<2x32xf32, #tpu.memory_space<vmem>>, vector<2x32xf32>,
    %c0_112 = arith.constant 0 : index
    %c0_113 = arith.constant 0 : index
    %201 = vector.load %arg7[%c0_112, %c0_113] : memref<2x32xf32, #tpu.memory_space<vmem>>, vector<2x32xf32>
    tpu.vector_store %arg7[%c0_112, %c0_113], %199 {strides = array<i32>} : memref<2x32xf32, #tpu.memory_space<vmem>>, vector<2x32xf32>,
    %c0_114 = arith.constant 0 : index
    %202 = arith.index_cast %177 : i32 to index
    %c0_115 = arith.constant 0 : index
    %c0_116 = arith.constant 0 : index
    %203 = vector.load %arg5[%c0_114, %202, %c0_115, %c0_116] : memref<1x8x2x32xf32, #tpu.memory_space<vmem>>, vector<1x1x2x32xf32>
    %204 = vector.shape_cast %203 : vector<1x1x2x32xf32> to vector<2x32xf32>
    %205 = vector.shape_cast %199 : vector<2x32xf32> to vector<1x1x2x32xf32>
    tpu.vector_store %arg5[%c0_114, %202, %c0_115, %c0_116], %205 {strides = array<i32>} : memref<1x8x2x32xf32, #tpu.memory_space<vmem>>, vector<1x1x2x32xf32>,
    %c5_i32 = arith.constant 5 : i32
    %c2_i32_117 = arith.constant 2 : i32
    %206 = arith.muli %c2_i32_117, %c5_i32 : i32
    %c7_i32_118 = arith.constant 7 : i32
    %207 = arith.subi %c7_i32_118, %206 : i32
    %208 = arith.muli %arg0, %207 : i32
    %209 = arith.addi %c5_i32, %208 : i32
    %210 = arith.index_cast %209 : i32 to index
    %c0_119 = arith.constant 0 : index
    %c0_120 = arith.constant 0 : index
    %211 = vector.load %arg6[%210, %c0_119, %c0_120] : memref<8x2x128xf32, #tpu.memory_space<vmem>>, vector<1x2x128xf32>
    %212 = vector.shape_cast %211 : vector<1x2x128xf32> to vector<2x128xf32>
    %c0_121 = arith.constant 0 : index
    %c0_122 = arith.constant 0 : index
    %213 = vector.load %arg7[%c0_121, %c0_122] : memref<2x32xf32, #tpu.memory_space<vmem>>, vector<2x32xf32>
    %cst_123 = arith.constant dense<0.000000e+00> : vector<2x128xf32>
    %214 = tpu.matmul %213, %3, %cst_123 {dimension_numbers = #tpu.dot_dimension_numbers<[1], [0], [0], [1], [0, 0, 1, 1], [], []>} : vector<2x32xf32>, vector<32x128xf32>, vector<2x128xf32> -> vector<2x128xf32>
    %215 = arith.addf %212, %214 : vector<2x128xf32>
    %216 = arith.negf %215 : vector<2x128xf32>
    %217 = math.exp %216 : vector<2x128xf32>
    %cst_124 = arith.constant 1.000000e+00 : f32
    %218 = vector.broadcast %cst_124 : f32 to vector<2x128xf32>
    %219 = arith.addf %218, %217 : vector<2x128xf32>
    %220 = arith.divf %218, %219 : vector<2x128xf32>
    %221 = math.tanh %215 : vector<2x128xf32>
    %222 = vector.extract_strided_slice %220 {offsets = [0, 0], sizes = [2, 32], strides = [1, 1]} : vector<2x128xf32> to vector<2x32xf32>
    %223 = vector.extract_strided_slice %220 {offsets = [0, 32], sizes = [2, 32], strides = [1, 1]} : vector<2x128xf32> to vector<2x32xf32>
    %224 = vector.extract_strided_slice %221 {offsets = [0, 64], sizes = [2, 32], strides = [1, 1]} : vector<2x128xf32> to vector<2x32xf32>
    %225 = vector.extract_strided_slice %220 {offsets = [0, 96], sizes = [2, 32], strides = [1, 1]} : vector<2x128xf32> to vector<2x32xf32>
    %c0_125 = arith.constant 0 : index
    %c0_126 = arith.constant 0 : index
    %226 = vector.load %arg8[%c0_125, %c0_126] : memref<2x32xf32, #tpu.memory_space<vmem>>, vector<2x32xf32>
    %227 = arith.mulf %223, %226 : vector<2x32xf32>
    %228 = arith.mulf %222, %224 : vector<2x32xf32>
    %229 = arith.addf %227, %228 : vector<2x32xf32>
    %230 = math.tanh %229 : vector<2x32xf32>
    %231 = arith.mulf %225, %230 : vector<2x32xf32>
    %c0_127 = arith.constant 0 : index
    %c0_128 = arith.constant 0 : index
    %232 = vector.load %arg8[%c0_127, %c0_128] : memref<2x32xf32, #tpu.memory_space<vmem>>, vector<2x32xf32>
    tpu.vector_store %arg8[%c0_127, %c0_128], %229 {strides = array<i32>} : memref<2x32xf32, #tpu.memory_space<vmem>>, vector<2x32xf32>,
    %c0_129 = arith.constant 0 : index
    %c0_130 = arith.constant 0 : index
    %233 = vector.load %arg7[%c0_129, %c0_130] : memref<2x32xf32, #tpu.memory_space<vmem>>, vector<2x32xf32>
    tpu.vector_store %arg7[%c0_129, %c0_130], %231 {strides = array<i32>} : memref<2x32xf32, #tpu.memory_space<vmem>>, vector<2x32xf32>,
    %c0_131 = arith.constant 0 : index
    %234 = arith.index_cast %209 : i32 to index
    %c0_132 = arith.constant 0 : index
    %c0_133 = arith.constant 0 : index
    %235 = vector.load %arg5[%c0_131, %234, %c0_132, %c0_133] : memref<1x8x2x32xf32, #tpu.memory_space<vmem>>, vector<1x1x2x32xf32>
    %236 = vector.shape_cast %235 : vector<1x1x2x32xf32> to vector<2x32xf32>
    %237 = vector.shape_cast %231 : vector<2x32xf32> to vector<1x1x2x32xf32>
    tpu.vector_store %arg5[%c0_131, %234, %c0_132, %c0_133], %237 {strides = array<i32>} : memref<1x8x2x32xf32, #tpu.memory_space<vmem>>, vector<1x1x2x32xf32>,
    %c6_i32 = arith.constant 6 : i32
    %c2_i32_134 = arith.constant 2 : i32
    %238 = arith.muli %c2_i32_134, %c6_i32 : i32
    %c7_i32_135 = arith.constant 7 : i32
    %239 = arith.subi %c7_i32_135, %238 : i32
    %240 = arith.muli %arg0, %239 : i32
    %241 = arith.addi %c6_i32, %240 : i32
    %242 = arith.index_cast %241 : i32 to index
    %c0_136 = arith.constant 0 : index
    %c0_137 = arith.constant 0 : index
    %243 = vector.load %arg6[%242, %c0_136, %c0_137] : memref<8x2x128xf32, #tpu.memory_space<vmem>>, vector<1x2x128xf32>
    %244 = vector.shape_cast %243 : vector<1x2x128xf32> to vector<2x128xf32>
    %c0_138 = arith.constant 0 : index
    %c0_139 = arith.constant 0 : index
    %245 = vector.load %arg7[%c0_138, %c0_139] : memref<2x32xf32, #tpu.memory_space<vmem>>, vector<2x32xf32>
    %cst_140 = arith.constant dense<0.000000e+00> : vector<2x128xf32>
    %246 = tpu.matmul %245, %3, %cst_140 {dimension_numbers = #tpu.dot_dimension_numbers<[1], [0], [0], [1], [0, 0, 1, 1], [], []>} : vector<2x32xf32>, vector<32x128xf32>, vector<2x128xf32> -> vector<2x128xf32>
    %247 = arith.addf %244, %246 : vector<2x128xf32>
    %248 = arith.negf %247 : vector<2x128xf32>
    %249 = math.exp %248 : vector<2x128xf32>
    %cst_141 = arith.constant 1.000000e+00 : f32
    %250 = vector.broadcast %cst_141 : f32 to vector<2x128xf32>
    %251 = arith.addf %250, %249 : vector<2x128xf32>
    %252 = arith.divf %250, %251 : vector<2x128xf32>
    %253 = math.tanh %247 : vector<2x128xf32>
    %254 = vector.extract_strided_slice %252 {offsets = [0, 0], sizes = [2, 32], strides = [1, 1]} : vector<2x128xf32> to vector<2x32xf32>
    %255 = vector.extract_strided_slice %252 {offsets = [0, 32], sizes = [2, 32], strides = [1, 1]} : vector<2x128xf32> to vector<2x32xf32>
    %256 = vector.extract_strided_slice %253 {offsets = [0, 64], sizes = [2, 32], strides = [1, 1]} : vector<2x128xf32> to vector<2x32xf32>
    %257 = vector.extract_strided_slice %252 {offsets = [0, 96], sizes = [2, 32], strides = [1, 1]} : vector<2x128xf32> to vector<2x32xf32>
    %c0_142 = arith.constant 0 : index
    %c0_143 = arith.constant 0 : index
    %258 = vector.load %arg8[%c0_142, %c0_143] : memref<2x32xf32, #tpu.memory_space<vmem>>, vector<2x32xf32>
    %259 = arith.mulf %255, %258 : vector<2x32xf32>
    %260 = arith.mulf %254, %256 : vector<2x32xf32>
    %261 = arith.addf %259, %260 : vector<2x32xf32>
    %262 = math.tanh %261 : vector<2x32xf32>
    %263 = arith.mulf %257, %262 : vector<2x32xf32>
    %c0_144 = arith.constant 0 : index
    %c0_145 = arith.constant 0 : index
    %264 = vector.load %arg8[%c0_144, %c0_145] : memref<2x32xf32, #tpu.memory_space<vmem>>, vector<2x32xf32>
    tpu.vector_store %arg8[%c0_144, %c0_145], %261 {strides = array<i32>} : memref<2x32xf32, #tpu.memory_space<vmem>>, vector<2x32xf32>,
    %c0_146 = arith.constant 0 : index
    %c0_147 = arith.constant 0 : index
    %265 = vector.load %arg7[%c0_146, %c0_147] : memref<2x32xf32, #tpu.memory_space<vmem>>, vector<2x32xf32>
    tpu.vector_store %arg7[%c0_146, %c0_147], %263 {strides = array<i32>} : memref<2x32xf32, #tpu.memory_space<vmem>>, vector<2x32xf32>,
    %c0_148 = arith.constant 0 : index
    %266 = arith.index_cast %241 : i32 to index
    %c0_149 = arith.constant 0 : index
    %c0_150 = arith.constant 0 : index
    %267 = vector.load %arg5[%c0_148, %266, %c0_149, %c0_150] : memref<1x8x2x32xf32, #tpu.memory_space<vmem>>, vector<1x1x2x32xf32>
    %268 = vector.shape_cast %267 : vector<1x1x2x32xf32> to vector<2x32xf32>
    %269 = vector.shape_cast %263 : vector<2x32xf32> to vector<1x1x2x32xf32>
    tpu.vector_store %arg5[%c0_148, %266, %c0_149, %c0_150], %269 {strides = array<i32>} : memref<1x8x2x32xf32, #tpu.memory_space<vmem>>, vector<1x1x2x32xf32>,
    %c7_i32_151 = arith.constant 7 : i32
    %c2_i32_152 = arith.constant 2 : i32
    %270 = arith.muli %c2_i32_152, %c7_i32_151 : i32
    %c7_i32_153 = arith.constant 7 : i32
    %271 = arith.subi %c7_i32_153, %270 : i32
    %272 = arith.muli %arg0, %271 : i32
    %273 = arith.addi %c7_i32_151, %272 : i32
    %274 = arith.index_cast %273 : i32 to index
    %c0_154 = arith.constant 0 : index
    %c0_155 = arith.constant 0 : index
    %275 = vector.load %arg6[%274, %c0_154, %c0_155] : memref<8x2x128xf32, #tpu.memory_space<vmem>>, vector<1x2x128xf32>
    %276 = vector.shape_cast %275 : vector<1x2x128xf32> to vector<2x128xf32>
    %c0_156 = arith.constant 0 : index
    %c0_157 = arith.constant 0 : index
    %277 = vector.load %arg7[%c0_156, %c0_157] : memref<2x32xf32, #tpu.memory_space<vmem>>, vector<2x32xf32>
    %cst_158 = arith.constant dense<0.000000e+00> : vector<2x128xf32>
    %278 = tpu.matmul %277, %3, %cst_158 {dimension_numbers = #tpu.dot_dimension_numbers<[1], [0], [0], [1], [0, 0, 1, 1], [], []>} : vector<2x32xf32>, vector<32x128xf32>, vector<2x128xf32> -> vector<2x128xf32>
    %279 = arith.addf %276, %278 : vector<2x128xf32>
    %280 = arith.negf %279 : vector<2x128xf32>
    %281 = math.exp %280 : vector<2x128xf32>
    %cst_159 = arith.constant 1.000000e+00 : f32
    %282 = vector.broadcast %cst_159 : f32 to vector<2x128xf32>
    %283 = arith.addf %282, %281 : vector<2x128xf32>
    %284 = arith.divf %282, %283 : vector<2x128xf32>
    %285 = math.tanh %279 : vector<2x128xf32>
    %286 = vector.extract_strided_slice %284 {offsets = [0, 0], sizes = [2, 32], strides = [1, 1]} : vector<2x128xf32> to vector<2x32xf32>
    %287 = vector.extract_strided_slice %284 {offsets = [0, 32], sizes = [2, 32], strides = [1, 1]} : vector<2x128xf32> to vector<2x32xf32>
    %288 = vector.extract_strided_slice %285 {offsets = [0, 64], sizes = [2, 32], strides = [1, 1]} : vector<2x128xf32> to vector<2x32xf32>
    %289 = vector.extract_strided_slice %284 {offsets = [0, 96], sizes = [2, 32], strides = [1, 1]} : vector<2x128xf32> to vector<2x32xf32>
    %c0_160 = arith.constant 0 : index
    %c0_161 = arith.constant 0 : index
    %290 = vector.load %arg8[%c0_160, %c0_161] : memref<2x32xf32, #tpu.memory_space<vmem>>, vector<2x32xf32>
    %291 = arith.mulf %287, %290 : vector<2x32xf32>
    %292 = arith.mulf %286, %288 : vector<2x32xf32>
    %293 = arith.addf %291, %292 : vector<2x32xf32>
    %294 = math.tanh %293 : vector<2x32xf32>
    %295 = arith.mulf %289, %294 : vector<2x32xf32>
    %c0_162 = arith.constant 0 : index
    %c0_163 = arith.constant 0 : index
    %296 = vector.load %arg8[%c0_162, %c0_163] : memref<2x32xf32, #tpu.memory_space<vmem>>, vector<2x32xf32>
    tpu.vector_store %arg8[%c0_162, %c0_163], %293 {strides = array<i32>} : memref<2x32xf32, #tpu.memory_space<vmem>>, vector<2x32xf32>,
    %c0_164 = arith.constant 0 : index
    %c0_165 = arith.constant 0 : index
    %297 = vector.load %arg7[%c0_164, %c0_165] : memref<2x32xf32, #tpu.memory_space<vmem>>, vector<2x32xf32>
    tpu.vector_store %arg7[%c0_164, %c0_165], %295 {strides = array<i32>} : memref<2x32xf32, #tpu.memory_space<vmem>>, vector<2x32xf32>,
    %c0_166 = arith.constant 0 : index
    %298 = arith.index_cast %273 : i32 to index
    %c0_167 = arith.constant 0 : index
    %c0_168 = arith.constant 0 : index
    %299 = vector.load %arg5[%c0_166, %298, %c0_167, %c0_168] : memref<1x8x2x32xf32, #tpu.memory_space<vmem>>, vector<1x1x2x32xf32>
    %300 = vector.shape_cast %299 : vector<1x1x2x32xf32> to vector<2x32xf32>
    %301 = vector.shape_cast %295 : vector<2x32xf32> to vector<1x1x2x32xf32>
    tpu.vector_store %arg5[%c0_166, %298, %c0_167, %c0_168], %301 {strides = array<i32>} : memref<1x8x2x32xf32, #tpu.memory_space<vmem>>, vector<1x1x2x32xf32>,
    %c8_i32 = arith.constant 8 : i32
    return
  }
  func.func @transform_0(%arg0: i32) -> (i32, i32) {
    %c0_i32 = arith.constant 0 : i32
    %c0_i32_0 = arith.constant 0 : i32
    %c0_i32_1 = arith.constant 0 : i32
    return %c0_i32, %c0_i32_0 : i32, i32
  }
  func.func @transform_1(%arg0: i32) -> (i32, i32, i32) {
    %c0_i32 = arith.constant 0 : i32
    %c0_i32_0 = arith.constant 0 : i32
    %c0_i32_1 = arith.constant 0 : i32
    return %arg0, %c0_i32, %c0_i32_0 : i32, i32, i32
  }
  func.func @transform_2(%arg0: i32) -> (i32, i32, i32) {
    %c0_i32 = arith.constant 0 : i32
    %c0_i32_0 = arith.constant 0 : i32
    %c0_i32_1 = arith.constant 0 : i32
    return %arg0, %c0_i32, %c0_i32_0 : i32, i32, i32
  }
  func.func @transform_3(%arg0: i32) -> (i32, i32, i32) {
    %c0_i32 = arith.constant 0 : i32
    %c0_i32_0 = arith.constant 0 : i32
    %c0_i32_1 = arith.constant 0 : i32
    return %arg0, %c0_i32, %c0_i32_0 : i32, i32, i32
  }
  func.func @transform_4(%arg0: i32) -> (i32, i32, i32, i32) {
    %c0_i32 = arith.constant 0 : i32
    %c0_i32_0 = arith.constant 0 : i32
    %c0_i32_1 = arith.constant 0 : i32
    %c0_i32_2 = arith.constant 0 : i32
    return %arg0, %c0_i32, %c0_i32_0, %c0_i32_1 : i32, i32, i32, i32
  }
}

module attributes {stable_mosaic.version = 11 : i64} {
  func.func @_classifier_kernel(%arg0: memref<2x8x2x32xf32, #tpu.memory_space<vmem>>, %arg1: memref<64x3xf32, #tpu.memory_space<vmem>>, %arg2: memref<1x3xf32, #tpu.memory_space<vmem>>, %arg3: memref<2x3xf32, #tpu.memory_space<vmem>>) attributes {dimension_semantics = [], scalar_prefetch = 0 : i64, scratch_operands = 0 : i64, tpu.core_type = #tpu.core_type<tc>} {
    %c0 = arith.constant 0 : index
    %c0_0 = arith.constant 0 : index
    %c0_1 = arith.constant 0 : index
    %c0_2 = arith.constant 0 : index
    %0 = vector.load %arg0[%c0, %c0_0, %c0_1, %c0_2] : memref<2x8x2x32xf32, #tpu.memory_space<vmem>>, vector<2x8x2x32xf32>
    %1 = vector.extract_strided_slice %0 {offsets = [0, 7, 0, 0], sizes = [1, 1, 2, 32], strides = [1, 1, 1, 1]} : vector<2x8x2x32xf32> to vector<1x1x2x32xf32>
    %2 = vector.shape_cast %1 : vector<1x1x2x32xf32> to vector<2x32xf32>
    %3 = vector.extract_strided_slice %0 {offsets = [1, 7, 0, 0], sizes = [1, 1, 2, 32], strides = [1, 1, 1, 1]} : vector<2x8x2x32xf32> to vector<1x1x2x32xf32>
    %4 = vector.shape_cast %3 : vector<1x1x2x32xf32> to vector<2x32xf32>
    %c0_3 = arith.constant 0 : index
    %c0_4 = arith.constant 0 : index
    %5 = vector.load %arg1[%c0_3, %c0_4] : memref<64x3xf32, #tpu.memory_space<vmem>>, vector<32x3xf32>
    %cst = arith.constant dense<0.000000e+00> : vector<2x3xf32>
    %6 = tpu.matmul %2, %5, %cst {dimension_numbers = #tpu.dot_dimension_numbers<[1], [0], [0], [1], [0, 0, 1, 1], [], []>} : vector<2x32xf32>, vector<32x3xf32>, vector<2x3xf32> -> vector<2x3xf32>
    %c32 = arith.constant 32 : index
    %c0_5 = arith.constant 0 : index
    %7 = vector.load %arg1[%c32, %c0_5] : memref<64x3xf32, #tpu.memory_space<vmem>>, vector<32x3xf32>
    %cst_6 = arith.constant dense<0.000000e+00> : vector<2x3xf32>
    %8 = tpu.matmul %4, %7, %cst_6 {dimension_numbers = #tpu.dot_dimension_numbers<[1], [0], [0], [1], [0, 0, 1, 1], [], []>} : vector<2x32xf32>, vector<32x3xf32>, vector<2x3xf32> -> vector<2x3xf32>
    %9 = arith.addf %6, %8 : vector<2x3xf32>
    %c0_7 = arith.constant 0 : index
    %c0_8 = arith.constant 0 : index
    %10 = vector.load %arg2[%c0_7, %c0_8] : memref<1x3xf32, #tpu.memory_space<vmem>>, vector<1x3xf32>
    %11 = vector.broadcast %10 : vector<1x3xf32> to vector<2x3xf32>
    %12 = arith.addf %9, %11 : vector<2x3xf32>
    %cst_9 = arith.constant dense<0xFF800000> : vector<2xf32>
    %13 = vector.multi_reduction <maximumf>, %12, %cst_9 [1] : vector<2x3xf32> to vector<2xf32>
    %14 = vector.shape_cast %13 : vector<2xf32> to vector<2x1xf32>
    %15 = vector.broadcast %14 : vector<2x1xf32> to vector<2x3xf32>
    %16 = arith.subf %12, %15 : vector<2x3xf32>
    %17 = math.exp %16 : vector<2x3xf32>
    %cst_10 = arith.constant dense<0.000000e+00> : vector<2xf32>
    %18 = vector.multi_reduction <add>, %17, %cst_10 [1] : vector<2x3xf32> to vector<2xf32>
    %19 = vector.shape_cast %18 : vector<2xf32> to vector<2x1xf32>
    %20 = tpu.reciprocal %19 : vector<2x1xf32> -> vector<2x1xf32>
    %21 = vector.broadcast %20 : vector<2x1xf32> to vector<2x3xf32>
    %22 = arith.mulf %17, %21 : vector<2x3xf32>
    %c0_11 = arith.constant 0 : index
    %c0_12 = arith.constant 0 : index
    %23 = vector.load %arg3[%c0_11, %c0_12] : memref<2x3xf32, #tpu.memory_space<vmem>>, vector<2x3xf32>
    tpu.vector_store %arg3[%c0_11, %c0_12], %22 {strides = array<i32>} : memref<2x3xf32, #tpu.memory_space<vmem>>, vector<2x3xf32>,
    return
  }
}

</mosaic_0001>

<bundles_post_ra>
// kernel: forward.6
= control target key start
LH: loop header
LB: loop body
LE: loop exit
PB: predicated region body
PF: predicated region fallthrough
CT: control target
= control target key end

     0   :  { %vm18_vm0 = vcmask 261120   ;;  %s118_s0 = inlined_call_operand.vmem [shape: f32[16,32], index: 0, kind: input, shape index: {}]   ;;  %s119_s1 = inlined_call_operand.vmem [shape: f32[1,32], index: 1, kind: input, shape index: {}]   ;;  %s120_s2 = inlined_call_operand.vmem [shape: f32[1,32], index: 2, kind: input, shape index: {}]   ;;  %s121_s3 = inlined_call_operand.vmem [shape: f32[16,32], index: 3, kind: output, shape index: {}]  }
   0x1   :  { %v14_v0 = vld [vmem:[%s118_s0] sm:$0xff]  ;;  %v15_v1 = vld [vmem:[%s118_s0 + $0x8] sm:$0xff] }
   0x2   :  { %v19_v2 = vsel %vm18_vm0, %v14_v0, 0.0  ;;  %v22_v3 = vsel %vm18_vm0, %v15_v1, 0.0  ;;  %v68_v21 = vld [vmem:[%s119_s1] ss:$0 sm:$0xff] }
   0x3   :  { %20 = vadd.xlane.f32.xlu0 %v19_v2  ;;  %v69_v23 = vld [vmem:[%s120_s2] ss:$0 sm:$0xff] }
   0x7   :  { %23 = vadd.xlane.f32.xlu0 %v22_v3 }
  0x8c   :  { %v21_v4 = vpop.xlane.xlu0 %20 }
  0x8d   :  { %v26_v5 = vmul.f32 0.03125, %v21_v4 }
  0x8f   :  { %v28_v6 = vsub.f32 %v14_v0, %v26_v5 }
  0x90   :  { %v24_v7 = vpop.xlane.xlu0 %23 }
  0x91   :  { %v27_v8 = vmul.f32 0.03125, %v24_v7  ;;  %v30_v9 = vmul.f32 %v28_v6, %v28_v6 }
  0x93   :  { %v29_v10 = vsub.f32 %v15_v1, %v27_v8  ;;  %v32_v11 = vsel %vm18_vm0, %v30_v9, 0.0 }
  0x94   :  { %33 = vadd.xlane.f32.xlu1 %v32_v11 }
  0x95   :  { %v31_v12 = vmul.f32 %v29_v10, %v29_v10 }
  0x97   :  { %v35_v13 = vsel %vm18_vm0, %v31_v12, 0.0 }
  0x98   :  { %36 = vadd.xlane.f32.xlu1 %v35_v13 }
 0x11d   :  { %v34_v14 = vpop.xlane.xlu1 %33 }
 0x11e   :  { %v38_v15 = vmul.f32 0.03125, %v34_v14 }
 0x120   :  { %v40_v16 = vadd.f32 1e-12, %v38_v15 }
 0x121   :  { %v37_v17 = vpop.xlane.xlu1 %36 }
 0x122   :  { %70 = vrsqrt.f32 %v40_v16  ;;  %v39_v18 = vmul.f32 0.03125, %v37_v17 }
 0x124   :  { %v41_v19 = vadd.f32 1e-12, %v39_v18 }
 0x126   :  { %72 = vrsqrt.f32 %v41_v19 }
 0x12f   :  { %v71_v20 = vpop.eup %70 }
 0x130   :  { %v44_v22 = vmul.f32 %v71_v20, %v28_v6 }
 0x132   :  { %v52_v24 = vmul.f32 %v68_v21, %v44_v22 }
 0x133   :  { %v73_v25 = vpop.eup %72 }
 0x134   :  { %v60_v26 = vadd.f32 %v69_v23, %v52_v24  ;;  %v45_v27 = vmul.f32 %v73_v25, %v29_v10 }
 0x136   :  { %62 = vst.msk [vmem:[%s121_s3] sm:$0xff] %vm18_vm0, %v60_v26  ;;  %v53_v28 = vmul.f32 %v68_v21, %v45_v27 }
 0x138   :  { %v61_v29 = vadd.f32 %v69_v23, %v53_v28 }
 0x13a   :  { %63 = vst.msk [vmem:[%s121_s3 + $0x8] sm:$0xff] %vm18_vm0, %v61_v29 }

// kernel: forward.10
= control target key start
LH: loop header
LB: loop body
LE: loop exit
PB: predicated region body
PF: predicated region fallthrough
CT: control target
= control target key end

     0   :  { %s1782_s15 = smov 0   ;;  %s2055_s0 = inlined_call_operand.vmem [shape: f32[16,64], index: 0, kind: input, shape index: {}]   ;;  %s2056_s1 = inlined_call_operand.vmem [shape: f32[2,64,128], index: 1, kind: input, shape index: {}]   ;;  %s2057_s2 = inlined_call_operand.vmem [shape: f32[2,32,128], index: 2, kind: input, shape index: {}]   ;;  %s2058_s3 = inlined_call_operand.vmem [shape: f32[2,1,128], index: 3, kind: input, shape index: {}]   ;;  %s2059_s4 = inlined_call_operand.vmem [shape: f32[2,8,2,32], index: 4, kind: output, shape index: {}]  }
   0x1 LB: > { %s1788_s16 = sadd.s32 4294967295, %s1750_s15   ;;  %p1453_p0 = scmp.ge.s32.totalorder %s1750_s15, 1  ;;  %s1750_s15 = sphi %s1782_s15, %s14_s15  }
   0x2   : > { %p180_p1 = scmp.lt.s32.totalorder %s1750_s15, 3 }
   0x4   : > { %p181_p2 = pnand %p1453_p0, %p180_p1 }
   0x5   : > { %p214_p3 = scmp.lt.s32.totalorder (!%p181_p2), %s1788_s16, 1  ;;  %s1463_s7 = smul.u32 (!%p181_p2), 14, %s1788_s16 }
   0x6   : > { %184 = sbr.rel (%p181_p2) target bundleno = 5613 (0x15ed), region = 36  ;;  %s1754_s9 = smov (!%p181_p2), 64  }
   0x7   : > { %s355_s8 = scalar_lea.vmem (!%p181_p2), [#allocation2], %s1463_s7  ;;  %s1755_s10 = smov (!%p181_p2), 32  }
   0x8   : > { %s1756_s11 = smov (!%p181_p2), 96   ;;  %s1472_s22 = smul.u32 (!%p181_p2), 6, %s1788_s16 }
   0x9   : > { %s1478_s25 = sshll.u32 (!%p181_p2), %s1788_s16, 1  ;;  %s836_s28 = ssub.s32 (!%p181_p2), 4, %s1788_s16 }
   0xa   : > { %s1373_s23 = scalar_lea.vmem (!%p181_p2), [#allocation2], %s1472_s22  ;;  %s1380_s26 = scalar_lea.vmem (!%p181_p2), [#allocation2], %s1478_s25 }
   0xb   : > { %v245_v0 = vld [vmem:[%s2055_s0] sm:$0xff]  ;;  %vm253_vm0 = vcmask 523264   ;;  %v1752_v1 = vmov 0.0   ;;  %vm350_vm1 = vcmask 254976   ;;  %s1799_s19 = scalar_select %p214_p3, %s1788_s16, 1  ;;  %vm1753_vm2 = vmmov 0  }
   0xc   : > { %1576 = vmatprep.mubr.msk.f32.mxu0 %vm253_vm0, %v245_v0  ;;  %1579 = vmatprep.subr.mxu1 %v1752_v1  ;;  %351 = vst.msk [vmem:[#allocation3] sm:$0x3] %vm350_vm1, %v1752_v1  ;;  %352 = vst.msk [vmem:[#allocation4] sm:$0x3] %vm350_vm1, %v1752_v1  ;;  %vm358_vm3 = vcmask 261120   ;;  %v246_v15 = vld [vmem:[%s2055_s0 + $0x8] sm:$0xff] }
   0xd   : > { %1587 = vmatprep.mubr.msk.f32.mxu1 %vm1753_vm2, %v1752_v1  ;;  %s1507_s20 = sshll.u32 %s1799_s19, 6  ;;  %s1508_s21 = sshll.u32 %s1799_s19, 5 }
   0xe   : > { %s1812_s24 = scalar_lea.vmem %s2056_s1, %s1507_s20  ;;  %s223_s27 = scalar_lea.vmem %s2057_s2, %s1508_s21 }
   0xf   : > { %v239_v2 = vld [vmem:[%s1812_s24 + $0x38] sm:$0xff]  ;;  %v238_v3 = vld [vmem:[%s1812_s24 + $0x30] sm:$0xff]  ;;  %v237_v4 = vld [vmem:[%s1812_s24 + $0x28] sm:$0xff]  ;;  %s226_s6 = scalar_lea.vmem %s2058_s3, %s1799_s19  ;;  %s1509_s12 = sshll.u32 %s1799_s19, 4 }
  0x10   : > { %1560 = vmatprep.subr.mxu0 %v239_v2  ;;  %v1820_v5 = vld [vmem:[%s223_s27 + $0x18] sm:$0xff]  ;;  %v1823_v6 = vld [vmem:[%s223_s27 + $0x10] sm:$0xff]  ;;  %v236_v7 = vld [vmem:[%s1812_s24 + $0x20] sm:$0xff]  ;;  %s1886_s17 = scalar_lea.vmem %s2059_s4, %s1509_s12  ;;  %s1466_s19 = smul.u32 10, %s1788_s16 }
  0x11   : > { %1561 = vmatpush3.msra.mxu0 %v239_v2  ;;  %1580 = vmatpush3.msra.mxu1 %v1820_v5  ;;  %v1827_v8 = vld [vmem:[%s223_s27 + $0x8] sm:$0xff]  ;;  %v235_v9 = vld [vmem:[%s1812_s24 + $0x18] sm:$0xff]  ;;  %v1832_v10 = vld [vmem:[%s223_s27] sm:$0xff]  ;;  %s472_s18 = scalar_lea.vmem %s1886_s17, %s1463_s7  ;;  %s1383_s27 = scalar_lea.vmem %s1886_s17, %s1478_s25 }
  0x12   : > { %1562 = vmatprep.subr.mxu0 %v238_v3  ;;  %1581 = vmatprep.subr.mxu1 %v1752_v1  ;;  %v234_v12 = vld [vmem:[%s1812_s24 + $0x10] sm:$0xff]  ;;  %v233_v13 = vld [vmem:[%s1812_s24 + $0x8] sm:$0xff]  ;;  %v232_v14 = vld [vmem:[%s1812_s24] sm:$0xff]  ;;  %s1365_s20 = scalar_lea.vmem [#allocation2], %s1466_s19  ;;  %s1369_s21 = scalar_lea.vmem %s1886_s17, %s1466_s19 }
  0x13   : > { %1563 = vmatpush3.msra.mxu0 %v238_v3  ;;  %1582 = vmatpush3.msra.mxu1 %v1823_v6  ;;  %v357_v11 = vld [vmem:[#allocation3] sm:$0x3]  ;;  %v1460_v18 = vld [vmem:[%s226_s6] ss:$0 sm:$0xff]  ;;  %v440_v26 = vld [vmem:[#allocation4] sm:$0x3]  ;;  %s1377_s24 = scalar_lea.vmem %s1886_s17, %s1472_s22 }
  0x14   : > { %1564 = vmatprep.subr.mxu0 %v237_v4  ;;  %1583 = vmatprep.subr.mxu1 %v1752_v1  ;;  %s1982_s29 = sshll.u32 %s836_s28, 1  ;;  %s1487_s6 = smul.u32 4294967290, %s1788_s16 }
  0x15   : > { %1565 = vmatpush3.msra.mxu0 %v237_v4  ;;  %1584 = vmatpush3.msra.mxu1 %v1827_v8  ;;  %s838_s30 = scalar_lea.vmem [#allocation2], %s1982_s29  ;;  %s954_s5 = scalar_lea.vmem %s1886_s17, %s1982_s29 }
  0x16   : > { %1566 = vmatprep.subr.mxu0 %v236_v7  ;;  %1585 = vmatprep.subr.mxu1 %v1752_v1  ;;  %s1391_s7 = scalar_lea.vmem [#allocation2], %s1487_s6  ;;  %s1493_s12 = smul.u32 4294967286, %s1788_s16 }
  0x17   : > { %1567 = vmatpush3.msra.mxu0 %v236_v7  ;;  %1586 = vmatpush3.msra.mxu1 %v1832_v10 }
  0x18   : > { %1568 = vmatprep.subr.mxu0 %v235_v9  ;;  %1588 = vmatmul.mubr.msk.f32.vlgmr.msra.gmra.mxu1 %vm358_vm3, %v357_v11  ;;  %s1399_s13 = scalar_lea.vmem [#allocation2], %s1493_s12  ;;  %s1403_s14 = scalar_lea.vmem %s1886_s17, %s1493_s12 }
  0x19   : > { %1569 = vmatpush3.msra.mxu0 %v235_v9  ;;  %1590 = vmatprep.subr.mxu1 %v1752_v1 }
  0x1a   : > { %1570 = vmatprep.subr.mxu0 %v234_v12  ;;  %1591 = vmatpush3.msra.mxu1 %v1820_v5 }
  0x1b   : > { %1571 = vmatpush3.msra.mxu0 %v234_v12  ;;  %1592 = vmatprep.subr.mxu1 %v1752_v1 }
  0x1c   : > { %1572 = vmatprep.subr.mxu0 %v233_v13  ;;  %1593 = vmatpush3.msra.mxu1 %v1823_v6 }
  0x1d   : > { %1573 = vmatpush3.msra.mxu0 %v233_v13  ;;  %1594 = vmatprep.subr.mxu1 %v1752_v1 }
  0x1e   : > { %1574 = vmatprep.subr.mxu0 %v232_v14  ;;  %1595 = vmatpush3.msra.mxu1 %v1827_v8 }
  0x1f   : > { %1575 = vmatpush3.msra.mxu0 %v232_v14  ;;  %1596 = vmatprep.subr.mxu1 %v1752_v1 }
  0x20   : > { %1577 = vmatmul.mubr.msk.f32.vlgmr.msra.gmra.mxu0 %vm253_vm0, %v246_v15  ;;  %1597 = vmatpush3.msra.mxu1 %v1832_v10 }
  0x21   : > { %1598 = vmatprep.mubr.msk.f32.mxu1 %vm1753_vm2, %v1752_v1  ;;  %1601 = vmatprep.subr.mxu0 %v1752_v1 }
  0x22   : > { %1609 = vmatprep.mubr.msk.f32.mxu0 %vm1753_vm2, %v1752_v1  ;;  %1602 = vmatpush3.msra.mxu0 %v1820_v5 }
  0x23   : > { %1612 = vmatprep.subr.mxu1 %v1752_v1  ;;  %1603 = vmatprep.subr.mxu0 %v1752_v1 }
  0x24   : > { %1604 = vmatpush3.msra.mxu0 %v1823_v6 }
  0x25   : > { %1605 = vmatprep.subr.mxu0 %v1752_v1 }
  0x26   : > { %1606 = vmatpush3.msra.mxu0 %v1827_v8 }
  0x27   : > { %1607 = vmatprep.subr.mxu0 %v1752_v1 }
  0x28   : > { %1608 = vmatpush3.msra.mxu0 %v1832_v10 }
  0x29   : > { %1623 = vmatprep.subr.mxu0 %v1752_v1 }
  0xd8   : > { %v428_v16 = vpop.f32.mrf.mxu1 }
  0xda   : > { %v1589_v17 = vpop.f32.mrf.mxu1 }
  0xe0   : > { %v1578_v19 = vpop.f32.mrf.mxu0 }
  0xe1   : > { %v332_v20 = vadd.f32 %v1578_v19, %v1460_v18 }
  0xe2   : > { %v326_v21 = vpop.f32.mrf.mxu0 }
  0xe3   : > { %343 = vst [vmem:[#allocation2 + $0x8] ss:$4 sps:$4 sm:$0xff] %v332_v20   ;;  %v327_v22 = vadd.f32 %v1460_v18, %v326_v21 }
  0xe5   : > { %335 = vst [vmem:[#allocation2] ss:$4 sps:$4 sm:$0xff] %v327_v22  }
  0xec   : > { %v356_v23 = vld [vmem:[%s355_s8] sm:$0x3]  ;;  %v1467_v44 = vld [vmem:[%s1365_s20 + $0x2] sm:$0x3]  ;;  %v1473_v3 = vld [vmem:[%s1373_s23 + $0x4] sm:$0x3]  ;;  %s1395_s8 = scalar_lea.vmem %s1886_s17, %s1487_s6 }
  0xed   : > { %v432_v24 = vadd.f32 %v428_v16, %v356_v23 }
  0xef   : > { %1680 = vtanh.f32 %v432_v24  ;;  %v1465_v27 = vmul.f32 -1.442695, %v432_v24 }
  0xf1   : > { %1682 = vpow2.f32 %v1465_v27 }
  0xfc   : > { %v1681_v25 = vpop.eup %1680 }
  0xfd   : > { %447 = vrot.lane.b32.xlu0 %v1681_v25, %s1754_s9 }
  0xfe   : > { %v1683_v28 = vpop.eup %1682 }
  0xff   : > { %v436_v29 = vadd.f32 1.0, %v1683_v28 }
 0x101   : > { %442 = vrot.lane.b32.xlu0 %v440_v26, %s1755_s10  ;;  %1684 = vrcp.f32 %v436_v29  ;;  %v1479_v29 = vld [vmem:[%s1380_s26 + $0x6] sm:$0x3] }
 0x10e   : > { %v1685_v30 = vpop.eup %1684 }
 0x16f   : > { %v448_v31 = vpop.permute.xlu0 %447 }
 0x170   : > { %v450_v32 = vmul.f32 %v1685_v30, %v448_v31 }
 0x172   : > { %452 = vrot.lane.b32.xlu1 %v450_v32, %s1755_s10 }
 0x173   : > { %v443_v33 = vpop.permute.xlu0 %442 }
 0x174   : > { %v445_v34 = vmul.f32 %v1685_v30, %v443_v33 }
 0x1e4   : > { %v453_v35 = vpop.permute.xlu1 %452 }
 0x1e5   : > { %v455_v36 = vadd.f32 %v453_v35, %v445_v34 }
 0x1e7   : > { %1686 = vtanh.f32 %v455_v36 }
 0x1f4   : > { %v1687_v37 = vpop.eup %1686 }
 0x1f5   : > { %458 = vrot.lane.b32.xlu1 %v1687_v37, %s1754_s9 }
 0x1f9   : > { %463 = vrot.lane.b32.xlu1 %v455_v36, %s1756_s11 }
 0x267   : > { %v459_v38 = vpop.permute.xlu1 %458 }
 0x268   : > { %v461_v39 = vmul.f32 %v1685_v30, %v459_v38 }
 0x26a   : > { %468 = vrot.lane.b32.xlu0 %v461_v39, %s1755_s10 }
 0x26b   : > { %v464_v40 = vpop.permute.xlu1 %463 }
 0x26c   : > { %466 = vst.msk [vmem:[#allocation4] sm:$0x3] %vm350_vm1, %v464_v40 }
 0x273   : > { %v561_v41 = vld [vmem:[#allocation4] sm:$0x3] }
 0x274   : > { %563 = vrot.lane.b32.xlu1 %v561_v41, %s1755_s10 }
 0x2dc   : > { %v469_v42 = vpop.permute.xlu0 %468 }
 0x2dd   : > { %471 = vst.msk [vmem:[#allocation3] sm:$0x3] %vm350_vm1, %v469_v42  ;;  %473 = vst.msk [vmem:[%s472_s18] sm:$0x3] %vm350_vm1, %v469_v42  ;;  %s1499_s18 = smul.u32 4294967282, %s1788_s16 }
 0x2df   : > { %s1407_s19 = scalar_lea.vmem [#allocation2], %s1499_s18  ;;  %s1411_s20 = scalar_lea.vmem %s1886_s17, %s1499_s18 }
 0x2e4   : > { %v479_v43 = vld [vmem:[#allocation3] sm:$0x3] }
 0x2e5   : > { %1599 = vmatmul.mubr.msk.f32.vlgmr.msra.gmra.mxu1 %vm358_vm3, %v479_v43 }
 0x2e6   : > { %1613 = vmatpush3.msra.mxu1 %v1820_v5  ;;  %1620 = vmatprep.mubr.msk.f32.mxu1 %vm1753_vm2, %v1752_v1  ;;  %v564_v55 = vpop.permute.xlu1 %563 }
 0x2e7   : > { %1614 = vmatprep.subr.mxu1 %v1752_v1 }
 0x2e8   : > { %1615 = vmatpush3.msra.mxu1 %v1823_v6 }
 0x2e9   : > { %1616 = vmatprep.subr.mxu1 %v1752_v1 }
 0x2ea   : > { %1617 = vmatpush3.msra.mxu1 %v1827_v8 }
 0x2eb   : > { %1618 = vmatprep.subr.mxu1 %v1752_v1 }
 0x2ec   : > { %1619 = vmatpush3.msra.mxu1 %v1832_v10 }
 0x2ed   : > { %1634 = vmatprep.subr.mxu1 %v1752_v1 }
 0x3a5   : > { %v549_v45 = vpop.f32.mrf.mxu1 }
 0x3a6   : > { %v553_v46 = vadd.f32 %v1467_v44, %v549_v45 }
 0x3a7   : > { %v1600_v47 = vpop.f32.mrf.mxu1 }
 0x3a8   : > { %1688 = vtanh.f32 %v553_v46  ;;  %v1469_v49 = vmul.f32 -1.442695, %v553_v46 }
 0x3aa   : > { %1690 = vpow2.f32 %v1469_v49 }
 0x3b5   : > { %v1689_v48 = vpop.eup %1688 }
 0x3b6   : > { %568 = vrot.lane.b32.xlu0 %v1689_v48, %s1754_s9 }
 0x3b7   : > { %v1691_v50 = vpop.eup %1690 }
 0x3b8   : > { %v557_v51 = vadd.f32 1.0, %v1691_v50 }
 0x3ba   : > { %1692 = vrcp.f32 %v557_v51  ;;  %v839_v51 = vld [vmem:[%s838_s30] sm:$0x3] }
 0x3c7   : > { %v1693_v52 = vpop.eup %1692 }
 0x3c8   : > { %v566_v56 = vmul.f32 %v1693_v52, %v564_v55 }
 0x428   : > { %v569_v53 = vpop.permute.xlu0 %568 }
 0x429   : > { %v571_v54 = vmul.f32 %v1693_v52, %v569_v53 }
 0x42b   : > { %573 = vrot.lane.b32.xlu0 %v571_v54, %s1755_s10 }
 0x49d   : > { %v574_v57 = vpop.permute.xlu0 %573 }
 0x49e   : > { %v576_v58 = vadd.f32 %v574_v57, %v566_v56 }
 0x4a0   : > { %1694 = vtanh.f32 %v576_v58 }
 0x4ad   : > { %v1695_v59 = vpop.eup %1694 }
 0x4ae   : > { %579 = vrot.lane.b32.xlu1 %v1695_v59, %s1754_s9 }
 0x4b2   : > { %584 = vrot.lane.b32.xlu1 %v576_v58, %s1756_s11 }
 0x520   : > { %v580_v60 = vpop.permute.xlu1 %579 }
 0x521   : > { %v582_v61 = vmul.f32 %v1693_v52, %v580_v60 }
 0x523   : > { %589 = vrot.lane.b32.xlu0 %v582_v61, %s1755_s10 }
 0x524   : > { %v585_v62 = vpop.permute.xlu1 %584 }
 0x525   : > { %587 = vst.msk [vmem:[#allocation4] sm:$0x3] %vm350_vm1, %v585_v62 }
 0x52c   : > { %v682_v63 = vld [vmem:[#allocation4] sm:$0x3] }
 0x52d   : > { %684 = vrot.lane.b32.xlu1 %v682_v63, %s1755_s10 }
 0x595   : > { %v590_v0 = vpop.permute.xlu0 %589 }
 0x596   : > { %592 = vst.msk [vmem:[#allocation3] sm:$0x3] %vm350_vm1, %v590_v0  ;;  %1471 = vst.msk [vmem:[%s1369_s21 + $0x2] sm:$0x3] %vm350_vm1, %v590_v0 }
 0x59d   : > { %v600_v2 = vld [vmem:[#allocation3] sm:$0x3] }
 0x59e   : > { %1610 = vmatmul.mubr.msk.f32.vlgmr.msra.gmra.mxu0 %vm358_vm3, %v600_v2 }
 0x59f   : > { %1624 = vmatpush3.msra.mxu0 %v1820_v5  ;;  %1631 = vmatprep.mubr.msk.f32.mxu0 %vm1753_vm2, %v1752_v1  ;;  %v685_v18 = vpop.permute.xlu1 %684 }
 0x5a0   : > { %1625 = vmatprep.subr.mxu0 %v1752_v1 }
 0x5a1   : > { %1626 = vmatpush3.msra.mxu0 %v1823_v6 }
 0x5a2   : > { %1627 = vmatprep.subr.mxu0 %v1752_v1 }
 0x5a3   : > { %1628 = vmatpush3.msra.mxu0 %v1827_v8 }
 0x5a4   : > { %1629 = vmatprep.subr.mxu0 %v1752_v1 }
 0x5a5   : > { %1630 = vmatpush3.msra.mxu0 %v1832_v10 }
 0x5a6   : > { %1645 = vmatprep.subr.mxu0 %v1752_v1 }
 0x65e   : > { %v670_v4 = vpop.f32.mrf.mxu0 }
 0x65f   : > { %v674_v7 = vadd.f32 %v1473_v3, %v670_v4 }
 0x660   : > { %v1611_v9 = vpop.f32.mrf.mxu0 }
 0x661   : > { %1696 = vtanh.f32 %v674_v7  ;;  %v1475_v12 = vmul.f32 -1.442695, %v674_v7 }
 0x663   : > { %1698 = vpow2.f32 %v1475_v12 }
 0x66e   : > { %v1697_v11 = vpop.eup %1696 }
 0x66f   : > { %689 = vrot.lane.b32.xlu0 %v1697_v11, %s1754_s9 }
 0x670   : > { %v1699_v13 = vpop.eup %1698 }
 0x671   : > { %v678_v14 = vadd.f32 1.0, %v1699_v13 }
 0x673   : > { %1700 = vrcp.f32 %v678_v14  ;;  %v1488_v14 = vld [vmem:[%s1391_s7 + $0xa] sm:$0x3] }
 0x680   : > { %v1701_v15 = vpop.eup %1700 }
 0x681   : > { %v687_v19 = vmul.f32 %v1701_v15, %v685_v18 }
 0x6e1   : > { %v690_v16 = vpop.permute.xlu0 %689 }
 0x6e2   : > { %v692_v17 = vmul.f32 %v1701_v15, %v690_v16 }
 0x6e4   : > { %694 = vrot.lane.b32.xlu0 %v692_v17, %s1755_s10 }
 0x756   : > { %v695_v20 = vpop.permute.xlu0 %694 }
 0x757   : > { %v697_v21 = vadd.f32 %v695_v20, %v687_v19 }
 0x759   : > { %1702 = vtanh.f32 %v697_v21 }
 0x766   : > { %v1703_v22 = vpop.eup %1702 }
 0x767   : > { %700 = vrot.lane.b32.xlu1 %v1703_v22, %s1754_s9 }
 0x76b   : > { %705 = vrot.lane.b32.xlu1 %v697_v21, %s1756_s11 }
 0x7d9   : > { %v701_v23 = vpop.permute.xlu1 %700 }
 0x7da   : > { %v703_v24 = vmul.f32 %v1701_v15, %v701_v23 }
 0x7dc   : > { %710 = vrot.lane.b32.xlu0 %v703_v24, %s1755_s10 }
 0x7dd   : > { %v706_v25 = vpop.permute.xlu1 %705 }
 0x7de   : > { %708 = vst.msk [vmem:[#allocation4] sm:$0x3] %vm350_vm1, %v706_v25 }
 0x7e5   : > { %v802_v26 = vld [vmem:[#allocation4] sm:$0x3] }
 0x7e6   : > { %804 = vrot.lane.b32.xlu1 %v802_v26, %s1755_s10 }
 0x84e   : > { %v711_v27 = vpop.permute.xlu0 %710 }
 0x84f   : > { %713 = vst.msk [vmem:[#allocation3] sm:$0x3] %vm350_vm1, %v711_v27  ;;  %1477 = vst.msk [vmem:[%s1377_s24 + $0x4] sm:$0x3] %vm350_vm1, %v711_v27 }
 0x856   : > { %v720_v28 = vld [vmem:[#allocation3] sm:$0x3] }
 0x857   : > { %1621 = vmatmul.mubr.msk.f32.vlgmr.msra.gmra.mxu1 %vm358_vm3, %v720_v28 }
 0x858   : > { %1635 = vmatpush3.msra.mxu1 %v1820_v5  ;;  %1642 = vmatprep.mubr.msk.f32.mxu1 %vm1753_vm2, %v1752_v1  ;;  %v805_v40 = vpop.permute.xlu1 %804 }
 0x859   : > { %1636 = vmatprep.subr.mxu1 %v1752_v1 }
 0x85a   : > { %1637 = vmatpush3.msra.mxu1 %v1823_v6 }
 0x85b   : > { %1638 = vmatprep.subr.mxu1 %v1752_v1 }
 0x85c   : > { %1639 = vmatpush3.msra.mxu1 %v1827_v8 }
 0x85d   : > { %1640 = vmatprep.subr.mxu1 %v1752_v1 }
 0x85e   : > { %1641 = vmatpush3.msra.mxu1 %v1832_v10 }
 0x85f   : > { %1656 = vmatprep.subr.mxu1 %v1752_v1 }
 0x917   : > { %v790_v30 = vpop.f32.mrf.mxu1 }
 0x918   : > { %v794_v31 = vadd.f32 %v1479_v29, %v790_v30 }
 0x919   : > { %v1622_v32 = vpop.f32.mrf.mxu1 }
 0x91a   : > { %1704 = vtanh.f32 %v794_v31  ;;  %v1481_v34 = vmul.f32 -1.442695, %v794_v31  ;;  %v1494_v31 = vld [vmem:[%s1399_s13 + $0xc] sm:$0x3] }
 0x91c   : > { %1706 = vpow2.f32 %v1481_v34 }
 0x927   : > { %v1705_v33 = vpop.eup %1704 }
 0x928   : > { %809 = vrot.lane.b32.xlu0 %v1705_v33, %s1754_s9 }
 0x929   : > { %v1707_v35 = vpop.eup %1706 }
 0x92a   : > { %v798_v36 = vadd.f32 1.0, %v1707_v35 }
 0x92c   : > { %1708 = vrcp.f32 %v798_v36 }
 0x939   : > { %v1709_v37 = vpop.eup %1708 }
 0x93a   : > { %v807_v41 = vmul.f32 %v1709_v37, %v805_v40 }
 0x99a   : > { %v810_v38 = vpop.permute.xlu0 %809 }
 0x99b   : > { %v812_v39 = vmul.f32 %v1709_v37, %v810_v38 }
 0x99d   : > { %814 = vrot.lane.b32.xlu0 %v812_v39, %s1755_s10 }
 0xa0f   : > { %v815_v42 = vpop.permute.xlu0 %814 }
 0xa10   : > { %v817_v43 = vadd.f32 %v815_v42, %v807_v41 }
 0xa12   : > { %1710 = vtanh.f32 %v817_v43 }
 0xa1f   : > { %v1711_v44 = vpop.eup %1710 }
 0xa20   : > { %820 = vrot.lane.b32.xlu1 %v1711_v44, %s1754_s9 }
 0xa24   : > { %825 = vrot.lane.b32.xlu1 %v817_v43, %s1756_s11 }
 0xa92   : > { %v821_v45 = vpop.permute.xlu1 %820 }
 0xa93   : > { %v823_v46 = vmul.f32 %v1709_v37, %v821_v45 }
 0xa95   : > { %830 = vrot.lane.b32.xlu0 %v823_v46, %s1755_s10 }
 0xa96   : > { %v826_v47 = vpop.permute.xlu1 %825 }
 0xa97   : > { %828 = vst.msk [vmem:[#allocation4] sm:$0x3] %vm350_vm1, %v826_v47 }
 0xa9e   : > { %v922_v48 = vld [vmem:[#allocation4] sm:$0x3] }
 0xa9f   : > { %924 = vrot.lane.b32.xlu1 %v922_v48, %s1755_s10 }
 0xb07   : > { %v831_v49 = vpop.permute.xlu0 %830 }
 0xb08   : > { %833 = vst.msk [vmem:[#allocation3] sm:$0x3] %vm350_vm1, %v831_v49  ;;  %1483 = vst.msk [vmem:[%s1383_s27 + $0x6] sm:$0x3] %vm350_vm1, %v831_v49 }
 0xb0f   : > { %v840_v50 = vld [vmem:[#allocation3] sm:$0x3] }
 0xb10   : > { %1632 = vmatmul.mubr.msk.f32.vlgmr.msra.gmra.mxu0 %vm358_vm3, %v840_v50 }
 0xb11   : > { %1646 = vmatpush3.msra.mxu0 %v1820_v5  ;;  %1653 = vmatprep.mubr.msk.f32.mxu0 %vm1753_vm2, %v1752_v1  ;;  %v925_v62 = vpop.permute.xlu1 %924 }
 0xb12   : > { %1647 = vmatprep.subr.mxu0 %v1752_v1 }
 0xb13   : > { %1648 = vmatpush3.msra.mxu0 %v1823_v6 }
 0xb14   : > { %1649 = vmatprep.subr.mxu0 %v1752_v1 }
 0xb15   : > { %1650 = vmatpush3.msra.mxu0 %v1827_v8 }
 0xb16   : > { %1651 = vmatprep.subr.mxu0 %v1752_v1 }
 0xb17   : > { %1652 = vmatpush3.msra.mxu0 %v1832_v10 }
 0xbd0   : > { %v910_v52 = vpop.f32.mrf.mxu0 }
 0xbd1   : > { %v914_v53 = vadd.f32 %v910_v52, %v839_v51 }
 0xbd2   : > { %v1633_v54 = vpop.f32.mrf.mxu0 }
 0xbd3   : > { %1712 = vtanh.f32 %v914_v53  ;;  %v1486_v56 = vmul.f32 -1.442695, %v914_v53  ;;  %v1500_v53 = vld [vmem:[%s1407_s19 + $0xe] sm:$0x3] }
 0xbd5   : > { %1714 = vpow2.f32 %v1486_v56 }
 0xbe0   : > { %v1713_v55 = vpop.eup %1712 }
 0xbe1   : > { %929 = vrot.lane.b32.xlu0 %v1713_v55, %s1754_s9 }
 0xbe2   : > { %v1715_v57 = vpop.eup %1714 }
 0xbe3   : > { %v918_v58 = vadd.f32 1.0, %v1715_v57 }
 0xbe5   : > { %1716 = vrcp.f32 %v918_v58 }
 0xbf2   : > { %v1717_v59 = vpop.eup %1716 }
 0xbf3   : > { %v927_v63 = vmul.f32 %v1717_v59, %v925_v62 }
 0xc53   : > { %v930_v60 = vpop.permute.xlu0 %929 }
 0xc54   : > { %v932_v61 = vmul.f32 %v1717_v59, %v930_v60 }
 0xc56   : > { %934 = vrot.lane.b32.xlu0 %v932_v61, %s1755_s10 }
 0xcc8   : > { %v935_v0 = vpop.permute.xlu0 %934 }
 0xcc9   : > { %v937_v2 = vadd.f32 %v935_v0, %v927_v63 }
 0xccb   : > { %1718 = vtanh.f32 %v937_v2 }
 0xcd8   : > { %v1719_v3 = vpop.eup %1718 }
 0xcd9   : > { %940 = vrot.lane.b32.xlu1 %v1719_v3, %s1754_s9 }
 0xcdd   : > { %945 = vrot.lane.b32.xlu1 %v937_v2, %s1756_s11 }
 0xd4b   : > { %v941_v4 = vpop.permute.xlu1 %940 }
 0xd4c   : > { %v943_v7 = vmul.f32 %v1717_v59, %v941_v4 }
 0xd4e   : > { %950 = vrot.lane.b32.xlu0 %v943_v7, %s1755_s10 }
 0xd4f   : > { %v946_v9 = vpop.permute.xlu1 %945 }
 0xd50   : > { %948 = vst.msk [vmem:[#allocation4] sm:$0x3] %vm350_vm1, %v946_v9 }
 0xd57   : > { %v1043_v11 = vld [vmem:[#allocation4] sm:$0x3] }
 0xd58   : > { %1045 = vrot.lane.b32.xlu1 %v1043_v11, %s1755_s10 }
 0xdc0   : > { %v951_v12 = vpop.permute.xlu0 %950 }
 0xdc1   : > { %953 = vst.msk [vmem:[#allocation3] sm:$0x3] %vm350_vm1, %v951_v12  ;;  %955 = vst.msk [vmem:[%s954_s5] sm:$0x3] %vm350_vm1, %v951_v12 }
 0xdc8   : > { %v961_v13 = vld [vmem:[#allocation3] sm:$0x3] }
 0xdc9   : > { %1643 = vmatmul.mubr.msk.f32.vlgmr.msra.gmra.mxu1 %vm358_vm3, %v961_v13 }
 0xdca   : > { %1657 = vmatpush3.msra.mxu1 %v1820_v5  ;;  %1664 = vmatprep.mubr.msk.f32.mxu1 %vm1753_vm2, %v1752_v1 }
 0xdcb   : > { %1658 = vmatprep.subr.mxu1 %v1752_v1 }
 0xdcc   : > { %1659 = vmatpush3.msra.mxu1 %v1823_v6 }
 0xdcd   : > { %1660 = vmatprep.subr.mxu1 %v1752_v1 }
 0xdce   : > { %1661 = vmatpush3.msra.mxu1 %v1827_v8 }
 0xdcf   : > { %1662 = vmatprep.subr.mxu1 %v1752_v1 }
 0xdd0   : > { %1663 = vmatpush3.msra.mxu1 %v1832_v10  ;;  %v1046_v10 = vpop.permute.xlu1 %1045 }
 0xe89   : > { %v1031_v5 = vpop.f32.mrf.mxu1 }
 0xe8a   : > { %v1035_v15 = vadd.f32 %v1488_v14, %v1031_v5 }
 0xe8b   : > { %v1644_v16 = vpop.f32.mrf.mxu1 }
 0xe8c   : > { %1720 = vtanh.f32 %v1035_v15  ;;  %v1490_v6 = vmul.f32 -1.442695, %v1035_v15 }
 0xe8e   : > { %1722 = vpow2.f32 %v1490_v6 }
 0xe99   : > { %v1721_v17 = vpop.eup %1720 }
 0xe9a   : > { %1050 = vrot.lane.b32.xlu0 %v1721_v17, %s1754_s9 }
 0xe9b   : > { %v1723_v18 = vpop.eup %1722 }
 0xe9c   : > { %v1039_v19 = vadd.f32 1.0, %v1723_v18 }
 0xe9e   : > { %1724 = vrcp.f32 %v1039_v19 }
 0xeab   : > { %v1725_v8 = vpop.eup %1724 }
 0xeac   : > { %v1048_v21 = vmul.f32 %v1725_v8, %v1046_v10 }
 0xf0c   : > { %v1051_v1 = vpop.permute.xlu0 %1050 }
 0xf0d   : > { %v1053_v20 = vmul.f32 %v1725_v8, %v1051_v1 }
 0xf0f   : > { %1055 = vrot.lane.b32.xlu0 %v1053_v20, %s1755_s10 }
 0xf81   : > { %v1056_v22 = vpop.permute.xlu0 %1055 }
 0xf82   : > { %v1058_v23 = vadd.f32 %v1056_v22, %v1048_v21 }
 0xf84   : > { %1726 = vtanh.f32 %v1058_v23 }
 0xf91   : > { %v1727_v24 = vpop.eup %1726 }
 0xf92   : > { %1061 = vrot.lane.b32.xlu1 %v1727_v24, %s1754_s9 }
 0xf96   : > { %1066 = vrot.lane.b32.xlu1 %v1058_v23, %s1756_s11 }
0x1004   : > { %v1062_v25 = vpop.permute.xlu1 %1061 }
0x1005   : > { %v1064_v26 = vmul.f32 %v1725_v8, %v1062_v25 }
0x1007   : > { %1071 = vrot.lane.b32.xlu0 %v1064_v26, %s1755_s10 }
0x1008   : > { %v1067_v27 = vpop.permute.xlu1 %1066 }
0x1009   : > { %1069 = vst.msk [vmem:[#allocation4] sm:$0x3] %vm350_vm1, %v1067_v27 }
0x1010   : > { %v1164_v28 = vld [vmem:[#allocation4] sm:$0x3] }
0x1011   : > { %1166 = vrot.lane.b32.xlu1 %v1164_v28, %s1755_s10 }
0x1079   : > { %v1072_v29 = vpop.permute.xlu0 %1071 }
0x107a   : > { %1074 = vst.msk [vmem:[#allocation3] sm:$0x3] %vm350_vm1, %v1072_v29  ;;  %1492 = vst.msk [vmem:[%s1395_s8 + $0xa] sm:$0x3] %vm350_vm1, %v1072_v29 }
0x1081   : > { %v1082_v30 = vld [vmem:[#allocation3] sm:$0x3] }
0x1082   : > { %1654 = vmatmul.mubr.msk.f32.vlgmr.msra.gmra.mxu0 %vm358_vm3, %v1082_v30 }
0x1083   : > { %v1167_v42 = vpop.permute.xlu1 %1166 }
0x1142   : > { %v1152_v32 = vpop.f32.mrf.mxu0 }
0x1143   : > { %v1156_v33 = vadd.f32 %v1494_v31, %v1152_v32 }
0x1144   : > { %v1655_v34 = vpop.f32.mrf.mxu0 }
0x1145   : > { %1728 = vtanh.f32 %v1156_v33  ;;  %v1496_v36 = vmul.f32 -1.442695, %v1156_v33 }
0x1147   : > { %1730 = vpow2.f32 %v1496_v36 }
0x1152   : > { %v1729_v35 = vpop.eup %1728 }
0x1153   : > { %1171 = vrot.lane.b32.xlu0 %v1729_v35, %s1754_s9 }
0x1154   : > { %v1731_v37 = vpop.eup %1730 }
0x1155   : > { %v1160_v38 = vadd.f32 1.0, %v1731_v37 }
0x1157   : > { %1732 = vrcp.f32 %v1160_v38 }
0x1164   : > { %v1733_v39 = vpop.eup %1732 }
0x1165   : > { %v1169_v43 = vmul.f32 %v1733_v39, %v1167_v42 }
0x11c5   : > { %v1172_v40 = vpop.permute.xlu0 %1171 }
0x11c6   : > { %v1174_v41 = vmul.f32 %v1733_v39, %v1172_v40 }
0x11c8   : > { %1176 = vrot.lane.b32.xlu0 %v1174_v41, %s1755_s10 }
0x123a   : > { %v1177_v44 = vpop.permute.xlu0 %1176 }
0x123b   : > { %v1179_v45 = vadd.f32 %v1177_v44, %v1169_v43 }
0x123d   : > { %1734 = vtanh.f32 %v1179_v45 }
0x124a   : > { %v1735_v46 = vpop.eup %1734 }
0x124b   : > { %1182 = vrot.lane.b32.xlu1 %v1735_v46, %s1754_s9 }
0x124f   : > { %1187 = vrot.lane.b32.xlu1 %v1179_v45, %s1756_s11 }
0x12bd   : > { %v1183_v47 = vpop.permute.xlu1 %1182 }
0x12be   : > { %v1185_v48 = vmul.f32 %v1733_v39, %v1183_v47 }
0x12c0   : > { %1192 = vrot.lane.b32.xlu0 %v1185_v48, %s1755_s10 }
0x12c1   : > { %v1188_v49 = vpop.permute.xlu1 %1187 }
0x12c2   : > { %1190 = vst.msk [vmem:[#allocation4] sm:$0x3] %vm350_vm1, %v1188_v49 }
0x12c9   : > { %v1285_v50 = vld [vmem:[#allocation4] sm:$0x3] }
0x12ca   : > { %1287 = vrot.lane.b32.xlu1 %v1285_v50, %s1755_s10 }
0x1332   : > { %v1193_v51 = vpop.permute.xlu0 %1192 }
0x1333   : > { %1195 = vst.msk [vmem:[#allocation3] sm:$0x3] %vm350_vm1, %v1193_v51  ;;  %1498 = vst.msk [vmem:[%s1403_s14 + $0xc] sm:$0x3] %vm350_vm1, %v1193_v51 }
0x133a   : > { %v1203_v52 = vld [vmem:[#allocation3] sm:$0x3] }
0x133b   : > { %1665 = vmatmul.mubr.msk.f32.vlgmr.msra.gmra.mxu1 %vm358_vm3, %v1203_v52 }
0x133c   : > { %v1288_v0 = vpop.permute.xlu1 %1287 }
0x13fb   : > { %v1273_v54 = vpop.f32.mrf.mxu1 }
0x13fc   : > { %v1277_v55 = vadd.f32 %v1500_v53, %v1273_v54 }
0x13fd   : > { %v1666_v56 = vpop.f32.mrf.mxu1 }
0x13fe   : > { %1736 = vtanh.f32 %v1277_v55  ;;  %v1502_v58 = vmul.f32 -1.442695, %v1277_v55 }
0x1400   : > { %1738 = vpow2.f32 %v1502_v58 }
0x140b   : > { %v1737_v57 = vpop.eup %1736 }
0x140c   : > { %1292 = vrot.lane.b32.xlu0 %v1737_v57, %s1754_s9 }
0x140d   : > { %v1739_v59 = vpop.eup %1738 }
0x140e   : > { %v1281_v60 = vadd.f32 1.0, %v1739_v59 }
0x1410   : > { %1740 = vrcp.f32 %v1281_v60 }
0x141d   : > { %v1741_v61 = vpop.eup %1740 }
0x141e   : > { %v1290_v2 = vmul.f32 %v1741_v61, %v1288_v0 }
0x147e   : > { %v1293_v62 = vpop.permute.xlu0 %1292 }
0x147f   : > { %v1295_v63 = vmul.f32 %v1741_v61, %v1293_v62 }
0x1481   : > { %1297 = vrot.lane.b32.xlu0 %v1295_v63, %s1755_s10 }
0x14f3   : > { %v1298_v3 = vpop.permute.xlu0 %1297 }
0x14f4   : > { %v1300_v4 = vadd.f32 %v1298_v3, %v1290_v2 }
0x14f6   : > { %1742 = vtanh.f32 %v1300_v4  ;;  %1308 = vrot.lane.b32.xlu0 %v1300_v4, %s1756_s11 }
0x1503   : > { %v1743_v7 = vpop.eup %1742 }
0x1504   : > { %1303 = vrot.lane.b32.xlu1 %v1743_v7, %s1754_s9 }
0x1568   : > { %v1309_v9 = vpop.permute.xlu0 %1308 }
0x1569   : > { %1311 = vst.msk [vmem:[#allocation4] sm:$0x3] %vm350_vm1, %v1309_v9 }
0x1576   : > { %v1304_v11 = vpop.permute.xlu1 %1303 }
0x1577   : > { %v1306_v12 = vmul.f32 %v1741_v61, %v1304_v11 }
0x1579   : > { %1313 = vrot.lane.b32.xlu1 %v1306_v12, %s1755_s10 }
0x15eb   : > { %v1314_v13 = vpop.permute.xlu1 %1313 }
0x15ec   : > { %1316 = vst.msk [vmem:[#allocation3] sm:$0x3] %vm350_vm1, %v1314_v13  ;;  %1504 = vst.msk [vmem:[%s1411_s20 + $0xe] sm:$0x3] %vm350_vm1, %v1314_v13 }
0x15ed PF: > { %s14_s15 = sadd.s32 1, %s1750_s15  }
0x15ee   : > { %p11_p4 = scmp.ge.s32.totalorder %s14_s15, 4  }
0x15f0   :  { %13 = sbr.rel (!%p11_p4) target bundleno = 1 (0x1), region = 95 }

// kernel: forward.9
= control target key start
LH: loop header
LB: loop body
LE: loop exit
PB: predicated region body
PF: predicated region fallthrough
CT: control target
= control target key end

     0   :  { %s1765_s15 = smov 0   ;;  %s2027_s0 = inlined_call_operand.vmem [shape: f32[16,32], index: 0, kind: input, shape index: {}]   ;;  %s2028_s1 = inlined_call_operand.vmem [shape: f32[2,32,128], index: 1, kind: input, shape index: {}]   ;;  %s2029_s2 = inlined_call_operand.vmem [shape: f32[2,32,128], index: 2, kind: input, shape index: {}]   ;;  %s2030_s3 = inlined_call_operand.vmem [shape: f32[2,1,128], index: 3, kind: input, shape index: {}]   ;;  %s2031_s4 = inlined_call_operand.vmem [shape: f32[2,8,2,32], index: 4, kind: output, shape index: {}]  }
   0x1 LB: > { %s1771_s16 = sadd.s32 4294967295, %s1733_s15   ;;  %p1448_p0 = scmp.ge.s32.totalorder %s1733_s15, 1  ;;  %s1733_s15 = sphi %s1765_s15, %s14_s15  }
   0x2   : > { %p180_p1 = scmp.lt.s32.totalorder %s1733_s15, 3 }
   0x4   : > { %p181_p2 = pnand %p1448_p0, %p180_p1 }
   0x5   : > { %p214_p3 = scmp.lt.s32.totalorder (!%p181_p2), %s1771_s16, 1  ;;  %s1458_s6 = smul.u32 (!%p181_p2), 14, %s1771_s16 }
   0x6   : > { %184 = sbr.rel (%p181_p2) target bundleno = 5605 (0x15e5), region = 36  ;;  %s1737_s8 = smov (!%p181_p2), 64  }
   0x7   : > { %s351_s7 = scalar_lea.vmem (!%p181_p2), [#allocation2], %s1458_s6  ;;  %s1738_s9 = smov (!%p181_p2), 32  }
   0x8   : > { %s1739_s10 = smov (!%p181_p2), 96   ;;  %s1461_s18 = smul.u32 (!%p181_p2), 10, %s1771_s16 }
   0x9   : > { %s1467_s21 = smul.u32 (!%p181_p2), 6, %s1771_s16  ;;  %s1473_s24 = sshll.u32 (!%p181_p2), %s1771_s16, 1 }
   0xa   : > { %s1375_s25 = scalar_lea.vmem (!%p181_p2), [#allocation2], %s1473_s24  ;;  %s831_s27 = ssub.s32 (!%p181_p2), 4, %s1771_s16 }
   0xb   : > { %v241_v0 = vld [vmem:[%s2027_s0] sm:$0xff]  ;;  %vm249_vm0 = vcmask 261120   ;;  %v1735_v1 = vmov 0.0   ;;  %vm346_vm1 = vcmask 254976   ;;  %s1782_s19 = scalar_select %p214_p3, %s1771_s16, 1  ;;  %vm1736_vm2 = vmmov 0  }
   0xc   : > { %1559 = vmatprep.mubr.msk.f32.mxu0 %vm249_vm0, %v241_v0  ;;  %1562 = vmatprep.subr.mxu1 %v1735_v1  ;;  %347 = vst.msk [vmem:[#allocation3] sm:$0x3] %vm346_vm1, %v1735_v1  ;;  %348 = vst.msk [vmem:[#allocation4] sm:$0x3] %vm346_vm1, %v1735_v1  ;;  %v242_v10 = vld [vmem:[%s2027_s0 + $0x8] sm:$0xff]  ;;  %s1368_s22 = scalar_lea.vmem [#allocation2], %s1467_s21 }
   0xd   : > { %1570 = vmatprep.mubr.msk.f32.mxu1 %vm1736_vm2, %v1735_v1  ;;  %s1502_s20 = sshll.u32 %s1782_s19, 5  ;;  %s226_s5 = scalar_lea.vmem %s2030_s3, %s1782_s19 }
   0xe   : > { %s218_s23 = scalar_lea.vmem %s2028_s1, %s1502_s20  ;;  %s223_s26 = scalar_lea.vmem %s2029_s2, %s1502_s20  ;;  %v1455_v12 = vld [vmem:[%s226_s5] ss:$0 sm:$0xff] }
   0xf   : > { %v235_v2 = vld [vmem:[%s218_s23 + $0x18] sm:$0xff]  ;;  %v1797_v3 = vld [vmem:[%s223_s26 + $0x10] sm:$0xff]  ;;  %v233_v6 = vld [vmem:[%s218_s23 + $0x8] sm:$0xff]  ;;  %s1504_s11 = sshll.u32 %s1782_s19, 4  ;;  %s1360_s19 = scalar_lea.vmem [#allocation2], %s1461_s18 }
  0x10   : > { %v1799_v4 = vld [vmem:[%s223_s26 + $0x18] sm:$0xff]  ;;  %1551 = vmatprep.subr.mxu0 %v235_v2  ;;  %v234_v5 = vld [vmem:[%s218_s23 + $0x10] sm:$0xff]  ;;  %v1802_v7 = vld [vmem:[%s223_s26 + $0x8] sm:$0xff]  ;;  %s1858_s14 = scalar_lea.vmem %s2031_s4, %s1504_s11  ;;  %s1954_s28 = sshll.u32 %s831_s27, 1 }
  0x11   : > { %1552 = vmatpush3.msra.mxu0 %v235_v2  ;;  %1563 = vmatpush3.msra.mxu1 %v1799_v4  ;;  %v232_v8 = vld [vmem:[%s218_s23] sm:$0xff]  ;;  %s467_s17 = scalar_lea.vmem %s1858_s14, %s1458_s6  ;;  %s1364_s20 = scalar_lea.vmem %s1858_s14, %s1461_s18 }
  0x12   : > { %1553 = vmatprep.subr.mxu0 %v234_v5  ;;  %1564 = vmatprep.subr.mxu1 %v1735_v1  ;;  %v1806_v9 = vld [vmem:[%s223_s26] sm:$0xff]  ;;  %s1372_s23 = scalar_lea.vmem %s1858_s14, %s1467_s21  ;;  %s1378_s26 = scalar_lea.vmem %s1858_s14, %s1473_s24 }
  0x13   : > { %1554 = vmatpush3.msra.mxu0 %v234_v5  ;;  %1565 = vmatpush3.msra.mxu1 %v1797_v3  ;;  %v353_v11 = vld [vmem:[#allocation3] sm:$0x3]  ;;  %v435_v22 = vld [vmem:[#allocation4] sm:$0x3]  ;;  %s833_s29 = scalar_lea.vmem [#allocation2], %s1954_s28  ;;  %s949_s30 = scalar_lea.vmem %s1858_s14, %s1954_s28 }
  0x14   : > { %1555 = vmatprep.subr.mxu0 %v233_v6  ;;  %1566 = vmatprep.subr.mxu1 %v1735_v1  ;;  %s1482_s5 = smul.u32 4294967290, %s1771_s16 }
  0x15   : > { %1556 = vmatpush3.msra.mxu0 %v233_v6  ;;  %1567 = vmatpush3.msra.mxu1 %v1802_v7  ;;  %s1488_s11 = smul.u32 4294967286, %s1771_s16 }
  0x16   : > { %1557 = vmatprep.subr.mxu0 %v232_v8  ;;  %1568 = vmatprep.subr.mxu1 %v1735_v1  ;;  %s1386_s6 = scalar_lea.vmem [#allocation2], %s1482_s5 }
  0x17   : > { %1558 = vmatpush3.msra.mxu0 %v232_v8  ;;  %1569 = vmatpush3.msra.mxu1 %v1806_v9  ;;  %s1394_s12 = scalar_lea.vmem [#allocation2], %s1488_s11  ;;  %s1398_s13 = scalar_lea.vmem %s1858_s14, %s1488_s11 }
  0x18   : > { %1560 = vmatmul.mubr.msk.f32.vlgmr.msra.gmra.mxu0 %vm249_vm0, %v242_v10  ;;  %1571 = vmatmul.mubr.msk.f32.vlgmr.msra.gmra.mxu1 %vm249_vm0, %v353_v11 }
  0x19   : > { %1573 = vmatprep.subr.mxu0 %v1735_v1  ;;  %1581 = vmatprep.mubr.msk.f32.mxu0 %vm1736_vm2, %v1735_v1 }
  0x1a   : > { %1574 = vmatpush3.msra.mxu0 %v1799_v4  ;;  %1584 = vmatprep.subr.mxu1 %v1735_v1 }
  0x1b   : > { %1575 = vmatprep.subr.mxu0 %v1735_v1  ;;  %1585 = vmatpush3.msra.mxu1 %v1799_v4 }
  0x1c   : > { %1576 = vmatpush3.msra.mxu0 %v1797_v3  ;;  %1586 = vmatprep.subr.mxu1 %v1735_v1 }
  0x1d   : > { %1577 = vmatprep.subr.mxu0 %v1735_v1  ;;  %1587 = vmatpush3.msra.mxu1 %v1797_v3 }
  0x1e   : > { %1578 = vmatpush3.msra.mxu0 %v1802_v7  ;;  %1588 = vmatprep.subr.mxu1 %v1735_v1 }
  0x1f   : > { %1579 = vmatprep.subr.mxu0 %v1735_v1  ;;  %1589 = vmatpush3.msra.mxu1 %v1802_v7 }
  0x20   : > { %1580 = vmatpush3.msra.mxu0 %v1806_v9  ;;  %1590 = vmatprep.subr.mxu1 %v1735_v1 }
  0x21   : > { %1591 = vmatpush3.msra.mxu1 %v1806_v9  ;;  %1592 = vmatprep.mubr.msk.f32.mxu1 %vm1736_vm2, %v1735_v1 }
  0x22   : > { %1595 = vmatprep.subr.mxu0 %v1735_v1  ;;  %1606 = vmatprep.subr.mxu1 %v1735_v1 }
  0xd8   : > { %v1561_v13 = vpop.f32.mrf.mxu0  ;;  %v423_v14 = vpop.f32.mrf.mxu1 }
  0xd9   : > { %v328_v15 = vadd.f32 %v1561_v13, %v1455_v12 }
  0xda   : > { %v322_v16 = vpop.f32.mrf.mxu0  ;;  %v1572_v17 = vpop.f32.mrf.mxu1 }
  0xdb   : > { %339 = vst [vmem:[#allocation2 + $0x8] ss:$4 sps:$4 sm:$0xff] %v328_v15   ;;  %v323_v18 = vadd.f32 %v1455_v12, %v322_v16 }
  0xdd   : > { %331 = vst [vmem:[#allocation2] ss:$4 sps:$4 sm:$0xff] %v323_v18  }
  0xe4   : > { %v352_v19 = vld [vmem:[%s351_s7] sm:$0x3]  ;;  %v1462_v40 = vld [vmem:[%s1360_s19 + $0x2] sm:$0x3]  ;;  %v1468_v62 = vld [vmem:[%s1368_s22 + $0x4] sm:$0x3]  ;;  %s1390_s7 = scalar_lea.vmem %s1858_s14, %s1482_s5 }
  0xe5   : > { %v427_v20 = vadd.f32 %v423_v14, %v352_v19 }
  0xe7   : > { %1663 = vtanh.f32 %v427_v20  ;;  %v1460_v23 = vmul.f32 -1.442695, %v427_v20 }
  0xe9   : > { %1665 = vpow2.f32 %v1460_v23 }
  0xf4   : > { %v1664_v21 = vpop.eup %1663 }
  0xf5   : > { %442 = vrot.lane.b32.xlu0 %v1664_v21, %s1737_s8 }
  0xf6   : > { %v1666_v24 = vpop.eup %1665 }
  0xf7   : > { %v431_v25 = vadd.f32 1.0, %v1666_v24 }
  0xf9   : > { %437 = vrot.lane.b32.xlu0 %v435_v22, %s1738_s9  ;;  %1667 = vrcp.f32 %v431_v25  ;;  %v1474_v25 = vld [vmem:[%s1375_s25 + $0x6] sm:$0x3] }
 0x106   : > { %v1668_v26 = vpop.eup %1667 }
 0x167   : > { %v443_v27 = vpop.permute.xlu0 %442 }
 0x168   : > { %v445_v28 = vmul.f32 %v1668_v26, %v443_v27 }
 0x16a   : > { %447 = vrot.lane.b32.xlu1 %v445_v28, %s1738_s9 }
 0x16b   : > { %v438_v29 = vpop.permute.xlu0 %437 }
 0x16c   : > { %v440_v30 = vmul.f32 %v1668_v26, %v438_v29 }
 0x1dc   : > { %v448_v31 = vpop.permute.xlu1 %447 }
 0x1dd   : > { %v450_v32 = vadd.f32 %v448_v31, %v440_v30 }
 0x1df   : > { %1669 = vtanh.f32 %v450_v32 }
 0x1ec   : > { %v1670_v33 = vpop.eup %1669 }
 0x1ed   : > { %453 = vrot.lane.b32.xlu1 %v1670_v33, %s1737_s8 }
 0x1f1   : > { %458 = vrot.lane.b32.xlu1 %v450_v32, %s1739_s10 }
 0x25f   : > { %v454_v34 = vpop.permute.xlu1 %453 }
 0x260   : > { %v456_v35 = vmul.f32 %v1668_v26, %v454_v34 }
 0x262   : > { %463 = vrot.lane.b32.xlu0 %v456_v35, %s1738_s9 }
 0x263   : > { %v459_v36 = vpop.permute.xlu1 %458 }
 0x264   : > { %461 = vst.msk [vmem:[#allocation4] sm:$0x3] %vm346_vm1, %v459_v36 }
 0x26b   : > { %v556_v37 = vld [vmem:[#allocation4] sm:$0x3] }
 0x26c   : > { %558 = vrot.lane.b32.xlu1 %v556_v37, %s1738_s9 }
 0x2d4   : > { %v464_v38 = vpop.permute.xlu0 %463 }
 0x2d5   : > { %466 = vst.msk [vmem:[#allocation3] sm:$0x3] %vm346_vm1, %v464_v38  ;;  %468 = vst.msk [vmem:[%s467_s17] sm:$0x3] %vm346_vm1, %v464_v38  ;;  %s1494_s17 = smul.u32 4294967282, %s1771_s16 }
 0x2d7   : > { %s1402_s18 = scalar_lea.vmem [#allocation2], %s1494_s17  ;;  %s1406_s19 = scalar_lea.vmem %s1858_s14, %s1494_s17 }
 0x2dc   : > { %v474_v39 = vld [vmem:[#allocation3] sm:$0x3] }
 0x2dd   : > { %1582 = vmatmul.mubr.msk.f32.vlgmr.msra.gmra.mxu0 %vm249_vm0, %v474_v39 }
 0x2de   : > { %1596 = vmatpush3.msra.mxu0 %v1799_v4  ;;  %1603 = vmatprep.mubr.msk.f32.mxu0 %vm1736_vm2, %v1735_v1  ;;  %v559_v51 = vpop.permute.xlu1 %558 }
 0x2df   : > { %1597 = vmatprep.subr.mxu0 %v1735_v1 }
 0x2e0   : > { %1598 = vmatpush3.msra.mxu0 %v1797_v3 }
 0x2e1   : > { %1599 = vmatprep.subr.mxu0 %v1735_v1 }
 0x2e2   : > { %1600 = vmatpush3.msra.mxu0 %v1802_v7 }
 0x2e3   : > { %1601 = vmatprep.subr.mxu0 %v1735_v1 }
 0x2e4   : > { %1602 = vmatpush3.msra.mxu0 %v1806_v9 }
 0x2e5   : > { %1617 = vmatprep.subr.mxu0 %v1735_v1 }
 0x39d   : > { %v544_v41 = vpop.f32.mrf.mxu0 }
 0x39e   : > { %v548_v42 = vadd.f32 %v1462_v40, %v544_v41 }
 0x39f   : > { %v1583_v43 = vpop.f32.mrf.mxu0 }
 0x3a0   : > { %1671 = vtanh.f32 %v548_v42  ;;  %v1464_v45 = vmul.f32 -1.442695, %v548_v42 }
 0x3a2   : > { %1673 = vpow2.f32 %v1464_v45 }
 0x3ad   : > { %v1672_v44 = vpop.eup %1671 }
 0x3ae   : > { %563 = vrot.lane.b32.xlu0 %v1672_v44, %s1737_s8 }
 0x3af   : > { %v1674_v46 = vpop.eup %1673 }
 0x3b0   : > { %v552_v47 = vadd.f32 1.0, %v1674_v46 }
 0x3b2   : > { %1675 = vrcp.f32 %v552_v47  ;;  %v834_v47 = vld [vmem:[%s833_s29] sm:$0x3] }
 0x3bf   : > { %v1676_v48 = vpop.eup %1675 }
 0x3c0   : > { %v561_v52 = vmul.f32 %v1676_v48, %v559_v51 }
 0x420   : > { %v564_v49 = vpop.permute.xlu0 %563 }
 0x421   : > { %v566_v50 = vmul.f32 %v1676_v48, %v564_v49 }
 0x423   : > { %568 = vrot.lane.b32.xlu0 %v566_v50, %s1738_s9 }
 0x495   : > { %v569_v53 = vpop.permute.xlu0 %568 }
 0x496   : > { %v571_v54 = vadd.f32 %v569_v53, %v561_v52 }
 0x498   : > { %1677 = vtanh.f32 %v571_v54 }
 0x4a5   : > { %v1678_v55 = vpop.eup %1677 }
 0x4a6   : > { %574 = vrot.lane.b32.xlu1 %v1678_v55, %s1737_s8 }
 0x4aa   : > { %579 = vrot.lane.b32.xlu1 %v571_v54, %s1739_s10 }
 0x518   : > { %v575_v56 = vpop.permute.xlu1 %574 }
 0x519   : > { %v577_v57 = vmul.f32 %v1676_v48, %v575_v56 }
 0x51b   : > { %584 = vrot.lane.b32.xlu0 %v577_v57, %s1738_s9 }
 0x51c   : > { %v580_v58 = vpop.permute.xlu1 %579 }
 0x51d   : > { %582 = vst.msk [vmem:[#allocation4] sm:$0x3] %vm346_vm1, %v580_v58 }
 0x524   : > { %v677_v59 = vld [vmem:[#allocation4] sm:$0x3] }
 0x525   : > { %679 = vrot.lane.b32.xlu1 %v677_v59, %s1738_s9 }
 0x58d   : > { %v585_v60 = vpop.permute.xlu0 %584 }
 0x58e   : > { %587 = vst.msk [vmem:[#allocation3] sm:$0x3] %vm346_vm1, %v585_v60  ;;  %1466 = vst.msk [vmem:[%s1364_s20 + $0x2] sm:$0x3] %vm346_vm1, %v585_v60 }
 0x595   : > { %v595_v61 = vld [vmem:[#allocation3] sm:$0x3] }
 0x596   : > { %1593 = vmatmul.mubr.msk.f32.vlgmr.msra.gmra.mxu1 %vm249_vm0, %v595_v61 }
 0x597   : > { %1607 = vmatpush3.msra.mxu1 %v1799_v4  ;;  %1614 = vmatprep.mubr.msk.f32.mxu1 %vm1736_vm2, %v1735_v1  ;;  %v680_v14 = vpop.permute.xlu1 %679 }
 0x598   : > { %1608 = vmatprep.subr.mxu1 %v1735_v1 }
 0x599   : > { %1609 = vmatpush3.msra.mxu1 %v1797_v3 }
 0x59a   : > { %1610 = vmatprep.subr.mxu1 %v1735_v1 }
 0x59b   : > { %1611 = vmatpush3.msra.mxu1 %v1802_v7 }
 0x59c   : > { %1612 = vmatprep.subr.mxu1 %v1735_v1 }
 0x59d   : > { %1613 = vmatpush3.msra.mxu1 %v1806_v9 }
 0x59e   : > { %1628 = vmatprep.subr.mxu1 %v1735_v1 }
 0x656   : > { %v665_v63 = vpop.f32.mrf.mxu1 }
 0x657   : > { %v669_v0 = vadd.f32 %v1468_v62, %v665_v63 }
 0x658   : > { %v1594_v2 = vpop.f32.mrf.mxu1 }
 0x659   : > { %1679 = vtanh.f32 %v669_v0  ;;  %v1470_v6 = vmul.f32 -1.442695, %v669_v0 }
 0x65b   : > { %1681 = vpow2.f32 %v1470_v6 }
 0x666   : > { %v1680_v5 = vpop.eup %1679 }
 0x667   : > { %684 = vrot.lane.b32.xlu0 %v1680_v5, %s1737_s8 }
 0x668   : > { %v1682_v8 = vpop.eup %1681 }
 0x669   : > { %v673_v10 = vadd.f32 1.0, %v1682_v8 }
 0x66b   : > { %1683 = vrcp.f32 %v673_v10  ;;  %v1483_v10 = vld [vmem:[%s1386_s6 + $0xa] sm:$0x3] }
 0x678   : > { %v1684_v11 = vpop.eup %1683 }
 0x679   : > { %v682_v15 = vmul.f32 %v1684_v11, %v680_v14 }
 0x6d9   : > { %v685_v12 = vpop.permute.xlu0 %684 }
 0x6da   : > { %v687_v13 = vmul.f32 %v1684_v11, %v685_v12 }
 0x6dc   : > { %689 = vrot.lane.b32.xlu0 %v687_v13, %s1738_s9 }
 0x74e   : > { %v690_v16 = vpop.permute.xlu0 %689 }
 0x74f   : > { %v692_v17 = vadd.f32 %v690_v16, %v682_v15 }
 0x751   : > { %1685 = vtanh.f32 %v692_v17 }
 0x75e   : > { %v1686_v18 = vpop.eup %1685 }
 0x75f   : > { %695 = vrot.lane.b32.xlu1 %v1686_v18, %s1737_s8 }
 0x763   : > { %700 = vrot.lane.b32.xlu1 %v692_v17, %s1739_s10 }
 0x7d1   : > { %v696_v19 = vpop.permute.xlu1 %695 }
 0x7d2   : > { %v698_v20 = vmul.f32 %v1684_v11, %v696_v19 }
 0x7d4   : > { %705 = vrot.lane.b32.xlu0 %v698_v20, %s1738_s9 }
 0x7d5   : > { %v701_v21 = vpop.permute.xlu1 %700 }
 0x7d6   : > { %703 = vst.msk [vmem:[#allocation4] sm:$0x3] %vm346_vm1, %v701_v21 }
 0x7dd   : > { %v797_v22 = vld [vmem:[#allocation4] sm:$0x3] }
 0x7de   : > { %799 = vrot.lane.b32.xlu1 %v797_v22, %s1738_s9 }
 0x846   : > { %v706_v23 = vpop.permute.xlu0 %705 }
 0x847   : > { %708 = vst.msk [vmem:[#allocation3] sm:$0x3] %vm346_vm1, %v706_v23  ;;  %1472 = vst.msk [vmem:[%s1372_s23 + $0x4] sm:$0x3] %vm346_vm1, %v706_v23 }
 0x84e   : > { %v715_v24 = vld [vmem:[#allocation3] sm:$0x3] }
 0x84f   : > { %1604 = vmatmul.mubr.msk.f32.vlgmr.msra.gmra.mxu0 %vm249_vm0, %v715_v24 }
 0x850   : > { %1618 = vmatpush3.msra.mxu0 %v1799_v4  ;;  %1625 = vmatprep.mubr.msk.f32.mxu0 %vm1736_vm2, %v1735_v1  ;;  %v800_v36 = vpop.permute.xlu1 %799 }
 0x851   : > { %1619 = vmatprep.subr.mxu0 %v1735_v1 }
 0x852   : > { %1620 = vmatpush3.msra.mxu0 %v1797_v3 }
 0x853   : > { %1621 = vmatprep.subr.mxu0 %v1735_v1 }
 0x854   : > { %1622 = vmatpush3.msra.mxu0 %v1802_v7 }
 0x855   : > { %1623 = vmatprep.subr.mxu0 %v1735_v1 }
 0x856   : > { %1624 = vmatpush3.msra.mxu0 %v1806_v9 }
 0x857   : > { %1639 = vmatprep.subr.mxu0 %v1735_v1 }
 0x90f   : > { %v785_v26 = vpop.f32.mrf.mxu0 }
 0x910   : > { %v789_v27 = vadd.f32 %v1474_v25, %v785_v26 }
 0x911   : > { %v1605_v28 = vpop.f32.mrf.mxu0 }
 0x912   : > { %1687 = vtanh.f32 %v789_v27  ;;  %v1476_v30 = vmul.f32 -1.442695, %v789_v27  ;;  %v1489_v27 = vld [vmem:[%s1394_s12 + $0xc] sm:$0x3] }
 0x914   : > { %1689 = vpow2.f32 %v1476_v30 }
 0x91f   : > { %v1688_v29 = vpop.eup %1687 }
 0x920   : > { %804 = vrot.lane.b32.xlu0 %v1688_v29, %s1737_s8 }
 0x921   : > { %v1690_v31 = vpop.eup %1689 }
 0x922   : > { %v793_v32 = vadd.f32 1.0, %v1690_v31 }
 0x924   : > { %1691 = vrcp.f32 %v793_v32 }
 0x931   : > { %v1692_v33 = vpop.eup %1691 }
 0x932   : > { %v802_v37 = vmul.f32 %v1692_v33, %v800_v36 }
 0x992   : > { %v805_v34 = vpop.permute.xlu0 %804 }
 0x993   : > { %v807_v35 = vmul.f32 %v1692_v33, %v805_v34 }
 0x995   : > { %809 = vrot.lane.b32.xlu0 %v807_v35, %s1738_s9 }
 0xa07   : > { %v810_v38 = vpop.permute.xlu0 %809 }
 0xa08   : > { %v812_v39 = vadd.f32 %v810_v38, %v802_v37 }
 0xa0a   : > { %1693 = vtanh.f32 %v812_v39 }
 0xa17   : > { %v1694_v40 = vpop.eup %1693 }
 0xa18   : > { %815 = vrot.lane.b32.xlu1 %v1694_v40, %s1737_s8 }
 0xa1c   : > { %820 = vrot.lane.b32.xlu1 %v812_v39, %s1739_s10 }
 0xa8a   : > { %v816_v41 = vpop.permute.xlu1 %815 }
 0xa8b   : > { %v818_v42 = vmul.f32 %v1692_v33, %v816_v41 }
 0xa8d   : > { %825 = vrot.lane.b32.xlu0 %v818_v42, %s1738_s9 }
 0xa8e   : > { %v821_v43 = vpop.permute.xlu1 %820 }
 0xa8f   : > { %823 = vst.msk [vmem:[#allocation4] sm:$0x3] %vm346_vm1, %v821_v43 }
 0xa96   : > { %v917_v44 = vld [vmem:[#allocation4] sm:$0x3] }
 0xa97   : > { %919 = vrot.lane.b32.xlu1 %v917_v44, %s1738_s9 }
 0xaff   : > { %v826_v45 = vpop.permute.xlu0 %825 }
 0xb00   : > { %828 = vst.msk [vmem:[#allocation3] sm:$0x3] %vm346_vm1, %v826_v45  ;;  %1478 = vst.msk [vmem:[%s1378_s26 + $0x6] sm:$0x3] %vm346_vm1, %v826_v45 }
 0xb07   : > { %v835_v46 = vld [vmem:[#allocation3] sm:$0x3] }
 0xb08   : > { %1615 = vmatmul.mubr.msk.f32.vlgmr.msra.gmra.mxu1 %vm249_vm0, %v835_v46 }
 0xb09   : > { %1629 = vmatpush3.msra.mxu1 %v1799_v4  ;;  %1636 = vmatprep.mubr.msk.f32.mxu1 %vm1736_vm2, %v1735_v1  ;;  %v920_v58 = vpop.permute.xlu1 %919 }
 0xb0a   : > { %1630 = vmatprep.subr.mxu1 %v1735_v1 }
 0xb0b   : > { %1631 = vmatpush3.msra.mxu1 %v1797_v3 }
 0xb0c   : > { %1632 = vmatprep.subr.mxu1 %v1735_v1 }
 0xb0d   : > { %1633 = vmatpush3.msra.mxu1 %v1802_v7 }
 0xb0e   : > { %1634 = vmatprep.subr.mxu1 %v1735_v1 }
 0xb0f   : > { %1635 = vmatpush3.msra.mxu1 %v1806_v9 }
 0xbc8   : > { %v905_v48 = vpop.f32.mrf.mxu1 }
 0xbc9   : > { %v909_v49 = vadd.f32 %v905_v48, %v834_v47 }
 0xbca   : > { %v1616_v50 = vpop.f32.mrf.mxu1 }
 0xbcb   : > { %1695 = vtanh.f32 %v909_v49  ;;  %v1481_v52 = vmul.f32 -1.442695, %v909_v49  ;;  %v1495_v49 = vld [vmem:[%s1402_s18 + $0xe] sm:$0x3] }
 0xbcd   : > { %1697 = vpow2.f32 %v1481_v52 }
 0xbd8   : > { %v1696_v51 = vpop.eup %1695 }
 0xbd9   : > { %924 = vrot.lane.b32.xlu0 %v1696_v51, %s1737_s8 }
 0xbda   : > { %v1698_v53 = vpop.eup %1697 }
 0xbdb   : > { %v913_v54 = vadd.f32 1.0, %v1698_v53 }
 0xbdd   : > { %1699 = vrcp.f32 %v913_v54 }
 0xbea   : > { %v1700_v55 = vpop.eup %1699 }
 0xbeb   : > { %v922_v59 = vmul.f32 %v1700_v55, %v920_v58 }
 0xc4b   : > { %v925_v56 = vpop.permute.xlu0 %924 }
 0xc4c   : > { %v927_v57 = vmul.f32 %v1700_v55, %v925_v56 }
 0xc4e   : > { %929 = vrot.lane.b32.xlu0 %v927_v57, %s1738_s9 }
 0xcc0   : > { %v930_v60 = vpop.permute.xlu0 %929 }
 0xcc1   : > { %v932_v61 = vadd.f32 %v930_v60, %v922_v59 }
 0xcc3   : > { %1701 = vtanh.f32 %v932_v61 }
 0xcd0   : > { %v1702_v62 = vpop.eup %1701 }
 0xcd1   : > { %935 = vrot.lane.b32.xlu1 %v1702_v62, %s1737_s8 }
 0xcd5   : > { %940 = vrot.lane.b32.xlu1 %v932_v61, %s1739_s10 }
 0xd43   : > { %v936_v63 = vpop.permute.xlu1 %935 }
 0xd44   : > { %v938_v0 = vmul.f32 %v1700_v55, %v936_v63 }
 0xd46   : > { %945 = vrot.lane.b32.xlu0 %v938_v0, %s1738_s9 }
 0xd47   : > { %v941_v2 = vpop.permute.xlu1 %940 }
 0xd48   : > { %943 = vst.msk [vmem:[#allocation4] sm:$0x3] %vm346_vm1, %v941_v2 }
 0xd4f   : > { %v1038_v5 = vld [vmem:[#allocation4] sm:$0x3] }
 0xd50   : > { %1040 = vrot.lane.b32.xlu1 %v1038_v5, %s1738_s9 }
 0xdb8   : > { %v946_v6 = vpop.permute.xlu0 %945 }
 0xdb9   : > { %948 = vst.msk [vmem:[#allocation3] sm:$0x3] %vm346_vm1, %v946_v6  ;;  %950 = vst.msk [vmem:[%s949_s30] sm:$0x3] %vm346_vm1, %v946_v6 }
 0xdc0   : > { %v956_v8 = vld [vmem:[#allocation3] sm:$0x3] }
 0xdc1   : > { %1626 = vmatmul.mubr.msk.f32.vlgmr.msra.gmra.mxu0 %vm249_vm0, %v956_v8 }
 0xdc2   : > { %1640 = vmatpush3.msra.mxu0 %v1799_v4  ;;  %1647 = vmatprep.mubr.msk.f32.mxu0 %vm1736_vm2, %v1735_v1 }
 0xdc3   : > { %1641 = vmatprep.subr.mxu0 %v1735_v1 }
 0xdc4   : > { %1642 = vmatpush3.msra.mxu0 %v1797_v3 }
 0xdc5   : > { %1643 = vmatprep.subr.mxu0 %v1735_v1 }
 0xdc6   : > { %1644 = vmatpush3.msra.mxu0 %v1802_v7 }
 0xdc7   : > { %1645 = vmatprep.subr.mxu0 %v1735_v1 }
 0xdc8   : > { %1646 = vmatpush3.msra.mxu0 %v1806_v9  ;;  %v1041_v9 = vpop.permute.xlu1 %1040 }
 0xe81   : > { %v1026_v4 = vpop.f32.mrf.mxu0 }
 0xe82   : > { %v1030_v11 = vadd.f32 %v1483_v10, %v1026_v4 }
 0xe83   : > { %v1627_v12 = vpop.f32.mrf.mxu0 }
 0xe84   : > { %1703 = vtanh.f32 %v1030_v11  ;;  %v1485_v3 = vmul.f32 -1.442695, %v1030_v11 }
 0xe86   : > { %1705 = vpow2.f32 %v1485_v3 }
 0xe91   : > { %v1704_v13 = vpop.eup %1703 }
 0xe92   : > { %1045 = vrot.lane.b32.xlu0 %v1704_v13, %s1737_s8 }
 0xe93   : > { %v1706_v14 = vpop.eup %1705 }
 0xe94   : > { %v1034_v15 = vadd.f32 1.0, %v1706_v14 }
 0xe96   : > { %1707 = vrcp.f32 %v1034_v15 }
 0xea3   : > { %v1708_v7 = vpop.eup %1707 }
 0xea4   : > { %v1043_v17 = vmul.f32 %v1708_v7, %v1041_v9 }
 0xf04   : > { %v1046_v1 = vpop.permute.xlu0 %1045 }
 0xf05   : > { %v1048_v16 = vmul.f32 %v1708_v7, %v1046_v1 }
 0xf07   : > { %1050 = vrot.lane.b32.xlu0 %v1048_v16, %s1738_s9 }
 0xf79   : > { %v1051_v18 = vpop.permute.xlu0 %1050 }
 0xf7a   : > { %v1053_v19 = vadd.f32 %v1051_v18, %v1043_v17 }
 0xf7c   : > { %1709 = vtanh.f32 %v1053_v19 }
 0xf89   : > { %v1710_v20 = vpop.eup %1709 }
 0xf8a   : > { %1056 = vrot.lane.b32.xlu1 %v1710_v20, %s1737_s8 }
 0xf8e   : > { %1061 = vrot.lane.b32.xlu1 %v1053_v19, %s1739_s10 }
 0xffc   : > { %v1057_v21 = vpop.permute.xlu1 %1056 }
 0xffd   : > { %v1059_v22 = vmul.f32 %v1708_v7, %v1057_v21 }
 0xfff   : > { %1066 = vrot.lane.b32.xlu0 %v1059_v22, %s1738_s9 }
0x1000   : > { %v1062_v23 = vpop.permute.xlu1 %1061 }
0x1001   : > { %1064 = vst.msk [vmem:[#allocation4] sm:$0x3] %vm346_vm1, %v1062_v23 }
0x1008   : > { %v1159_v24 = vld [vmem:[#allocation4] sm:$0x3] }
0x1009   : > { %1161 = vrot.lane.b32.xlu1 %v1159_v24, %s1738_s9 }
0x1071   : > { %v1067_v25 = vpop.permute.xlu0 %1066 }
0x1072   : > { %1069 = vst.msk [vmem:[#allocation3] sm:$0x3] %vm346_vm1, %v1067_v25  ;;  %1487 = vst.msk [vmem:[%s1390_s7 + $0xa] sm:$0x3] %vm346_vm1, %v1067_v25 }
0x1079   : > { %v1077_v26 = vld [vmem:[#allocation3] sm:$0x3] }
0x107a   : > { %1637 = vmatmul.mubr.msk.f32.vlgmr.msra.gmra.mxu1 %vm249_vm0, %v1077_v26 }
0x107b   : > { %v1162_v38 = vpop.permute.xlu1 %1161 }
0x113a   : > { %v1147_v28 = vpop.f32.mrf.mxu1 }
0x113b   : > { %v1151_v29 = vadd.f32 %v1489_v27, %v1147_v28 }
0x113c   : > { %v1638_v30 = vpop.f32.mrf.mxu1 }
0x113d   : > { %1711 = vtanh.f32 %v1151_v29  ;;  %v1491_v32 = vmul.f32 -1.442695, %v1151_v29 }
0x113f   : > { %1713 = vpow2.f32 %v1491_v32 }
0x114a   : > { %v1712_v31 = vpop.eup %1711 }
0x114b   : > { %1166 = vrot.lane.b32.xlu0 %v1712_v31, %s1737_s8 }
0x114c   : > { %v1714_v33 = vpop.eup %1713 }
0x114d   : > { %v1155_v34 = vadd.f32 1.0, %v1714_v33 }
0x114f   : > { %1715 = vrcp.f32 %v1155_v34 }
0x115c   : > { %v1716_v35 = vpop.eup %1715 }
0x115d   : > { %v1164_v39 = vmul.f32 %v1716_v35, %v1162_v38 }
0x11bd   : > { %v1167_v36 = vpop.permute.xlu0 %1166 }
0x11be   : > { %v1169_v37 = vmul.f32 %v1716_v35, %v1167_v36 }
0x11c0   : > { %1171 = vrot.lane.b32.xlu0 %v1169_v37, %s1738_s9 }
0x1232   : > { %v1172_v40 = vpop.permute.xlu0 %1171 }
0x1233   : > { %v1174_v41 = vadd.f32 %v1172_v40, %v1164_v39 }
0x1235   : > { %1717 = vtanh.f32 %v1174_v41 }
0x1242   : > { %v1718_v42 = vpop.eup %1717 }
0x1243   : > { %1177 = vrot.lane.b32.xlu1 %v1718_v42, %s1737_s8 }
0x1247   : > { %1182 = vrot.lane.b32.xlu1 %v1174_v41, %s1739_s10 }
0x12b5   : > { %v1178_v43 = vpop.permute.xlu1 %1177 }
0x12b6   : > { %v1180_v44 = vmul.f32 %v1716_v35, %v1178_v43 }
0x12b8   : > { %1187 = vrot.lane.b32.xlu0 %v1180_v44, %s1738_s9 }
0x12b9   : > { %v1183_v45 = vpop.permute.xlu1 %1182 }
0x12ba   : > { %1185 = vst.msk [vmem:[#allocation4] sm:$0x3] %vm346_vm1, %v1183_v45 }
0x12c1   : > { %v1280_v46 = vld [vmem:[#allocation4] sm:$0x3] }
0x12c2   : > { %1282 = vrot.lane.b32.xlu1 %v1280_v46, %s1738_s9 }
0x132a   : > { %v1188_v47 = vpop.permute.xlu0 %1187 }
0x132b   : > { %1190 = vst.msk [vmem:[#allocation3] sm:$0x3] %vm346_vm1, %v1188_v47  ;;  %1493 = vst.msk [vmem:[%s1398_s13 + $0xc] sm:$0x3] %vm346_vm1, %v1188_v47 }
0x1332   : > { %v1198_v48 = vld [vmem:[#allocation3] sm:$0x3] }
0x1333   : > { %1648 = vmatmul.mubr.msk.f32.vlgmr.msra.gmra.mxu0 %vm249_vm0, %v1198_v48 }
0x1334   : > { %v1283_v60 = vpop.permute.xlu1 %1282 }
0x13f3   : > { %v1268_v50 = vpop.f32.mrf.mxu0 }
0x13f4   : > { %v1272_v51 = vadd.f32 %v1495_v49, %v1268_v50 }
0x13f5   : > { %v1649_v52 = vpop.f32.mrf.mxu0 }
0x13f6   : > { %1719 = vtanh.f32 %v1272_v51  ;;  %v1497_v54 = vmul.f32 -1.442695, %v1272_v51 }
0x13f8   : > { %1721 = vpow2.f32 %v1497_v54 }
0x1403   : > { %v1720_v53 = vpop.eup %1719 }
0x1404   : > { %1287 = vrot.lane.b32.xlu0 %v1720_v53, %s1737_s8 }
0x1405   : > { %v1722_v55 = vpop.eup %1721 }
0x1406   : > { %v1276_v56 = vadd.f32 1.0, %v1722_v55 }
0x1408   : > { %1723 = vrcp.f32 %v1276_v56 }
0x1415   : > { %v1724_v57 = vpop.eup %1723 }
0x1416   : > { %v1285_v61 = vmul.f32 %v1724_v57, %v1283_v60 }
0x1476   : > { %v1288_v58 = vpop.permute.xlu0 %1287 }
0x1477   : > { %v1290_v59 = vmul.f32 %v1724_v57, %v1288_v58 }
0x1479   : > { %1292 = vrot.lane.b32.xlu0 %v1290_v59, %s1738_s9 }
0x14eb   : > { %v1293_v62 = vpop.permute.xlu0 %1292 }
0x14ec   : > { %v1295_v63 = vadd.f32 %v1293_v62, %v1285_v61 }
0x14ee   : > { %1725 = vtanh.f32 %v1295_v63  ;;  %1303 = vrot.lane.b32.xlu0 %v1295_v63, %s1739_s10 }
0x14fb   : > { %v1726_v0 = vpop.eup %1725 }
0x14fc   : > { %1298 = vrot.lane.b32.xlu1 %v1726_v0, %s1737_s8 }
0x1560   : > { %v1304_v2 = vpop.permute.xlu0 %1303 }
0x1561   : > { %1306 = vst.msk [vmem:[#allocation4] sm:$0x3] %vm346_vm1, %v1304_v2 }
0x156e   : > { %v1299_v5 = vpop.permute.xlu1 %1298 }
0x156f   : > { %v1301_v6 = vmul.f32 %v1724_v57, %v1299_v5 }
0x1571   : > { %1308 = vrot.lane.b32.xlu1 %v1301_v6, %s1738_s9 }
0x15e3   : > { %v1309_v8 = vpop.permute.xlu1 %1308 }
0x15e4   : > { %1311 = vst.msk [vmem:[#allocation3] sm:$0x3] %vm346_vm1, %v1309_v8  ;;  %1499 = vst.msk [vmem:[%s1406_s19 + $0xe] sm:$0x3] %vm346_vm1, %v1309_v8 }
0x15e5 PF: > { %s14_s15 = sadd.s32 1, %s1733_s15  }
0x15e6   : > { %p11_p4 = scmp.ge.s32.totalorder %s14_s15, 4  }
0x15e8   :  { %13 = sbr.rel (!%p11_p4) target bundleno = 1 (0x1), region = 95 }

// kernel: forward.7
= control target key start
LH: loop header
LB: loop body
LE: loop exit
PB: predicated region body
PF: predicated region fallthrough
CT: control target
= control target key end

     0   :  { %vm60_vm0 = vcmask 261120   ;;  %v2216_v6 = vmov 0.0   ;;  %vm2217_vm1 = vmmov 0   ;;  %s2218_s25 = smov 120   ;;  %s2219_s26 = smov 96   ;;  %vm146_vm2 = vcmask 64512   ;;  %s2582_s2 = inlined_call_operand.vmem [shape: f32[32,96], index: 2, kind: input, shape index: {}]   ;;  %s2583_s0 = inlined_call_operand.vmem [shape: f32[16,32], index: 0, kind: input, shape index: {}]   ;;  %s2584_s3 = inlined_call_operand.vmem [shape: f32[1,96], index: 3, kind: input, shape index: {}]   ;;  %s2585_s1 = inlined_call_operand.vmem [shape: f32[2,8], index: 1, kind: input, shape index: {}]   ;;  %s2586_s4 = inlined_call_operand.vmem [shape: f32[32,32], index: 4, kind: input, shape index: {}]   ;;  %s2587_s5 = inlined_call_operand.vmem [shape: f32[1,32], index: 5, kind: input, shape index: {}]   ;;  %s2588_s8 = inlined_call_operand.vmem [shape: f32[32,64], index: 8, kind: input, shape index: {}]   ;;  %s2589_s6 = inlined_call_operand.vmem [shape: f32[1,32], index: 6, kind: input, shape index: {}]   ;;  %s2590_s7 = inlined_call_operand.vmem [shape: f32[1,32], index: 7, kind: input, shape index: {}]   ;;  %s2591_s10 = inlined_call_operand.vmem [shape: f32[64,32], index: 10, kind: input, shape index: {}]   ;;  %s2592_s9 = inlined_call_operand.vmem [shape: f32[1,64], index: 9, kind: input, shape index: {}]   ;;  %s2593_s11 = inlined_call_operand.vmem [shape: f32[1,32], index: 11, kind: input, shape index: {}]   ;;  %s2594_s12 = inlined_call_operand.vmem [shape: f32[1,32], index: 12, kind: input, shape index: {}]   ;;  %s2595_s13 = inlined_call_operand.vmem [shape: f32[1,32], index: 13, kind: input, shape index: {}]   ;;  %s2596_s14 = inlined_call_operand.vmem [shape: f32[16,32], index: 14, kind: output, shape index: {}]  }
   0x1   :  { %v52_v0 = vld [vmem:[%s2582_s2 + $0x18] sm:$0xff]  ;;  %v51_v1 = vld [vmem:[%s2582_s2 + $0x10] sm:$0xff]  ;;  %v2316_v2 = vld [vmem:[%s2583_s0] sm:$0xff]  ;;  %2045 = vmatprep.subr.mxu0 %v2216_v6  ;;  %2047 = vmatprep.mubr.msk.f32.mxu0 %vm2217_vm1, %v2216_v6  ;;  %s2220_s27 = smov 80   ;;  %s2221_s28 = smov 88   ;;  %vm486_vm3 = vcmask 130112  }
   0x2   :  { %2024 = vmatprep.subr.mxu1 %v52_v0  ;;  %v50_v3 = vld [vmem:[%s2582_s2 + $0x8] sm:$0xff]  ;;  %2032 = vmatprep.mubr.msk.f32.mxu1 %vm60_vm0, %v2316_v2  ;;  %v49_v4 = vld [vmem:[%s2582_s2] sm:$0xff]  ;;  %s2222_s29 = smov 72   ;;  %s2223_s30 = smov 112   ;;  %vm659_vm4 = vcmask 195712   ;;  %vm832_vm5 = vcmask 261312  }
   0x3   :  { %2025 = vmatpush3.msra.mxu1 %v52_v0  ;;  %v2329_v5 = vld [vmem:[%s2583_s0 + $0x8] sm:$0xff]  ;;  %v1922_v8 = vld [vmem:[%s2584_s3] ss:$0 sm:$0xff]  ;;  %s2224_s3 = smov 104   ;;  %s2225_s15 = smov 56   ;;  %vm1788_vm6 = vcmask 523264  }
   0x4   :  { %2026 = vmatprep.subr.mxu1 %v51_v1  ;;  %s2226_s16 = smov 64   ;;  %v1927_v28 = vld [vmem:[%s2585_s1] ss:$0 sm:$0xff]  ;;  %v1940_v48 = vld [vmem:[%s2585_s1 + $0x1] ss:$0 sm:$0xff]  ;;  %s2227_s1 = smov 40  }
   0x5   :  { %2027 = vmatpush3.msra.mxu1 %v51_v1  ;;  %s2228_s21 = smov 48   ;;  %s2229_s22 = smov 8  }
   0x6   :  { %2028 = vmatprep.subr.mxu1 %v50_v3  ;;  %s2230_s23 = smov 16   ;;  %s2231_s24 = smov 24  }
   0x7   :  { %2029 = vmatpush3.msra.mxu1 %v50_v3 }
   0x8   :  { %2030 = vmatprep.subr.mxu1 %v49_v4 }
   0x9   :  { %2031 = vmatpush3.msra.mxu1 %v49_v4 }
   0xa   :  { %2033 = vmatmul.mubr.msk.f32.vlgmr.msra.gmra.mxu1 %vm60_vm0, %v2329_v5  ;;  %2035 = vmatprep.subr.mxu1 %v2216_v6 }
   0xb   :  { %2037 = vmatprep.mubr.msk.f32.mxu1 %vm2217_vm1, %v2216_v6 }
  0xca   :  { %v2034_v7 = vpop.f32.mrf.mxu1 }
  0xcb   :  { %v2350_v11 = vadd.f32 %v2034_v7, %v1922_v8 }
  0xcc   :  { %v133_v9 = vpop.f32.mrf.mxu1 }
  0xcd   :  { %v2342_v10 = vadd.f32 %v1922_v8, %v133_v9 }
  0xcf   :  { %315 = vrot.lane.b32.xlu1 %v2342_v10, %s2218_s25  ;;  %144 = vrot.lane.b32.xlu0 %v2342_v10, %s2219_s26 }
  0xd3   :  { %490 = vrot.lane.b32.xlu1 %v2342_v10, %s2220_s27  ;;  %317 = vrot.lane.b32.xlu0 %v2342_v10, %s2221_s28 }
  0xd7   :  { %663 = vrot.lane.b32.xlu1 %v2342_v10, %s2222_s29  ;;  %488 = vrot.lane.b32.xlu0 %v2342_v10, %s2223_s30 }
  0xdb   :  { %836 = vrot.lane.b32.xlu1 %v2350_v11, %s2219_s26  ;;  %661 = vrot.lane.b32.xlu0 %v2342_v10, %s2224_s3 }
  0xdf   :  { %1006 = vrot.lane.b32.xlu1 %v2350_v11, %s2218_s25  ;;  %1008 = vrot.lane.b32.xlu0 %v2350_v11, %s2221_s28 }
  0xe3   :  { %1178 = vrot.lane.b32.xlu1 %v2350_v11, %s2223_s30  ;;  %1180 = vrot.lane.b32.xlu0 %v2350_v11, %s2220_s27 }
  0xe7   :  { %1350 = vrot.lane.b32.xlu1 %v2350_v11, %s2224_s3  ;;  %1352 = vrot.lane.b32.xlu0 %v2350_v11, %s2222_s29 }
  0xeb   :  { %406 = vrot.lane.b32.xlu1 %v2342_v10, %s2225_s15  ;;  %238 = vrot.lane.b32.xlu0 %v2342_v10, %s2226_s16 }
 0x141   :  { %v316_v12 = vpop.permute.xlu1 %315  ;;  %v145_v13 = vpop.permute.xlu0 %144 }
 0x142   :  { %2036 = vmatpush3.xpose.msk.msra.mxu1 %vm146_vm2, %v145_v13 }
 0x143   :  { %2040 = vmatprep.subr.mxu1 %v2216_v6 }
 0x145   :  { %v491_v14 = vpop.permute.xlu1 %490  ;;  %2038 = vmatmul.mubr.msk.f32.vlgmr.msra.gmra.mxu1 %vm146_vm2, %v2342_v10  ;;  %v318_v15 = vpop.permute.xlu0 %317 }
 0x146   :  { %2046 = vmatpush3.xpose.msk.msra.mxu0 %vm146_vm2, %v318_v15  ;;  %2042 = vmatprep.mubr.msk.f32.mxu1 %vm2217_vm1, %v2216_v6 }
 0x147   :  { %2055 = vmatprep.subr.mxu0 %v2216_v6 }
 0x149   :  { %v664_v16 = vpop.permute.xlu1 %663  ;;  %2048 = vmatmul.mubr.msk.f32.vlgmr.msra.gmra.mxu0 %vm146_vm2, %v316_v12  ;;  %v489_v17 = vpop.permute.xlu0 %488 }
 0x14a   :  { %2056 = vmatpush3.xpose.msk.msra.mxu0 %vm146_vm2, %v491_v14  ;;  %2057 = vmatprep.mubr.msk.f32.mxu0 %vm2217_vm1, %v2216_v6 }
 0x14b   :  { %2065 = vmatprep.subr.mxu0 %v2216_v6 }
 0x14d   :  { %2058 = vmatmul.mubr.msk.f32.vlgmr.msra.gmra.mxu0 %vm146_vm2, %v489_v17  ;;  %v662_v18 = vpop.permute.xlu0 %661  ;;  %v837_v19 = vpop.permute.xlu1 %836 }
 0x14e   :  { %2066 = vmatpush3.xpose.msk.msra.mxu0 %vm146_vm2, %v664_v16  ;;  %2067 = vmatprep.mubr.msk.f32.mxu0 %vm2217_vm1, %v2216_v6 }
 0x14f   :  { %2075 = vmatprep.subr.mxu0 %v2216_v6 }
 0x151   :  { %2068 = vmatmul.mubr.msk.f32.vlgmr.msra.gmra.mxu0 %vm146_vm2, %v662_v18  ;;  %v1009_v20 = vpop.permute.xlu0 %1008  ;;  %v1007_v21 = vpop.permute.xlu1 %1006 }
 0x152   :  { %2076 = vmatpush3.xpose.msk.msra.mxu0 %vm146_vm2, %v837_v19  ;;  %2077 = vmatprep.mubr.msk.f32.mxu0 %vm2217_vm1, %v2216_v6 }
 0x153   :  { %2085 = vmatprep.subr.mxu0 %v2216_v6 }
 0x155   :  { %2078 = vmatmul.mubr.msk.f32.vlgmr.msra.gmra.mxu0 %vm146_vm2, %v2350_v11  ;;  %v1181_v22 = vpop.permute.xlu0 %1180  ;;  %v1179_v24 = vpop.permute.xlu1 %1178 }
 0x156   :  { %2086 = vmatpush3.xpose.msk.msra.mxu0 %vm146_vm2, %v1009_v20  ;;  %2087 = vmatprep.mubr.msk.f32.mxu0 %vm2217_vm1, %v2216_v6 }
 0x157   :  { %2095 = vmatprep.subr.mxu0 %v2216_v6 }
 0x159   :  { %2088 = vmatmul.mubr.msk.f32.vlgmr.msra.gmra.mxu0 %vm146_vm2, %v1007_v21  ;;  %v1353_v23 = vpop.permute.xlu0 %1352  ;;  %v1351_v26 = vpop.permute.xlu1 %1350 }
 0x15a   :  { %2096 = vmatpush3.xpose.msk.msra.mxu0 %vm146_vm2, %v1181_v22  ;;  %2097 = vmatprep.mubr.msk.f32.mxu0 %vm2217_vm1, %v2216_v6 }
 0x15b   :  { %2105 = vmatprep.subr.mxu0 %v2216_v6 }
 0x15d   :  { %2098 = vmatmul.mubr.msk.f32.vlgmr.msra.gmra.mxu0 %vm146_vm2, %v1179_v24  ;;  %v239_v25 = vpop.permute.xlu0 %238  ;;  %v2422_v8 = vpop.permute.xlu1 %406 }
 0x15e   :  { %2041 = vmatpush3.msra.mxu1 %v239_v25  ;;  %2106 = vmatpush3.xpose.msk.msra.mxu0 %vm146_vm2, %v1353_v23 }
 0x15f   :  { %2107 = vmatprep.mubr.msk.f32.mxu0 %vm2217_vm1, %v2216_v6  ;;  %2050 = vmatprep.subr.mxu1 %v2216_v6 }
 0x161   :  { %2108 = vmatmul.mubr.msk.f32.vlgmr.msra.gmra.mxu0 %vm146_vm2, %v1351_v26 }
 0x205   :  { %v217_v27 = vpop.f32.mrf.mxu1 }
 0x206   :  { %v221_v29 = vmul.f32 0.35355338, %v217_v27 }
 0x207   :  { %v2039_v30 = vpop.f32.mrf.mxu1 }
 0x208   :  { %v226_v31 = vadd.f32 %v1927_v28, %v221_v29 }
 0x209   :  { %v389_v32 = vpop.f32.mrf.mxu0 }
 0x20a   :  { %v393_v33 = vmul.f32 0.35355338, %v389_v32  ;;  %v227_v34 = vsel %vm146_vm2, %v226_v31, -inf }
 0x20b   :  { %228 = vmax.xlane.f32.xlu0 %v227_v34  ;;  %v2049_v35 = vpop.f32.mrf.mxu0 }
 0x20c   :  { %v394_v36 = vadd.f32 %v1927_v28, %v393_v33 }
 0x20d   :  { %v562_v37 = vpop.f32.mrf.mxu0 }
 0x20e   :  { %v566_v38 = vmul.f32 0.35355338, %v562_v37  ;;  %v395_v39 = vsel %vm146_vm2, %v394_v36, -inf }
 0x20f   :  { %396 = vmax.xlane.f32.xlu1 %v395_v39  ;;  %v2059_v40 = vpop.f32.mrf.mxu0 }
 0x210   :  { %v567_v41 = vadd.f32 %v1927_v28, %v566_v38 }
 0x211   :  { %v735_v42 = vpop.f32.mrf.mxu0 }
 0x212   :  { %v739_v43 = vmul.f32 0.35355338, %v735_v42  ;;  %v568_v44 = vsel %vm146_vm2, %v567_v41, -inf }
 0x213   :  { %569 = vmax.xlane.f32.xlu0 %v568_v44  ;;  %v2069_v45 = vpop.f32.mrf.mxu0 }
 0x214   :  { %v740_v46 = vadd.f32 %v1927_v28, %v739_v43 }
 0x215   :  { %v908_v47 = vpop.f32.mrf.mxu0 }
 0x216   :  { %v912_v49 = vmul.f32 0.35355338, %v908_v47  ;;  %v741_v50 = vsel %vm146_vm2, %v740_v46, -inf }
 0x217   :  { %742 = vmax.xlane.f32.xlu0 %v741_v50  ;;  %v2079_v51 = vpop.f32.mrf.mxu0 }
 0x218   :  { %v917_v52 = vadd.f32 %v1940_v48, %v912_v49 }
 0x219   :  { %v1080_v53 = vpop.f32.mrf.mxu0 }
 0x21a   :  { %v1084_v54 = vmul.f32 0.35355338, %v1080_v53  ;;  %v918_v55 = vsel %vm146_vm2, %v917_v52, -inf }
 0x21b   :  { %919 = vmax.xlane.f32.xlu1 %v918_v55  ;;  %v2089_v56 = vpop.f32.mrf.mxu0 }
 0x21c   :  { %v1085_v57 = vadd.f32 %v1940_v48, %v1084_v54 }
 0x21d   :  { %v1252_v58 = vpop.f32.mrf.mxu0 }
 0x21e   :  { %v1256_v59 = vmul.f32 0.35355338, %v1252_v58  ;;  %v1086_v60 = vsel %vm146_vm2, %v1085_v57, -inf }
 0x21f   :  { %1087 = vmax.xlane.f32.xlu0 %v1086_v60  ;;  %v2099_v61 = vpop.f32.mrf.mxu0 }
 0x220   :  { %v1257_v62 = vadd.f32 %v1940_v48, %v1256_v59 }
 0x221   :  { %v1424_v63 = vpop.f32.mrf.mxu0 }
 0x222   :  { %v1428_v0 = vmul.f32 0.35355338, %v1424_v63  ;;  %v1258_v1 = vsel %vm146_vm2, %v1257_v62, -inf }
 0x223   :  { %1259 = vmax.xlane.f32.xlu1 %v1258_v1  ;;  %v2109_v3 = vpop.f32.mrf.mxu0 }
 0x224   :  { %v1429_v4 = vadd.f32 %v1940_v48, %v1428_v0 }
 0x226   :  { %v1430_v7 = vsel %vm146_vm2, %v1429_v4, -inf }
 0x227   :  { %1431 = vmax.xlane.f32.xlu0 %v1430_v7 }
 0x234   :  { %752 = vrot.lane.b32.xlu1 %v2342_v10, %s2227_s1 }
 0x23d   :  { %579 = vrot.lane.b32.xlu0 %v2342_v10, %s2228_s21 }
 0x294   :  { %v229_v9 = vpop.xlane.xlu0 %228 }
 0x295   :  { %v230_v12 = vsub.f32 %v226_v31, %v229_v9 }
 0x297   :  { %v231_v13 = vmul.f32 1.442695, %v230_v12 }
 0x298   :  { %v397_v14 = vpop.xlane.xlu1 %396 }
 0x299   :  { %2172 = vpow2.f32 %v231_v13  ;;  %v398_v15 = vsub.f32 %v394_v36, %v397_v14 }
 0x29b   :  { %v399_v16 = vmul.f32 1.442695, %v398_v15 }
 0x29c   :  { %v570_v17 = vpop.xlane.xlu0 %569 }
 0x29d   :  { %2174 = vpow2.f32 %v399_v16  ;;  %v571_v18 = vsub.f32 %v567_v41, %v570_v17 }
 0x29f   :  { %v572_v19 = vmul.f32 1.442695, %v571_v18 }
 0x2a0   :  { %v743_v20 = vpop.xlane.xlu0 %742 }
 0x2a1   :  { %2176 = vpow2.f32 %v572_v19  ;;  %v744_v21 = vsub.f32 %v740_v46, %v743_v20 }
 0x2a3   :  { %v745_v22 = vmul.f32 1.442695, %v744_v21 }
 0x2a4   :  { %v920_v30 = vpop.xlane.xlu1 %919 }
 0x2a5   :  { %2178 = vpow2.f32 %v745_v22  ;;  %v921_v31 = vsub.f32 %v917_v52, %v920_v30  ;;  %v1525_v30 = vld [vmem:[%s2586_s4 + $0x8] sm:$0xff] }
 0x2a6   :  { %v2173_v23 = vpop.eup %2172 }
 0x2a7   :  { %v233_v10 = vsel %vm146_vm2, %v2173_v23, 0.0  ;;  %v922_v35 = vmul.f32 1.442695, %v921_v31 }
 0x2a8   :  { %234 = vadd.xlane.f32.xlu1 %v233_v10  ;;  %v1088_v32 = vpop.xlane.xlu0 %1087 }
 0x2a9   :  { %v1089_v34 = vsub.f32 %v1085_v57, %v1088_v32  ;;  %2180 = vpow2.f32 %v922_v35  ;;  %v1524_v32 = vld [vmem:[%s2586_s4] sm:$0xff] }
 0x2aa   :  { %v2175_v24 = vpop.eup %2174 }
 0x2ab   :  { %v401_v25 = vsel %vm146_vm2, %v2175_v24, 0.0  ;;  %v1090_v38 = vmul.f32 1.442695, %v1089_v34 }
 0x2ac   :  { %402 = vadd.xlane.f32.xlu0 %v401_v25  ;;  %v1260_v33 = vpop.xlane.xlu1 %1259 }
 0x2ad   :  { %v1261_v36 = vsub.f32 %v1257_v62, %v1260_v33  ;;  %2182 = vpow2.f32 %v1090_v38 }
 0x2ae   :  { %v2177_v26 = vpop.eup %2176 }
 0x2af   :  { %v574_v27 = vsel %vm146_vm2, %v2177_v26, 0.0  ;;  %v1262_v39 = vmul.f32 1.442695, %v1261_v36 }
 0x2b0   :  { %575 = vadd.xlane.f32.xlu1 %v574_v27  ;;  %v1432_v37 = vpop.xlane.xlu0 %1431  ;;  %v753_v50 = vpop.permute.xlu1 %752  ;;  %v1527_v27 = vld [vmem:[%s2586_s4 + $0x18] sm:$0xff] }
 0x2b1   :  { %v1433_v40 = vsub.f32 %v1429_v4, %v1432_v37  ;;  %2184 = vpow2.f32 %v1262_v39  ;;  %2115 = vmatprep.subr.mxu0 %v1527_v27 }
 0x2b2   :  { %v2427_v28 = vpop.eup %2178  ;;  %2116 = vmatpush3.msra.mxu0 %v1527_v27  ;;  %v1774_v27 = vld [vmem:[%s2591_s10 + $0x8] sm:$0xff] }
 0x2b3   :  { %v747_v29 = vsel %vm146_vm2, %v2427_v28, 0.0  ;;  %v1434_v41 = vmul.f32 1.442695, %v1433_v40 }
 0x2b4   :  { %748 = vadd.xlane.f32.xlu0 %v747_v29  ;;  %v580_v51 = vpop.permute.xlu0 %579 }
 0x2b5   :  { %2186 = vpow2.f32 %v1434_v41 }
 0x2b6   :  { %v2181_v42 = vpop.eup %2180 }
 0x2b7   :  { %v924_v44 = vsel %vm146_vm2, %v2181_v42, 0.0 }
 0x2ba   :  { %v2435_v43 = vpop.eup %2182 }
 0x2bb   :  { %v1092_v47 = vsel %vm146_vm2, %v2435_v43, 0.0 }
 0x2be   :  { %v2438_v45 = vpop.eup %2184 }
 0x2bf   :  { %v1264_v46 = vsel %vm146_vm2, %v2438_v45, 0.0 }
 0x2c1   :  { %1097 = vrot.lane.b32.xlu1 %v2350_v11, %s2225_s15 }
 0x2c2   :  { %v2444_v48 = vpop.eup %2186 }
 0x2c3   :  { %v1436_v49 = vsel %vm146_vm2, %v2444_v48, 0.0 }
 0x2ca   :  { %929 = vrot.lane.b32.xlu0 %v2350_v11, %s2226_s16 }
 0x2e5   :  { %925 = vadd.xlane.f32.xlu1 %v924_v44 }
 0x2e9   :  { %1265 = vadd.xlane.f32.xlu1 %v1264_v46  ;;  %1093 = vadd.xlane.f32.xlu0 %v1092_v47  ;;  %v1951_v46 = vld [vmem:[%s2587_s5] ss:$0 sm:$0xff] }
 0x2ed   :  { %1437 = vadd.xlane.f32.xlu1 %v1436_v49 }
 0x2fe   :  { %1441 = vrot.lane.b32.xlu1 %v2350_v11, %s2227_s1 }
 0x2ff   :  { %1269 = vrot.lane.b32.xlu0 %v2350_v11, %s2228_s21 }
 0x331   :  { %v235_v52 = vpop.xlane.xlu1 %234 }
 0x332   :  { %2188 = vrcp.f32 %v235_v52 }
 0x335   :  { %v403_v53 = vpop.xlane.xlu0 %402 }
 0x336   :  { %2190 = vrcp.f32 %v403_v53 }
 0x339   :  { %v576_v54 = vpop.xlane.xlu1 %575 }
 0x33a   :  { %2192 = vrcp.f32 %v576_v54 }
 0x33d   :  { %v749_v55 = vpop.xlane.xlu0 %748  ;;  %v1098_v0 = vpop.permute.xlu1 %1097 }
 0x33e   :  { %2194 = vrcp.f32 %v749_v55 }
 0x33f   :  { %v2189_v56 = vpop.eup %2188 }
 0x340   :  { %v237_v57 = vmul.f32 %v2189_v56, %v2173_v23 }
 0x341   :  { %v930_v63 = vpop.permute.xlu0 %929 }
 0x342   :  { %2043 = vmatmul.mubr.msk.f32.vlgmr.msra.gmra.mxu1 %vm146_vm2, %v237_v57 }
 0x343   :  { %v2191_v58 = vpop.eup %2190  ;;  %2051 = vmatpush3.msra.mxu1 %v2422_v8  ;;  %2052 = vmatprep.mubr.msk.f32.mxu1 %vm2217_vm1, %v2216_v6 }
 0x344   :  { %2060 = vmatprep.subr.mxu1 %v2216_v6  ;;  %v405_v11 = vmul.f32 %v2191_v58, %v2175_v24 }
 0x346   :  { %2053 = vmatmul.mubr.msk.f32.vlgmr.msra.gmra.mxu1 %vm146_vm2, %v405_v11 }
 0x347   :  { %v2193_v59 = vpop.eup %2192  ;;  %2061 = vmatpush3.msra.mxu1 %v580_v51  ;;  %2062 = vmatprep.mubr.msk.f32.mxu1 %vm2217_vm1, %v2216_v6 }
 0x348   :  { %2070 = vmatprep.subr.mxu1 %v2216_v6  ;;  %v578_v60 = vmul.f32 %v2193_v59, %v2177_v26 }
 0x34a   :  { %2063 = vmatmul.mubr.msk.f32.vlgmr.msra.gmra.mxu1 %vm146_vm2, %v578_v60 }
 0x34b   :  { %v2195_v61 = vpop.eup %2194  ;;  %2071 = vmatpush3.msra.mxu1 %v753_v50  ;;  %2072 = vmatprep.mubr.msk.f32.mxu1 %vm2217_vm1, %v2216_v6 }
 0x34c   :  { %2080 = vmatprep.subr.mxu1 %v2216_v6  ;;  %v751_v62 = vmul.f32 %v2195_v61, %v2427_v28  ;;  %v1526_v28 = vld [vmem:[%s2586_s4 + $0x10] sm:$0xff] }
 0x34d   :  { %2117 = vmatprep.subr.mxu0 %v1526_v28 }
 0x34e   :  { %2073 = vmatmul.mubr.msk.f32.vlgmr.msra.gmra.mxu1 %vm146_vm2, %v751_v62  ;;  %2118 = vmatpush3.msra.mxu0 %v1526_v28  ;;  %v1773_v28 = vld [vmem:[%s2591_s10] sm:$0xff] }
 0x34f   :  { %2081 = vmatpush3.msra.mxu1 %v930_v63  ;;  %2082 = vmatprep.mubr.msk.f32.mxu1 %vm2217_vm1, %v2216_v6  ;;  %v1665_v63 = vld [vmem:[%s2588_s8 + $0x10] sm:$0xff] }
 0x350   :  { %2090 = vmatprep.subr.mxu1 %v2216_v6  ;;  %2119 = vmatprep.subr.mxu0 %v1525_v30 }
 0x351   :  { %2120 = vmatpush3.msra.mxu0 %v1525_v30 }
 0x352   :  { %2121 = vmatprep.subr.mxu0 %v1524_v32 }
 0x353   :  { %2122 = vmatpush3.msra.mxu0 %v1524_v32 }
 0x36e   :  { %v926_v1 = vpop.xlane.xlu1 %925 }
 0x36f   :  { %2196 = vrcp.f32 %v926_v1  ;;  %v1663_v1 = vld [vmem:[%s2588_s8] sm:$0xff] }
 0x372   :  { %v1266_v3 = vpop.xlane.xlu1 %1265  ;;  %v1094_v4 = vpop.xlane.xlu0 %1093 }
 0x373   :  { %2198 = vrcp.f32 %v1094_v4 }
 0x374   :  { %2200 = vrcp.f32 %v1266_v3 }
 0x376   :  { %v1438_v7 = vpop.xlane.xlu1 %1437  ;;  %v1270_v15 = vpop.permute.xlu0 %1269 }
 0x377   :  { %2202 = vrcp.f32 %v1438_v7 }
 0x37a   :  { %v1442_v18 = vpop.permute.xlu1 %1441 }
 0x37c   :  { %v2197_v8 = vpop.eup %2196 }
 0x37d   :  { %v928_v9 = vmul.f32 %v2197_v8, %v2181_v42 }
 0x37f   :  { %2083 = vmatmul.mubr.msk.f32.vlgmr.msra.gmra.mxu1 %vm146_vm2, %v928_v9 }
 0x380   :  { %2091 = vmatpush3.msra.mxu1 %v1098_v0  ;;  %2092 = vmatprep.mubr.msk.f32.mxu1 %vm2217_vm1, %v2216_v6  ;;  %v2199_v12 = vpop.eup %2198  ;;  %v1664_v0 = vld [vmem:[%s2588_s8 + $0x8] sm:$0xff] }
 0x381   :  { %2100 = vmatprep.subr.mxu1 %v2216_v6  ;;  %v1096_v13 = vmul.f32 %v2199_v12, %v2435_v43  ;;  %v2201_v14 = vpop.eup %2200 }
 0x382   :  { %v1268_v16 = vmul.f32 %v2201_v14, %v2438_v45  ;;  %v1954_v14 = vld [vmem:[%s2589_s6] ss:$0 sm:$0xff] }
 0x383   :  { %2093 = vmatmul.mubr.msk.f32.vlgmr.msra.gmra.mxu1 %vm146_vm2, %v1096_v13 }
 0x384   :  { %2101 = vmatpush3.msra.mxu1 %v1270_v15  ;;  %2102 = vmatprep.mubr.msk.f32.mxu1 %vm2217_vm1, %v2216_v6  ;;  %v2203_v17 = vpop.eup %2202 }
 0x385   :  { %2110 = vmatprep.subr.mxu1 %v2216_v6  ;;  %v1440_v19 = vmul.f32 %v2203_v17, %v2444_v48 }
 0x387   :  { %2103 = vmatmul.mubr.msk.f32.vlgmr.msra.gmra.mxu1 %vm146_vm2, %v1268_v16  ;;  %v1955_v16 = vld [vmem:[%s2590_s7] ss:$0 sm:$0xff] }
 0x388   :  { %2111 = vmatpush3.msra.mxu1 %v1442_v18  ;;  %2112 = vmatprep.mubr.msk.f32.mxu1 %vm2217_vm1, %v2216_v6 }
 0x38b   :  { %2113 = vmatmul.mubr.msk.f32.vlgmr.msra.gmra.mxu1 %vm146_vm2, %v1440_v19 }
 0x402   :  { %v310_v20 = vpop.f32.mrf.mxu1 }
 0x403   :  { %314 = vst.msk [vmem:[#allocation2] sm:$0xff] %vm146_vm2, %v310_v20 }
 0x404   :  { %v2044_v21 = vpop.f32.mrf.mxu1 }
 0x406   :  { %v478_v22 = vpop.f32.mrf.mxu1 }
 0x407   :  { %483 = vrot.lane.b32.xlu0 %v478_v22, %s2229_s22 }
 0x408   :  { %v2054_v23 = vpop.f32.mrf.mxu1 }
 0x409   :  { %v1780_v23 = vld [vmem:[%s2591_s10 + $0x38] sm:$0xff] }
 0x40a   :  { %v651_v10 = vpop.f32.mrf.mxu1  ;;  %2137 = vmatprep.subr.mxu0 %v1780_v23 }
 0x40b   :  { %656 = vrot.lane.b32.xlu1 %v651_v10, %s2230_s23  ;;  %v1779_v10 = vld [vmem:[%s2591_s10 + $0x30] sm:$0xff] }
 0x40c   :  { %v2064_v24 = vpop.f32.mrf.mxu1 }
 0x40d   :  { %v1778_v24 = vld [vmem:[%s2591_s10 + $0x28] sm:$0xff] }
 0x40e   :  { %v824_v25 = vpop.f32.mrf.mxu1 }
 0x40f   :  { %829 = vrot.lane.b32.xlu1 %v824_v25, %s2231_s24  ;;  %v1777_v25 = vld [vmem:[%s2591_s10 + $0x20] sm:$0xff] }
 0x410   :  { %v2074_v6 = vpop.f32.mrf.mxu1 }
 0x411   :  { %v1776_v6 = vld [vmem:[%s2591_s10 + $0x18] sm:$0xff] }
 0x43f   :  { %v1001_v26 = vpop.f32.mrf.mxu1 }
 0x440   :  { %1005 = vst.msk [vmem:[#allocation2 + $0x8] sm:$0xff] %vm146_vm2, %v1001_v26  ;;  %v1775_v26 = vld [vmem:[%s2591_s10 + $0x10] sm:$0xff] }
 0x441   :  { %v2084_v29 = vpop.f32.mrf.mxu1 }
 0x442   :  { %v1956_v29 = vld [vmem:[%s2592_s9] ss:$0 sm:$0xff] }
 0x443   :  { %v1169_v31 = vpop.f32.mrf.mxu1 }
 0x444   :  { %1174 = vrot.lane.b32.xlu0 %v1169_v31, %s2229_s22 }
 0x445   :  { %v2094_v33 = vpop.f32.mrf.mxu1 }
 0x447   :  { %v1341_v34 = vpop.f32.mrf.mxu1 }
 0x448   :  { %1346 = vrot.lane.b32.xlu0 %v1341_v34, %s2230_s23 }
 0x449   :  { %v2104_v35 = vpop.f32.mrf.mxu1 }
 0x44b   :  { %v1513_v36 = vpop.f32.mrf.mxu1 }
 0x44c   :  { %1518 = vrot.lane.b32.xlu1 %v1513_v36, %s2231_s24 }
 0x44d   :  { %v2114_v37 = vpop.f32.mrf.mxu1 }
 0x479   :  { %v484_v38 = vpop.permute.xlu0 %483 }
 0x47a   :  { %487 = vst.msk [vmem:[#allocation2] sm:$0xff] %vm486_vm3, %v484_v38 }
 0x47d   :  { %v657_v39 = vpop.permute.xlu1 %656 }
 0x47e   :  { %660 = vst.msk [vmem:[#allocation2] sm:$0xff] %vm659_vm4, %v657_v39 }
 0x481   :  { %v830_v40 = vpop.permute.xlu1 %829 }
 0x482   :  { %833 = vst.msk [vmem:[#allocation2] sm:$0xff] %vm832_vm5, %v830_v40 }
 0x489   :  { %v1522_v41 = vld [vmem:[#allocation2] sm:$0xff] }
 0x48a   :  { %2123 = vmatprep.mubr.msk.f32.mxu0 %vm60_vm0, %v1522_v41 }
 0x4b6   :  { %v1175_v42 = vpop.permute.xlu0 %1174 }
 0x4b7   :  { %1177 = vst.msk [vmem:[#allocation2 + $0x8] sm:$0xff] %vm486_vm3, %v1175_v42 }
 0x4ba   :  { %v1347_v43 = vpop.permute.xlu0 %1346 }
 0x4bb   :  { %1349 = vst.msk [vmem:[#allocation2 + $0x8] sm:$0xff] %vm659_vm4, %v1347_v43 }
 0x4be   :  { %v1519_v44 = vpop.permute.xlu1 %1518 }
 0x4bf   :  { %1521 = vst.msk [vmem:[#allocation2 + $0x8] sm:$0xff] %vm832_vm5, %v1519_v44 }
 0x4c6   :  { %v1523_v45 = vld [vmem:[#allocation2 + $0x8] sm:$0xff] }
 0x4c7   :  { %2124 = vmatmul.mubr.msk.f32.vlgmr.msra.gmra.mxu0 %vm60_vm0, %v1523_v45 }
 0x4c8   :  { %2138 = vmatpush3.msra.mxu0 %v1780_v23 }
 0x4c9   :  { %2139 = vmatprep.subr.mxu0 %v1779_v10 }
 0x4ca   :  { %2140 = vmatpush3.msra.mxu0 %v1779_v10 }
 0x4cb   :  { %2141 = vmatprep.subr.mxu0 %v1778_v24 }
 0x4cc   :  { %2142 = vmatpush3.msra.mxu0 %v1778_v24 }
 0x4cd   :  { %2143 = vmatprep.subr.mxu0 %v1777_v25 }
 0x4ce   :  { %2144 = vmatpush3.msra.mxu0 %v1777_v25 }
 0x4cf   :  { %2145 = vmatprep.subr.mxu0 %v1776_v6 }
 0x4d0   :  { %2146 = vmatpush3.msra.mxu0 %v1776_v6 }
 0x4d1   :  { %2147 = vmatprep.subr.mxu0 %v1775_v26 }
 0x4d2   :  { %2148 = vmatpush3.msra.mxu0 %v1775_v26 }
 0x4d3   :  { %2149 = vmatprep.subr.mxu0 %v1774_v27 }
 0x4d4   :  { %2150 = vmatpush3.msra.mxu0 %v1774_v27 }
 0x4d5   :  { %2151 = vmatprep.subr.mxu0 %v1773_v28 }
 0x4d6   :  { %2152 = vmatpush3.msra.mxu0 %v1773_v28 }
 0x587   :  { %v2125_v47 = vpop.f32.mrf.mxu0 }
 0x588   :  { %v1613_v48 = vadd.f32 %v2125_v47, %v1951_v46 }
 0x589   :  { %v1607_v49 = vpop.f32.mrf.mxu0 }
 0x58a   :  { %v1608_v50 = vadd.f32 %v1951_v46, %v1607_v49  ;;  %v1617_v51 = vadd.f32 %v1613_v48, %v2329_v5 }
 0x58c   :  { %v1623_v52 = vsel %vm60_vm0, %v1617_v51, 0.0  ;;  %v1616_v53 = vadd.f32 %v1608_v50, %v2316_v2  ;;  %v1666_v2 = vld [vmem:[%s2588_s8 + $0x18] sm:$0xff] }
 0x58d   :  { %1624 = vadd.xlane.f32.xlu1 %v1623_v52  ;;  %2126 = vmatprep.subr.mxu1 %v1666_v2  ;;  %v1959_v52 = vld [vmem:[%s2593_s11] ss:$0 sm:$0xff] }
 0x58e   :  { %v1620_v54 = vsel %vm60_vm0, %v1616_v53, 0.0  ;;  %2127 = vmatpush3.msra.mxu1 %v1666_v2 }
 0x58f   :  { %1621 = vadd.xlane.f32.xlu0 %v1620_v54  ;;  %2128 = vmatprep.subr.mxu1 %v1665_v63 }
 0x590   :  { %2129 = vmatpush3.msra.mxu1 %v1665_v63 }
 0x591   :  { %2130 = vmatprep.subr.mxu1 %v1664_v0 }
 0x592   :  { %2131 = vmatpush3.msra.mxu1 %v1664_v0 }
 0x593   :  { %2132 = vmatprep.subr.mxu1 %v1663_v1 }
 0x594   :  { %2133 = vmatpush3.msra.mxu1 %v1663_v1 }
 0x616   :  { %v1625_v55 = vpop.xlane.xlu1 %1624 }
 0x617   :  { %v1628_v56 = vmul.f32 0.03125, %v1625_v55 }
 0x618   :  { %v1622_v57 = vpop.xlane.xlu0 %1621 }
 0x619   :  { %v1627_v58 = vmul.f32 0.03125, %v1622_v57  ;;  %v1630_v11 = vsub.f32 %v1617_v51, %v1628_v56 }
 0x61b   :  { %v1629_v59 = vsub.f32 %v1616_v53, %v1627_v58  ;;  %v1632_v62 = vmul.f32 %v1630_v11, %v1630_v11 }
 0x61d   :  { %v1631_v60 = vmul.f32 %v1629_v59, %v1629_v59  ;;  %v1636_v5 = vsel %vm60_vm0, %v1632_v62, 0.0 }
 0x61f   :  { %v1633_v61 = vsel %vm60_vm0, %v1631_v60, 0.0 }
 0x620   :  { %1634 = vadd.xlane.f32.xlu0 %v1633_v61 }
 0x624   :  { %1637 = vadd.xlane.f32.xlu0 %v1636_v5 }
 0x6a9   :  { %v1635_v3 = vpop.xlane.xlu0 %1634 }
 0x6aa   :  { %v1639_v4 = vmul.f32 0.03125, %v1635_v3 }
 0x6ac   :  { %v1641_v7 = vadd.f32 1e-12, %v1639_v4 }
 0x6ad   :  { %v1638_v8 = vpop.xlane.xlu0 %1637 }
 0x6ae   :  { %2204 = vrsqrt.f32 %v1641_v7  ;;  %v1640_v9 = vmul.f32 0.03125, %v1638_v8 }
 0x6b0   :  { %v1642_v12 = vadd.f32 1e-12, %v1640_v9 }
 0x6b2   :  { %2206 = vrsqrt.f32 %v1642_v12 }
 0x6bb   :  { %v2205_v13 = vpop.eup %2204 }
 0x6bc   :  { %v1645_v15 = vmul.f32 %v2205_v13, %v1629_v59 }
 0x6be   :  { %v1653_v17 = vmul.f32 %v1954_v14, %v1645_v15 }
 0x6bf   :  { %v2207_v18 = vpop.eup %2206 }
 0x6c0   :  { %v1646_v19 = vmul.f32 %v2207_v18, %v1630_v11  ;;  %v2528_v20 = vadd.f32 %v1955_v16, %v1653_v17 }
 0x6c2   :  { %v1654_v21 = vmul.f32 %v1954_v14, %v1646_v19  ;;  %2134 = vmatprep.mubr.msk.f32.mxu1 %vm60_vm0, %v2528_v20  ;;  %v1963_v19 = vld [vmem:[%s2595_s13] ss:$0 sm:$0xff] }
 0x6c4   :  { %v1662_v22 = vadd.f32 %v1955_v16, %v1654_v21  ;;  %v1962_v16 = vld [vmem:[%s2594_s12] ss:$0 sm:$0xff] }
 0x6c6   :  { %2135 = vmatmul.mubr.msk.f32.vlgmr.msra.gmra.mxu1 %vm60_vm0, %v1662_v22 }
 0x786   :  { %v2136_v30 = vpop.f32.mrf.mxu1 }
 0x787   :  { %v1752_v31 = vadd.f32 %v2136_v30, %v1956_v29 }
 0x788   :  { %v1746_v32 = vpop.f32.mrf.mxu1 }
 0x789   :  { %v1758_v33 = vmul.f32 0.044715, %v1752_v31  ;;  %v1747_v34 = vadd.f32 %v1956_v29, %v1746_v32  ;;  %v1756_v49 = vmul.f32 0.5, %v1752_v31 }
 0x78b   :  { %v1760_v35 = vmul.f32 %v1758_v33, %v1752_v31  ;;  %v1757_v36 = vmul.f32 0.044715, %v1747_v34  ;;  %v1755_v47 = vmul.f32 0.5, %v1747_v34 }
 0x78d   :  { %v1762_v37 = vmul.f32 %v1760_v35, %v1752_v31  ;;  %v1759_v38 = vmul.f32 %v1757_v36, %v1747_v34 }
 0x78f   :  { %v1764_v39 = vadd.f32 %v1762_v37, %v1752_v31  ;;  %v1761_v40 = vmul.f32 %v1759_v38, %v1747_v34 }
 0x791   :  { %v1766_v41 = vmul.f32 0.7978846, %v1764_v39  ;;  %v1763_v42 = vadd.f32 %v1761_v40, %v1747_v34 }
 0x793   :  { %2208 = vtanh.f32 %v1766_v41  ;;  %v1765_v43 = vmul.f32 0.7978846, %v1763_v42 }
 0x795   :  { %2210 = vtanh.f32 %v1765_v43 }
 0x7a0   :  { %v2209_v44 = vpop.eup %2208 }
 0x7a1   :  { %v1770_v46 = vadd.f32 1.0, %v2209_v44 }
 0x7a2   :  { %v2211_v45 = vpop.eup %2210 }
 0x7a3   :  { %v1769_v48 = vadd.f32 1.0, %v2211_v45  ;;  %v1772_v51 = vmul.f32 %v1770_v46, %v1756_v49 }
 0x7a5   :  { %v1771_v50 = vmul.f32 %v1769_v48, %v1755_v47 }
 0x7a7   :  { %2153 = vmatprep.mubr.msk.f32.mxu0 %vm1788_vm6, %v1771_v50 }
 0x7a8   :  { %2154 = vmatmul.mubr.msk.f32.vlgmr.msra.gmra.mxu0 %vm1788_vm6, %v1772_v51 }
 0x868   :  { %v2155_v53 = vpop.f32.mrf.mxu0 }
 0x869   :  { %v1867_v54 = vadd.f32 %v2155_v53, %v1959_v52 }
 0x86a   :  { %v1861_v55 = vpop.f32.mrf.mxu0 }
 0x86b   :  { %v1862_v56 = vadd.f32 %v1959_v52, %v1861_v55  ;;  %v1871_v57 = vadd.f32 %v1867_v54, %v1662_v22 }
 0x86d   :  { %v1877_v58 = vsel %vm60_vm0, %v1871_v57, 0.0  ;;  %v1870_v11 = vadd.f32 %v1862_v56, %v2528_v20 }
 0x86e   :  { %1878 = vadd.xlane.f32.xlu0 %v1877_v58 }
 0x86f   :  { %v1874_v59 = vsel %vm60_vm0, %v1870_v11, 0.0 }
 0x870   :  { %1875 = vadd.xlane.f32.xlu1 %v1874_v59 }
 0x8f7   :  { %v1879_v60 = vpop.xlane.xlu0 %1878 }
 0x8f8   :  { %v1881_v61 = vmul.f32 0.03125, %v1879_v60 }
 0x8f9   :  { %v1876_v62 = vpop.xlane.xlu1 %1875 }
 0x8fa   :  { %v1883_v5 = vsub.f32 %v1871_v57, %v1881_v61  ;;  %v1880_v2 = vmul.f32 0.03125, %v1876_v62 }
 0x8fc   :  { %v1882_v63 = vsub.f32 %v1870_v11, %v1880_v2  ;;  %v1885_v0 = vmul.f32 %v1883_v5, %v1883_v5 }
 0x8fe   :  { %v1889_v1 = vsel %vm60_vm0, %v1885_v0, 0.0  ;;  %v1884_v3 = vmul.f32 %v1882_v63, %v1882_v63 }
 0x8ff   :  { %1890 = vadd.xlane.f32.xlu0 %v1889_v1 }
 0x900   :  { %v1886_v4 = vsel %vm60_vm0, %v1884_v3, 0.0 }
 0x901   :  { %1887 = vadd.xlane.f32.xlu1 %v1886_v4 }
 0x988   :  { %v1891_v7 = vpop.xlane.xlu0 %1890 }
 0x989   :  { %v1893_v8 = vmul.f32 0.03125, %v1891_v7 }
 0x98a   :  { %v1888_v9 = vpop.xlane.xlu1 %1887 }
 0x98b   :  { %v1895_v12 = vadd.f32 1e-12, %v1893_v8  ;;  %v1892_v13 = vmul.f32 0.03125, %v1888_v9 }
 0x98d   :  { %2212 = vrsqrt.f32 %v1895_v12  ;;  %v1894_v14 = vadd.f32 1e-12, %v1892_v13 }
 0x98f   :  { %2214 = vrsqrt.f32 %v1894_v14 }
 0x99a   :  { %v2213_v15 = vpop.eup %2212 }
 0x99b   :  { %v1899_v17 = vmul.f32 %v2213_v15, %v1883_v5 }
 0x99c   :  { %v2215_v18 = vpop.eup %2214 }
 0x99d   :  { %v1907_v20 = vmul.f32 %v1962_v16, %v1899_v17  ;;  %v1898_v21 = vmul.f32 %v2215_v18, %v1882_v63 }
 0x99f   :  { %v1915_v22 = vadd.f32 %v1963_v19, %v1907_v20  ;;  %v1906_v23 = vmul.f32 %v1962_v16, %v1898_v21 }
 0x9a1   :  { %1917 = vst.msk [vmem:[%s2596_s14 + $0x8] sm:$0xff] %vm60_vm0, %v1915_v22  ;;  %v1914_v10 = vadd.f32 %v1963_v19, %v1906_v23 }
 0x9a3   :  { %1916 = vst.msk [vmem:[%s2596_s14] sm:$0xff] %vm60_vm0, %v1914_v10 }

// kernel: forward.11
= control target key start
LH: loop header
LB: loop body
LE: loop exit
PB: predicated region body
PF: predicated region fallthrough
CT: control target
= control target key end

     0   :  { %v271_v2 = vmov 0.0   ;;  %s333_s0 = inlined_call_operand.vmem [shape: f32[2,8,2,32], index: 0, kind: input, shape index: {}]   ;;  %s334_s1 = inlined_call_operand.vmem [shape: f32[64,3], index: 1, kind: input, shape index: {}]   ;;  %s335_s2 = inlined_call_operand.vmem [shape: f32[1,3], index: 2, kind: input, shape index: {}]   ;;  %s336_s3 = inlined_call_operand.hbm [shape: f32[2,3], index: 3, kind: output, shape index: {}]  }
   0x1   :  { %v24_v0 = vld [vmem:[%s334_s1 + $0x38] sm:$0xff]  ;;  %220 = vmatprep.subr.mxu0 %v271_v2  ;;  %231 = vmatprep.subr.mxu1 %v271_v2  ;;  %v23_v3 = vld [vmem:[%s334_s1 + $0x30] sm:$0xff]  ;;  %v22_v5 = vld [vmem:[%s334_s1 + $0x28] sm:$0xff] }
   0x2   :  { %v20_v1 = vld [vmem:[%s334_s1 + $0x18] sm:$0xff]  ;;  %v19_v4 = vld [vmem:[%s334_s1 + $0x10] sm:$0xff]  ;;  %221 = vmatpush3.msra.mxu0 %v24_v0  ;;  %v18_v6 = vld [vmem:[%s334_s1 + $0x8] sm:$0xff] }
   0x3   :  { %232 = vmatpush3.msra.mxu1 %v20_v1  ;;  %222 = vmatprep.subr.mxu0 %v271_v2 }
   0x4   :  { %233 = vmatprep.subr.mxu1 %v271_v2 }
   0x5   :  { %8 = vsyncpa [#allocation3], 0  ;;  %223 = vmatpush3.msra.mxu0 %v23_v3  ;;  %234 = vmatpush3.msra.mxu1 %v19_v4  ;;  %v21_v7 = vld [vmem:[%s334_s1 + $0x20] sm:$0xff]  ;;  %v16_v9 = vld [vmem:[%s333_s0 + $0x1e] sm:$0x3]  ;;  %vm25_vm0 = vcmask 261120  }
   0x6   :  { %224 = vmatprep.subr.mxu0 %v271_v2  ;;  %235 = vmatprep.subr.mxu1 %v271_v2  ;;  %v17_v8 = vld [vmem:[%s334_s1] sm:$0xff]  ;;  %v15_v10 = vld [vmem:[%s333_s0 + $0xe] sm:$0x3]  ;;  %vm272_vm1 = vmmov 0   ;;  %vm180_vm2 = vcmask 17408   ;;  %s273_s0 = smov [#allocation2]  }
   0x7   :  { %225 = vmatpush3.msra.mxu0 %v22_v5  ;;  %236 = vmatpush3.msra.mxu1 %v18_v6  ;;  %v209_v13 = vld [vmem:[%s335_s2] ss:$0 sm:$0xff]  ;;  %s199_s2 = sshll.u32 %s273_s0, 4  ;;  %s200_s2 = int_to_ptr.vmem [resolvable:$true] %s199_s2 }
   0x8   :  { %226 = vmatprep.subr.mxu0 %v271_v2  ;;  %237 = vmatprep.subr.mxu1 %v271_v2  ;;  %s249_s6 = scalar_lea.vmem %s200_s2, 32  ;;  %p254_p1 = scmp.lt.s32.totalorder %s200_s2, %s200_s2 }
   0x9   :  { %227 = vmatpush3.msra.mxu0 %v21_v7  ;;  %228 = vmatprep.mubr.msk.f32.mxu0 %vm272_vm1, %v271_v2  ;;  %p250_p0 = scmp.ne.s32.totalorder %s200_s2, %s249_s6  ;;  %p255_p2 = scmp.lt.s32.totalorder %s249_s6, %s249_s6 }
   0xa   :  { %238 = vmatpush3.msra.mxu1 %v17_v8  ;;  %239 = vmatprep.mubr.msk.f32.mxu1 %vm272_vm1, %v271_v2 }
   0xb   :  { %229 = vmatmul.mubr.msk.f32.vlgmr.msra.gmra.mxu0 %vm25_vm0, %v16_v9  ;;  %240 = vmatmul.mubr.msk.f32.vlgmr.msra.gmra.mxu1 %vm25_vm0, %v15_v10  ;;  %p256_p3 = por %p255_p2, %p254_p1 }
   0xd   :  { %p257_p4 = pnand %p256_p3, %p250_p0 }
  0xcb   :  { %v95_v11 = vpop.f32.mrf.mxu0  ;;  %v168_v12 = vpop.f32.mrf.mxu1 }
  0xcc   :  { %v169_v14 = vadd.f32 %v168_v12, %v95_v11 }
  0xcd   :  { %v230_v15 = vpop.f32.mrf.mxu0  ;;  %v241_v16 = vpop.f32.mrf.mxu1 }
  0xce   :  { %v179_v17 = vadd.f32 %v209_v13, %v169_v14 }
  0xd0   :  { %v181_v18 = vsel %vm180_vm2, %v179_v17, -inf }
  0xd1   :  { %182 = vmax.xlane.f32.xlu0 %v181_v18 }
 0x15a   :  { %v183_v19 = vpop.xlane.xlu0 %182 }
 0x15b   :  { %v184_v20 = vsub.f32 %v179_v17, %v183_v19 }
 0x15d   :  { %v185_v21 = vmul.f32 1.442695, %v184_v20 }
 0x15f   :  { %245 = vpow2.f32 %v185_v21 }
 0x16c   :  { %v246_v22 = vpop.eup %245 }
 0x16d   :  { %v187_v23 = vsel %vm180_vm2, %v246_v22, 0.0 }
 0x16e   :  { %188 = vadd.xlane.f32.xlu0 %v187_v23 }
 0x1f7   :  { %v189_v24 = vpop.xlane.xlu0 %188 }
 0x1f8   :  { %247 = vrcp.f32 %v189_v24 }
 0x205   :  { %v248_v25 = vpop.eup %247 }
 0x206   :  { %v191_v26 = vmul.f32 %v248_v25, %v246_v22 }
 0x208   :  { %192 = vst.msk [vmem:[#allocation2] sm:$0x3] %vm180_vm2, %v191_v26 }
 0x209   :  { %260 = shalt.err (!%p257_p4)
}
 0x20a   :  { %202 = dma.vmem_to_hbm [thread:$0]  %s200_s2, 32, %s336_s3, [#allocation3]  }
 0x20b   :  { %269 = dma.done.wait [#allocation3], 32  }
 0x20c   :  { %270 = vsyncadd [#allocation3], 4294967264 }
 0x20d   :  { %206 = vsyncpa [#allocation3], 1 }

</bundles_post_ra>
